<compile_context>
chip_gen: v7x
topology: tpu7x:2x2x1
jax: 0.10.0
libtpu: 0.0.40
codegen_flags: <defaults>
</compile_context>

<pallas_src>
import functools

import jax
import jax.numpy as jnp
from jax.experimental import pallas as pl
from jax.experimental.pallas import tpu as pltpu


NEG_BIG = -1e9  # finite mask for padded class logits (exp underflows cleanly in f32)


# ----------------------------- kernels ---------------------------------------


def _sage_layer1_kernel(a_ref, xk_ref, xi_ref, invdeg_ref, ws1_ref, wn1_ref, b1_ref,
                        h1_ref, acc_ref):
    """Row tile of: h1 = relu( X @ Ws1 + (invdeg * (A01 @ X)) @ Wn1 + b1 )."""
    k = pl.program_id(1)

    @pl.when(k == 0)
    def _():
        acc_ref[...] = jnp.zeros_like(acc_ref)

    # int8 0/1 adjacency tile -> bf16 (VPU cast; halves the dominant HBM stream).
    a = a_ref[...].astype(jnp.float32).astype(jnp.bfloat16)
    acc_ref[...] += jnp.dot(a, xk_ref[...], preferred_element_type=jnp.float32)

    @pl.when(k == pl.num_programs(1) - 1)
    def _():
        agg = (acc_ref[...] * invdeg_ref[...]).astype(jnp.bfloat16)     # mean aggregation
        h = (jnp.dot(xi_ref[...], ws1_ref[...], preferred_element_type=jnp.float32)
             + jnp.dot(agg, wn1_ref[...], preferred_element_type=jnp.float32)
             + b1_ref[...])
        h1_ref[...] = jnp.maximum(h, 0.0).astype(h1_ref.dtype)          # ReLU (dropout p=0.0)


def _sage_layer2_kernel(a_ref, hk_ref, hi_ref, invdeg_ref, ws2_ref, wn2_ref, b2_ref,
                        o_ref, acc_ref):
    """Row tile of: y = log_softmax( h1 @ Ws2 + (invdeg * (A01 @ h1)) @ Wn2 + b2 )."""
    k = pl.program_id(1)

    @pl.when(k == 0)
    def _():
        acc_ref[...] = jnp.zeros_like(acc_ref)

    a = a_ref[...].astype(jnp.float32).astype(jnp.bfloat16)
    acc_ref[...] += jnp.dot(a, hk_ref[...], preferred_element_type=jnp.float32)

    @pl.when(k == pl.num_programs(1) - 1)
    def _():
        agg = (acc_ref[...] * invdeg_ref[...]).astype(jnp.bfloat16)
        # Padded class columns: zero weights + NEG_BIG bias -> logits ~ -1e9 there.
        logits = (jnp.dot(hi_ref[...], ws2_ref[...], preferred_element_type=jnp.float32)
                  + jnp.dot(agg, wn2_ref[...], preferred_element_type=jnp.float32)
                  + b2_ref[...])
        m = jnp.max(logits, axis=-1, keepdims=True)
        s = logits - m
        lse = jnp.log(jnp.sum(jnp.exp(s), axis=-1, keepdims=True))
        o_ref[...] = (s - lse).astype(o_ref.dtype)                      # lane-dense [tm, 128k]


# ----------------------------- wrapper ----------------------------------------


@functools.partial(jax.jit, static_argnames=("tm", "tk"))
def cluster_gcn_forward(adj, x, w_self1, w_neigh1, b1, w_self2, w_neigh2, b2,
                        *, tm=256, tk=512):
    """adj: dense 0/1 adjacency of the cluster subgraph (any numeric dtype)."""
    n = adj.shape[0]
    fin = x.shape[1]
    nh = w_self1.shape[1]
    nc = w_self2.shape[1]
    nh_pad = 128 * pl.cdiv(nh, 128)           # lane-dense hidden width
    c_pad = 128 * pl.cdiv(nc, 128)            # lane-dense class width

    tm = min(tm, n)
    tk = min(tk, n)
    # Keep >=2 row tiles when possible so both v7x TensorCores get work.
    if n // tm < 2 and n % 2 == 0 and (n // 2) % 32 == 0:
        tm = n // 2
    assert n % tm == 0 and n % tk == 0, "demo shapes must tile evenly"

    bf16 = jnp.bfloat16

    # int8 0/1 adjacency + per-row mean scale (applied to the f32 accumulator in-kernel).
    adj_i8 = (adj != 0).astype(jnp.int8)
    deg = jnp.sum((adj != 0).astype(jnp.float32), axis=1, keepdims=True)
    inv_deg = 1.0 / jnp.maximum(deg, 1.0)                               # (n, 1) f32

    x_bf = x.astype(bf16)

    # Padded (lane-dense) projection weights / biases.
    ws1 = jnp.pad(w_self1, ((0, 0), (0, nh_pad - nh))).astype(bf16)     # [Fin, Hp]
    wn1 = jnp.pad(w_neigh1, ((0, 0), (0, nh_pad - nh))).astype(bf16)    # [Fin, Hp]
    b1p = jnp.pad(b1.astype(jnp.float32).reshape(1, nh),
                  ((0, 0), (0, nh_pad - nh)))                           # [1, Hp]
    ws2 = jnp.pad(w_self2, ((0, nh_pad - nh), (0, c_pad - nc))).astype(bf16)   # [Hp, Cp]
    wn2 = jnp.pad(w_neigh2, ((0, nh_pad - nh), (0, c_pad - nc))).astype(bf16)  # [Hp, Cp]
    b2p = jnp.pad(b2.astype(jnp.float32).reshape(1, nc),
                  ((0, 0), (0, c_pad - nc)), constant_values=NEG_BIG)          # [1, Cp]

    grid = (n // tm, n // tk)
    cparams = pltpu.CompilerParams(
        dimension_semantics=("parallel", "arbitrary"),
        vmem_limit_bytes=48 * 1024 * 1024,   # leave headroom on v7x (64 MiB physical)
    )

    # ---- Layer 1: SAGEConv(in_feats -> n_hidden, 'mean') + ReLU ----
    h1 = pl.pallas_call(
        _sage_layer1_kernel,
        out_shape=jax.ShapeDtypeStruct((n, nh_pad), bf16),
        grid_spec=pltpu.PrefetchScalarGridSpec(
            num_scalar_prefetch=0,
            grid=grid,
            in_specs=[
                pl.BlockSpec((tm, tk), lambda i, k: (i, k)),          # A01 tile (int8)
                pl.BlockSpec((tk, fin), lambda i, k: (k, 0)),         # X (neighbor rows)
                pl.BlockSpec((tm, fin), lambda i, k: (i, 0)),         # X (self rows)
                pl.BlockSpec((tm, 1), lambda i, k: (i, 0)),           # 1/deg
                pl.BlockSpec((fin, nh_pad), lambda i, k: (0, 0)),     # W_self1 (padded)
                pl.BlockSpec((fin, nh_pad), lambda i, k: (0, 0)),     # W_neigh1 (padded)
                pl.BlockSpec((1, nh_pad), lambda i, k: (0, 0)),       # b1 (padded)
            ],
            out_specs=pl.BlockSpec((tm, nh_pad), lambda i, k: (i, 0)),
            scratch_shapes=[pltpu.VMEM((tm, fin), jnp.float32)],
        ),
        compiler_params=cparams,
    )(adj_i8, x_bf, x_bf, inv_deg, ws1, wn1, b1p)

    # ---- Layer 2: SAGEConv(n_hidden -> n_classes, 'mean') + log_softmax ----
    out_padded = pl.pallas_call(
        _sage_layer2_kernel,
        out_shape=jax.ShapeDtypeStruct((n, c_pad), jnp.float32),
        grid_spec=pltpu.PrefetchScalarGridSpec(
            num_scalar_prefetch=0,
            grid=grid,
            in_specs=[
                pl.BlockSpec((tm, tk), lambda i, k: (i, k)),          # A01 tile (int8)
                pl.BlockSpec((tk, nh_pad), lambda i, k: (k, 0)),      # h1 (neighbor rows)
                pl.BlockSpec((tm, nh_pad), lambda i, k: (i, 0)),      # h1 (self rows)
                pl.BlockSpec((tm, 1), lambda i, k: (i, 0)),           # 1/deg
                pl.BlockSpec((nh_pad, c_pad), lambda i, k: (0, 0)),   # W_self2 (padded)
                pl.BlockSpec((nh_pad, c_pad), lambda i, k: (0, 0)),   # W_neigh2 (padded)
                pl.BlockSpec((1, c_pad), lambda i, k: (0, 0)),        # b2 (padded, NEG_BIG mask)
            ],
            out_specs=pl.BlockSpec((tm, c_pad), lambda i, k: (i, 0)),
            scratch_shapes=[pltpu.VMEM((tm, nh_pad), jnp.float32)],
        ),
        compiler_params=cparams,
    )(adj_i8, h1, h1, inv_deg, ws2, wn2, b2p)

    return out_padded[:, :nc]


# ----------------------------- references -------------------------------------


def reference_forward_f32(adj, x, ws1, wn1, b1, ws2, wn2, b2):
    deg = jnp.sum((adj != 0).astype(jnp.float32), axis=1, keepdims=True)
    a = (adj != 0).astype(jnp.float32) / jnp.maximum(deg, 1.0)
    h1 = x @ ws1 + (a @ x) @ wn1 + b1
    h1 = jnp.maximum(h1, 0.0)
    h2 = h1 @ ws2 + (a @ h1) @ wn2 + b2
    return jax.nn.log_softmax(h2, axis=-1)


def reference_forward_matched(adj, x, ws1, wn1, b1, ws2, wn2, b2):
    """Matches the kernel's numerics: bf16 MXU inputs, f32 accum, f32 mean scaling."""
    bf = jnp.bfloat16
    a_b = (adj != 0).astype(jnp.float32).astype(bf)
    deg = jnp.sum((adj != 0).astype(jnp.float32), axis=1, keepdims=True)
    inv_deg = 1.0 / jnp.maximum(deg, 1.0)
    x_b = x.astype(bf)
    agg1 = jnp.dot(a_b, x_b, preferred_element_type=jnp.float32) * inv_deg
    h1 = (jnp.dot(x_b, ws1.astype(bf), preferred_element_type=jnp.float32)
          + jnp.dot(agg1.astype(bf), wn1.astype(bf), preferred_element_type=jnp.float32)
          + b1)
    h1 = jnp.maximum(h1, 0.0).astype(bf)
    agg2 = jnp.dot(a_b, h1, preferred_element_type=jnp.float32) * inv_deg
    h2 = (jnp.dot(h1, ws2.astype(bf), preferred_element_type=jnp.float32)
          + jnp.dot(agg2.astype(bf), wn2.astype(bf), preferred_element_type=jnp.float32)
          + b2)
    return jax.nn.log_softmax(h2, axis=-1)


# ----------------------------- demo / test -------------------------------------


if __name__ == "__main__":
    # Small synthetic cluster-subgraph shapes consistent with ClusterGCN(in_feats, n_hidden, n_classes).
    N = 512           # nodes in a cluster subgraph -> 2 row tiles of 256, single K step of 512
    IN_FEATS = 64
    N_HIDDEN = 32
    N_CLASSES = 8

    key = jax.random.PRNGKey(0)
    k_adj, k_x, k_ws1, k_wn1, k_ws2, k_wn2 = jax.random.split(key, 6)

    # Random sparse-ish graph as dense 0/1 adjacency ('mean' aggregation handles degrees).
    adj = (jax.random.uniform(k_adj, (N, N)) < 0.05).astype(jnp.float32)

    x = jax.random.normal(k_x, (N, IN_FEATS), dtype=jnp.float32)

    def init_w(k, fan_in, fan_out):
        scale = (2.0 / (fan_in + fan_out)) ** 0.5
        return scale * jax.random.normal(k, (fan_in, fan_out), dtype=jnp.float32)

    w_self1 = init_w(k_ws1, IN_FEATS, N_HIDDEN)
    w_neigh1 = init_w(k_wn1, IN_FEATS, N_HIDDEN)
    b1 = jnp.zeros((1, N_HIDDEN), jnp.float32)
    w_self2 = init_w(k_ws2, N_HIDDEN, N_CLASSES)
    w_neigh2 = init_w(k_wn2, N_HIDDEN, N_CLASSES)
    b2 = jnp.zeros((1, N_CLASSES), jnp.float32)

    out = cluster_gcn_forward(adj, x, w_self1, w_neigh1, b1, w_self2, w_neigh2, b2)
    out = jax.block_until_ready(out)
    assert out.shape == (N, N_CLASSES)
    assert bool(jnp.all(jnp.isfinite(out)))

    # Tight check vs a reference with identical bf16-input / f32-accum numerics.
    ref_m = reference_forward_matched(adj, x, w_self1, w_neigh1, b1, w_self2, w_neigh2, b2)
    err_m = float(jnp.max(jnp.abs(out - ref_m)))
    assert err_m < 5e-2, f"mismatch vs matched reference: {err_m}"

    # Loose check vs the full-f32 reference (bf16 matmul inputs -> ~1e-2 level differences).
    ref_f32 = reference_forward_f32(adj, x, w_self1, w_neigh1, b1, w_self2, w_neigh2, b2)
    err_f32 = float(jnp.max(jnp.abs(out - ref_f32)))
    assert err_f32 < 2e-1, f"mismatch vs f32 reference: {err_f32}"

    print("KERNEL_OK")
</pallas_src>

<mosaic_0001>
module attributes {stable_mosaic.version = 11 : i64} {
  func.func @_sage_layer1_kernel(%arg0: i32, %arg1: i32, %arg2: memref<256x512xi8, #tpu.memory_space<vmem>>, %arg3: memref<512x64xbf16, #tpu.memory_space<vmem>>, %arg4: memref<256x64xbf16, #tpu.memory_space<vmem>>, %arg5: memref<256x1xf32, #tpu.memory_space<vmem>>, %arg6: memref<64x128xbf16, #tpu.memory_space<vmem>>, %arg7: memref<64x128xbf16, #tpu.memory_space<vmem>>, %arg8: memref<1x128xf32, #tpu.memory_space<vmem>>, %arg9: memref<256x128xbf16, #tpu.memory_space<vmem>>, %arg10: memref<256x64xf32, #tpu.memory_space<vmem>>) attributes {dimension_semantics = [#tpu.dimension_semantics<parallel>, #tpu.dimension_semantics<arbitrary>], iteration_bounds = array<i64: 2, 1>, scalar_prefetch = 0 : i64, scratch_operands = 1 : i64, tpu.core_type = #tpu.core_type<tc>, window_params = [{transform_indices = @transform_0, window_bounds = array<i64: 256, 512>}, {transform_indices = @transform_1, window_bounds = array<i64: 512, 64>}, {transform_indices = @transform_2, window_bounds = array<i64: 256, 64>}, {transform_indices = @transform_3, window_bounds = array<i64: 256, 1>}, {pipeline_mode = #tpu.pipeline_mode<synchronous>, transform_indices = @transform_4, window_bounds = array<i64: 64, 128>}, {pipeline_mode = #tpu.pipeline_mode<synchronous>, transform_indices = @transform_5, window_bounds = array<i64: 64, 128>}, {pipeline_mode = #tpu.pipeline_mode<synchronous>, transform_indices = @transform_6, window_bounds = array<i64: 1, 128>}, {transform_indices = @transform_7, window_bounds = array<i64: 256, 128>}]} {
    %c0_i32 = arith.constant 0 : i32
    %0 = arith.cmpi eq, %arg1, %c0_i32 : i32
    %1 = arith.extui %0 : i1 to i32
    %c0_i32_0 = arith.constant 0 : i32
    %2 = arith.cmpi ne, %1, %c0_i32_0 : i32
    scf.if %2 {
      %cst_10 = arith.constant 0.000000e+00 : f32
      %14 = vector.broadcast %cst_10 : f32 to vector<256x64xf32>
      %c0_11 = arith.constant 0 : index
      %c0_12 = arith.constant 0 : index
      %15 = vector.load %arg10[%c0_11, %c0_12] : memref<256x64xf32, #tpu.memory_space<vmem>>, vector<256x64xf32>
      tpu.vector_store %arg10[%c0_11, %c0_12], %14 {strides = array<i32>} : memref<256x64xf32, #tpu.memory_space<vmem>>, vector<256x64xf32>,
    } else {
    }
    %c0 = arith.constant 0 : index
    %c0_1 = arith.constant 0 : index
    %3 = vector.load %arg2[%c0, %c0_1] : memref<256x512xi8, #tpu.memory_space<vmem>>, vector<256x512xi8>
    %4 = arith.sitofp %3 : vector<256x512xi8> to vector<256x512xf32>
    %5 = arith.truncf %4 : vector<256x512xf32> to vector<256x512xbf16>
    %c0_2 = arith.constant 0 : index
    %c0_3 = arith.constant 0 : index
    %6 = vector.load %arg10[%c0_2, %c0_3] : memref<256x64xf32, #tpu.memory_space<vmem>>, vector<256x64xf32>
    %c0_4 = arith.constant 0 : index
    %c0_5 = arith.constant 0 : index
    %7 = vector.load %arg3[%c0_4, %c0_5] : memref<512x64xbf16, #tpu.memory_space<vmem>>, vector<512x64xbf16>
    %cst = arith.constant dense<0.000000e+00> : vector<256x64xf32>
    %8 = tpu.matmul %5, %7, %cst {dimension_numbers = #tpu.dot_dimension_numbers<[1], [0], [0], [1], [0, 0, 1, 1], [], []>} : vector<256x512xbf16>, vector<512x64xbf16>, vector<256x64xf32> -> vector<256x64xf32>
    %9 = arith.addf %6, %8 : vector<256x64xf32>
    %c0_6 = arith.constant 0 : index
    %c0_7 = arith.constant 0 : index
    %10 = vector.load %arg10[%c0_6, %c0_7] : memref<256x64xf32, #tpu.memory_space<vmem>>, vector<256x64xf32>
    tpu.vector_store %arg10[%c0_6, %c0_7], %9 {strides = array<i32>} : memref<256x64xf32, #tpu.memory_space<vmem>>, vector<256x64xf32>,
    %c0_i32_8 = arith.constant 0 : i32
    %11 = arith.cmpi eq, %arg1, %c0_i32_8 : i32
    %12 = arith.extui %11 : i1 to i32
    %c0_i32_9 = arith.constant 0 : i32
    %13 = arith.cmpi ne, %12, %c0_i32_9 : i32
    scf.if %13 {
      %c0_10 = arith.constant 0 : index
      %c0_11 = arith.constant 0 : index
      %14 = vector.load %arg10[%c0_10, %c0_11] : memref<256x64xf32, #tpu.memory_space<vmem>>, vector<256x64xf32>
      %c0_12 = arith.constant 0 : index
      %c0_13 = arith.constant 0 : index
      %15 = vector.load %arg5[%c0_12, %c0_13] : memref<256x1xf32, #tpu.memory_space<vmem>>, vector<256x1xf32>
      %16 = vector.broadcast %15 : vector<256x1xf32> to vector<256x64xf32>
      %17 = arith.mulf %14, %16 : vector<256x64xf32>
      %18 = arith.truncf %17 : vector<256x64xf32> to vector<256x64xbf16>
      %c0_14 = arith.constant 0 : index
      %c0_15 = arith.constant 0 : index
      %19 = vector.load %arg4[%c0_14, %c0_15] : memref<256x64xbf16, #tpu.memory_space<vmem>>, vector<256x64xbf16>
      %c0_16 = arith.constant 0 : index
      %c0_17 = arith.constant 0 : index
      %20 = vector.load %arg6[%c0_16, %c0_17] : memref<64x128xbf16, #tpu.memory_space<vmem>>, vector<64x128xbf16>
      %cst_18 = arith.constant dense<0.000000e+00> : vector<256x128xf32>
      %21 = tpu.matmul %19, %20, %cst_18 {dimension_numbers = #tpu.dot_dimension_numbers<[1], [0], [0], [1], [0, 0, 1, 1], [], []>} : vector<256x64xbf16>, vector<64x128xbf16>, vector<256x128xf32> -> vector<256x128xf32>
      %c0_19 = arith.constant 0 : index
      %c0_20 = arith.constant 0 : index
      %22 = vector.load %arg7[%c0_19, %c0_20] : memref<64x128xbf16, #tpu.memory_space<vmem>>, vector<64x128xbf16>
      %cst_21 = arith.constant dense<0.000000e+00> : vector<256x128xf32>
      %23 = tpu.matmul %18, %22, %cst_21 {dimension_numbers = #tpu.dot_dimension_numbers<[1], [0], [0], [1], [0, 0, 1, 1], [], []>} : vector<256x64xbf16>, vector<64x128xbf16>, vector<256x128xf32> -> vector<256x128xf32>
      %24 = arith.addf %21, %23 : vector<256x128xf32>
      %c0_22 = arith.constant 0 : index
      %c0_23 = arith.constant 0 : index
      %25 = vector.load %arg8[%c0_22, %c0_23] : memref<1x128xf32, #tpu.memory_space<vmem>>, vector<1x128xf32>
      %26 = vector.broadcast %25 : vector<1x128xf32> to vector<256x128xf32>
      %27 = arith.addf %24, %26 : vector<256x128xf32>
      %cst_24 = arith.constant 0.000000e+00 : f32
      %28 = vector.broadcast %cst_24 : f32 to vector<256x128xf32>
      %29 = arith.maximumf %27, %28 : vector<256x128xf32>
      %30 = arith.truncf %29 : vector<256x128xf32> to vector<256x128xbf16>
      %c0_25 = arith.constant 0 : index
      %c0_26 = arith.constant 0 : index
      %31 = vector.load %arg9[%c0_25, %c0_26] : memref<256x128xbf16, #tpu.memory_space<vmem>>, vector<256x128xbf16>
      tpu.vector_store %arg9[%c0_25, %c0_26], %30 {strides = array<i32>} : memref<256x128xbf16, #tpu.memory_space<vmem>>, vector<256x128xbf16>,
    } else {
    }
    return
  }
  func.func @transform_0(%arg0: i32, %arg1: i32) -> (i32, i32) {
    %c0_i32 = arith.constant 0 : i32
    return %arg0, %arg1 : i32, i32
  }
  func.func @transform_1(%arg0: i32, %arg1: i32) -> (i32, i32) {
    %c0_i32 = arith.constant 0 : i32
    %c0_i32_0 = arith.constant 0 : i32
    return %arg1, %c0_i32 : i32, i32
  }
  func.func @transform_2(%arg0: i32, %arg1: i32) -> (i32, i32) {
    %c0_i32 = arith.constant 0 : i32
    %c0_i32_0 = arith.constant 0 : i32
    return %arg0, %c0_i32 : i32, i32
  }
  func.func @transform_3(%arg0: i32, %arg1: i32) -> (i32, i32) {
    %c0_i32 = arith.constant 0 : i32
    %c0_i32_0 = arith.constant 0 : i32
    return %arg0, %c0_i32 : i32, i32
  }
  func.func @transform_4(%arg0: i32, %arg1: i32) -> (i32, i32) {
    %c0_i32 = arith.constant 0 : i32
    %c0_i32_0 = arith.constant 0 : i32
    %c0_i32_1 = arith.constant 0 : i32
    return %c0_i32, %c0_i32_0 : i32, i32
  }
  func.func @transform_5(%arg0: i32, %arg1: i32) -> (i32, i32) {
    %c0_i32 = arith.constant 0 : i32
    %c0_i32_0 = arith.constant 0 : i32
    %c0_i32_1 = arith.constant 0 : i32
    return %c0_i32, %c0_i32_0 : i32, i32
  }
  func.func @transform_6(%arg0: i32, %arg1: i32) -> (i32, i32) {
    %c0_i32 = arith.constant 0 : i32
    %c0_i32_0 = arith.constant 0 : i32
    %c0_i32_1 = arith.constant 0 : i32
    return %c0_i32, %c0_i32_0 : i32, i32
  }
  func.func @transform_7(%arg0: i32, %arg1: i32) -> (i32, i32) {
    %c0_i32 = arith.constant 0 : i32
    %c0_i32_0 = arith.constant 0 : i32
    return %arg0, %c0_i32 : i32, i32
  }
}

module attributes {stable_mosaic.version = 11 : i64} {
  func.func @_sage_layer2_kernel(%arg0: i32, %arg1: i32, %arg2: memref<256x512xi8, #tpu.memory_space<vmem>>, %arg3: memref<512x128xbf16, #tpu.memory_space<vmem>>, %arg4: memref<256x128xbf16, #tpu.memory_space<vmem>>, %arg5: memref<256x1xf32, #tpu.memory_space<vmem>>, %arg6: memref<128x128xbf16, #tpu.memory_space<vmem>>, %arg7: memref<128x128xbf16, #tpu.memory_space<vmem>>, %arg8: memref<1x128xf32, #tpu.memory_space<vmem>>, %arg9: memref<256x128xf32, #tpu.memory_space<vmem>>, %arg10: memref<256x128xf32, #tpu.memory_space<vmem>>) attributes {dimension_semantics = [#tpu.dimension_semantics<parallel>, #tpu.dimension_semantics<arbitrary>], iteration_bounds = array<i64: 2, 1>, scalar_prefetch = 0 : i64, scratch_operands = 1 : i64, tpu.core_type = #tpu.core_type<tc>, window_params = [{transform_indices = @transform_0, window_bounds = array<i64: 256, 512>}, {transform_indices = @transform_1, window_bounds = array<i64: 512, 128>}, {transform_indices = @transform_2, window_bounds = array<i64: 256, 128>}, {transform_indices = @transform_3, window_bounds = array<i64: 256, 1>}, {pipeline_mode = #tpu.pipeline_mode<synchronous>, transform_indices = @transform_4, window_bounds = array<i64: 128, 128>}, {pipeline_mode = #tpu.pipeline_mode<synchronous>, transform_indices = @transform_5, window_bounds = array<i64: 128, 128>}, {pipeline_mode = #tpu.pipeline_mode<synchronous>, transform_indices = @transform_6, window_bounds = array<i64: 1, 128>}, {transform_indices = @transform_7, window_bounds = array<i64: 256, 128>}]} {
    %c0_i32 = arith.constant 0 : i32
    %0 = arith.cmpi eq, %arg1, %c0_i32 : i32
    %1 = arith.extui %0 : i1 to i32
    %c0_i32_0 = arith.constant 0 : i32
    %2 = arith.cmpi ne, %1, %c0_i32_0 : i32
    scf.if %2 {
      %cst_10 = arith.constant 0.000000e+00 : f32
      %14 = vector.broadcast %cst_10 : f32 to vector<256x128xf32>
      %c0_11 = arith.constant 0 : index
      %c0_12 = arith.constant 0 : index
      %15 = vector.load %arg10[%c0_11, %c0_12] : memref<256x128xf32, #tpu.memory_space<vmem>>, vector<256x128xf32>
      tpu.vector_store %arg10[%c0_11, %c0_12], %14 {strides = array<i32>} : memref<256x128xf32, #tpu.memory_space<vmem>>, vector<256x128xf32>,
    } else {
    }
    %c0 = arith.constant 0 : index
    %c0_1 = arith.constant 0 : index
    %3 = vector.load %arg2[%c0, %c0_1] : memref<256x512xi8, #tpu.memory_space<vmem>>, vector<256x512xi8>
    %4 = arith.sitofp %3 : vector<256x512xi8> to vector<256x512xf32>
    %5 = arith.truncf %4 : vector<256x512xf32> to vector<256x512xbf16>
    %c0_2 = arith.constant 0 : index
    %c0_3 = arith.constant 0 : index
    %6 = vector.load %arg10[%c0_2, %c0_3] : memref<256x128xf32, #tpu.memory_space<vmem>>, vector<256x128xf32>
    %c0_4 = arith.constant 0 : index
    %c0_5 = arith.constant 0 : index
    %7 = vector.load %arg3[%c0_4, %c0_5] : memref<512x128xbf16, #tpu.memory_space<vmem>>, vector<512x128xbf16>
    %cst = arith.constant dense<0.000000e+00> : vector<256x128xf32>
    %8 = tpu.matmul %5, %7, %cst {dimension_numbers = #tpu.dot_dimension_numbers<[1], [0], [0], [1], [0, 0, 1, 1], [], []>} : vector<256x512xbf16>, vector<512x128xbf16>, vector<256x128xf32> -> vector<256x128xf32>
    %9 = arith.addf %6, %8 : vector<256x128xf32>
    %c0_6 = arith.constant 0 : index
    %c0_7 = arith.constant 0 : index
    %10 = vector.load %arg10[%c0_6, %c0_7] : memref<256x128xf32, #tpu.memory_space<vmem>>, vector<256x128xf32>
    tpu.vector_store %arg10[%c0_6, %c0_7], %9 {strides = array<i32>} : memref<256x128xf32, #tpu.memory_space<vmem>>, vector<256x128xf32>,
    %c0_i32_8 = arith.constant 0 : i32
    %11 = arith.cmpi eq, %arg1, %c0_i32_8 : i32
    %12 = arith.extui %11 : i1 to i32
    %c0_i32_9 = arith.constant 0 : i32
    %13 = arith.cmpi ne, %12, %c0_i32_9 : i32
    scf.if %13 {
      %c0_10 = arith.constant 0 : index
      %c0_11 = arith.constant 0 : index
      %14 = vector.load %arg10[%c0_10, %c0_11] : memref<256x128xf32, #tpu.memory_space<vmem>>, vector<256x128xf32>
      %c0_12 = arith.constant 0 : index
      %c0_13 = arith.constant 0 : index
      %15 = vector.load %arg5[%c0_12, %c0_13] : memref<256x1xf32, #tpu.memory_space<vmem>>, vector<256x1xf32>
      %16 = vector.broadcast %15 : vector<256x1xf32> to vector<256x128xf32>
      %17 = arith.mulf %14, %16 : vector<256x128xf32>
      %18 = arith.truncf %17 : vector<256x128xf32> to vector<256x128xbf16>
      %c0_14 = arith.constant 0 : index
      %c0_15 = arith.constant 0 : index
      %19 = vector.load %arg4[%c0_14, %c0_15] : memref<256x128xbf16, #tpu.memory_space<vmem>>, vector<256x128xbf16>
      %c0_16 = arith.constant 0 : index
      %c0_17 = arith.constant 0 : index
      %20 = vector.load %arg6[%c0_16, %c0_17] : memref<128x128xbf16, #tpu.memory_space<vmem>>, vector<128x128xbf16>
      %cst_18 = arith.constant dense<0.000000e+00> : vector<256x128xf32>
      %21 = tpu.matmul %19, %20, %cst_18 {dimension_numbers = #tpu.dot_dimension_numbers<[1], [0], [0], [1], [0, 0, 1, 1], [], []>} : vector<256x128xbf16>, vector<128x128xbf16>, vector<256x128xf32> -> vector<256x128xf32>
      %c0_19 = arith.constant 0 : index
      %c0_20 = arith.constant 0 : index
      %22 = vector.load %arg7[%c0_19, %c0_20] : memref<128x128xbf16, #tpu.memory_space<vmem>>, vector<128x128xbf16>
      %cst_21 = arith.constant dense<0.000000e+00> : vector<256x128xf32>
      %23 = tpu.matmul %18, %22, %cst_21 {dimension_numbers = #tpu.dot_dimension_numbers<[1], [0], [0], [1], [0, 0, 1, 1], [], []>} : vector<256x128xbf16>, vector<128x128xbf16>, vector<256x128xf32> -> vector<256x128xf32>
      %24 = arith.addf %21, %23 : vector<256x128xf32>
      %c0_22 = arith.constant 0 : index
      %c0_23 = arith.constant 0 : index
      %25 = vector.load %arg8[%c0_22, %c0_23] : memref<1x128xf32, #tpu.memory_space<vmem>>, vector<1x128xf32>
      %26 = vector.broadcast %25 : vector<1x128xf32> to vector<256x128xf32>
      %27 = arith.addf %24, %26 : vector<256x128xf32>
      %cst_24 = arith.constant dense<0xFF800000> : vector<256xf32>
      %28 = vector.multi_reduction <maximumf>, %27, %cst_24 [1] : vector<256x128xf32> to vector<256xf32>
      %29 = vector.shape_cast %28 : vector<256xf32> to vector<256x1xf32>
      %30 = vector.broadcast %29 : vector<256x1xf32> to vector<256x128xf32>
      %31 = arith.subf %27, %30 : vector<256x128xf32>
      %32 = math.exp %31 : vector<256x128xf32>
      %cst_25 = arith.constant dense<0.000000e+00> : vector<256xf32>
      %33 = vector.multi_reduction <add>, %32, %cst_25 [1] : vector<256x128xf32> to vector<256xf32>
      %34 = vector.shape_cast %33 : vector<256xf32> to vector<256x1xf32>
      %35 = math.log %34 : vector<256x1xf32>
      %36 = vector.broadcast %35 : vector<256x1xf32> to vector<256x128xf32>
      %37 = arith.subf %31, %36 : vector<256x128xf32>
      %c0_26 = arith.constant 0 : index
      %c0_27 = arith.constant 0 : index
      %38 = vector.load %arg9[%c0_26, %c0_27] : memref<256x128xf32, #tpu.memory_space<vmem>>, vector<256x128xf32>
      tpu.vector_store %arg9[%c0_26, %c0_27], %37 {strides = array<i32>} : memref<256x128xf32, #tpu.memory_space<vmem>>, vector<256x128xf32>,
    } else {
    }
    return
  }
  func.func @transform_0(%arg0: i32, %arg1: i32) -> (i32, i32) {
    %c0_i32 = arith.constant 0 : i32
    return %arg0, %arg1 : i32, i32
  }
  func.func @transform_1(%arg0: i32, %arg1: i32) -> (i32, i32) {
    %c0_i32 = arith.constant 0 : i32
    %c0_i32_0 = arith.constant 0 : i32
    return %arg1, %c0_i32 : i32, i32
  }
  func.func @transform_2(%arg0: i32, %arg1: i32) -> (i32, i32) {
    %c0_i32 = arith.constant 0 : i32
    %c0_i32_0 = arith.constant 0 : i32
    return %arg0, %c0_i32 : i32, i32
  }
  func.func @transform_3(%arg0: i32, %arg1: i32) -> (i32, i32) {
    %c0_i32 = arith.constant 0 : i32
    %c0_i32_0 = arith.constant 0 : i32
    return %arg0, %c0_i32 : i32, i32
  }
  func.func @transform_4(%arg0: i32, %arg1: i32) -> (i32, i32) {
    %c0_i32 = arith.constant 0 : i32
    %c0_i32_0 = arith.constant 0 : i32
    %c0_i32_1 = arith.constant 0 : i32
    return %c0_i32, %c0_i32_0 : i32, i32
  }
  func.func @transform_5(%arg0: i32, %arg1: i32) -> (i32, i32) {
    %c0_i32 = arith.constant 0 : i32
    %c0_i32_0 = arith.constant 0 : i32
    %c0_i32_1 = arith.constant 0 : i32
    return %c0_i32, %c0_i32_0 : i32, i32
  }
  func.func @transform_6(%arg0: i32, %arg1: i32) -> (i32, i32) {
    %c0_i32 = arith.constant 0 : i32
    %c0_i32_0 = arith.constant 0 : i32
    %c0_i32_1 = arith.constant 0 : i32
    return %c0_i32, %c0_i32_0 : i32, i32
  }
  func.func @transform_7(%arg0: i32, %arg1: i32) -> (i32, i32) {
    %c0_i32 = arith.constant 0 : i32
    %c0_i32_0 = arith.constant 0 : i32
    return %arg0, %c0_i32 : i32, i32
  }
}

</mosaic_0001>

<bundles_post_ra>
// kernel: cluster_gcn_forward.2
= control target key start
LH: loop header
LB: loop body
LE: loop exit
PB: predicated region body
PF: predicated region fallthrough
CT: control target
= control target key end

     0   :  { %s3206_s24 = smov 0   ;;  %s3208_s25 = smov 0   ;;  %s3714_s0 = inlined_call_operand.vmem [shape: s8[512,512], index: 0, kind: input, shape index: {}]   ;;  %s3715_s1 = inlined_call_operand.vmem [shape: bf16[512,64], index: 1, kind: input, shape index: {}, may-alias: {1,2}]   ;;  %s3716_s2 = inlined_call_operand.vmem [shape: bf16[512,64], index: 2, kind: input, shape index: {}, may-alias: {1,2}]   ;;  %s3717_s3 = inlined_call_operand.vmem [shape: f32[512,1], index: 3, kind: input, shape index: {}]   ;;  %s3718_s4 = inlined_call_operand.vmem [shape: bf16[64,128], index: 4, kind: input, shape index: {}]   ;;  %s3719_s5 = inlined_call_operand.vmem [shape: bf16[64,128], index: 5, kind: input, shape index: {}]   ;;  %s3720_s6 = inlined_call_operand.vmem [shape: f32[1,128], index: 6, kind: input, shape index: {}]   ;;  %s3721_s7 = inlined_call_operand.vmem [shape: bf16[512,128], index: 7, kind: output, shape index: {}]  }
   0x1   :  { %s3210_s26 = smov 0  }
   0x2 LB: > { %s29_s27 = sadd.s32 1, %s3158_s25  ;;  %p2403_p0 = scmp.ge.s32.totalorder %s3162_s26, 1  ;;  %s3162_s26 = sphi %s3210_s26, %s17_s26   ;;  %s3158_s25 = sphi %s3208_s25, %s3723_s25   ;;  %s3154_s24 = sphi %s3206_s24, %s3722_s24  }
   0x3   : > { %p31_p1 = scmp.ge.s32.totalorder %s29_s27, 2  ;;  %p291_p2 = scmp.lt.s32.totalorder %s3162_s26, 3 }
   0x5   : > { %s3725_s27 = smov (%p31_p1, %s29_s27), 0  ;;  %p292_p3 = pnand %p2403_p0, %p291_p2 }
   0x6   : > { %v3084_v0 = vld [vmem:[%s3715_s1 + $0x40] sm:$0xff] (!%p292_p3)   ;;  %s2404_s30 = sshll.u32 (!%p292_p3), %s3154_s24, 3  ;;  %v3086_v2 = vld [vmem:[%s3715_s1 + $0x48] sm:$0xff] (!%p292_p3)   ;;  %v3088_v4 = vld [vmem:[%s3715_s1 + $0x50] sm:$0xff] (!%p292_p3)   ;;  %s2407_s19 = sshll.u32 (!%p292_p3), %s3154_s24, 5  ;;  %v3164_v61 = vmov (!%p292_p3), 0  }
   0x7   : > { %295 = sbr.rel (%p292_p3) target bundleno = 742 (0x2e6), region = 48  ;;  %v3085_v1 = vld [vmem:[%s3715_s1] sm:$0xff] (!%p292_p3)   ;;  %3008 = vmatprep.subr.bf16.mxu1 (!%p292_p3), %v3084_v0  ;;  %p345_p4 = scmp.lt.s32.totalorder (!%p292_p3), %s2404_s30, 15  ;;  %2664 = vmatprep.subr.bf16.mxu0 (!%p292_p3), %v3084_v0  ;;  %v3087_v3 = vld [vmem:[%s3715_s1 + $0x8] sm:$0xff] (!%p292_p3)   ;;  %v3089_v5 = vld [vmem:[%s3715_s1 + $0x10] sm:$0xff] (!%p292_p3)   ;;  %vm384_vm0 = vcmask (!%p292_p3), 523264  }
   0x8   : > { %3016 = vmatpush3.bf16.msra.mxu1 (!%p292_p3), %v3085_v1  ;;  %2665 = vmatpush3.bf16.msra.mxu0 (!%p292_p3), %v3085_v1  ;;  %v3090_v6 = vld [vmem:[%s3715_s1 + $0x58] sm:$0xff] (!%p292_p3)   ;;  %v3092_v8 = vld [vmem:[%s3715_s1 + $0x60] sm:$0xff] (!%p292_p3)   ;;  %v3094_v10 = vld [vmem:[%s3715_s1 + $0x68] sm:$0xff] (!%p292_p3)   ;;  %p362_p5 = scmp.lt.s32.totalorder (!%p292_p3), %s2407_s19, 63 }
   0x9   : > { %3009 = vmatprep.subr.bf16.mxu1 (!%p292_p3), %v3086_v2  ;;  %2666 = vmatprep.subr.bf16.mxu0 (!%p292_p3), %v3086_v2  ;;  %v3091_v7 = vld [vmem:[%s3715_s1 + $0x18] sm:$0xff] (!%p292_p3)   ;;  %v3093_v9 = vld [vmem:[%s3715_s1 + $0x20] sm:$0xff] (!%p292_p3)   ;;  %v3095_v13 = vld [vmem:[%s3715_s1 + $0x28] sm:$0xff] (!%p292_p3)  }
   0xa   : > { %v3096_v14 = vld [vmem:[%s3715_s1 + $0x70] sm:$0xff] (!%p292_p3)   ;;  %v3098_v16 = vld [vmem:[%s3715_s1 + $0x78] sm:$0xff] (!%p292_p3)   ;;  %v3100_v19 = vld [vmem:[%s3715_s1 + $0xc0] sm:$0xff] (!%p292_p3)   ;;  %3082 = vset.pattern.permute.xlu0 (!%p292_p3), %v3164_v61  ;;  %3083 = vset.pattern.permute.xlu1 (!%p292_p3), %v3164_v61 }
   0xb   : > { %v3097_v15 = vld [vmem:[%s3715_s1 + $0x30] sm:$0xff] (!%p292_p3)   ;;  %v3099_v17 = vld [vmem:[%s3715_s1 + $0x38] sm:$0xff] (!%p292_p3)   ;;  %v3101_v22 = vld [vmem:[%s3715_s1 + $0x80] sm:$0xff] (!%p292_p3)  }
   0xc   : > { %3017 = vmatpush3.bf16.msra.mxu1 (!%p292_p3), %v3087_v3  ;;  %2667 = vmatpush3.bf16.msra.mxu0 (!%p292_p3), %v3087_v3  ;;  %v3102_v23 = vld [vmem:[%s3715_s1 + $0xc8] sm:$0xff] (!%p292_p3)   ;;  %v3104_v30 = vld [vmem:[%s3715_s1 + $0xd0] sm:$0xff] (!%p292_p3)   ;;  %v3106_v35 = vld [vmem:[%s3715_s1 + $0xd8] sm:$0xff] (!%p292_p3)  }
   0xd   : > { %3010 = vmatprep.subr.bf16.mxu1 (!%p292_p3), %v3088_v4  ;;  %2668 = vmatprep.subr.bf16.mxu0 (!%p292_p3), %v3088_v4  ;;  %v3103_v25 = vld [vmem:[%s3715_s1 + $0x88] sm:$0xff] (!%p292_p3)   ;;  %v3105_v34 = vld [vmem:[%s3715_s1 + $0x90] sm:$0xff] (!%p292_p3)   ;;  %v3107_v38 = vld [vmem:[%s3715_s1 + $0x98] sm:$0xff] (!%p292_p3)  }
   0xe   : > { %s3727_s30 = smov (!%p345_p4, %s2404_s30), 15  ;;  %v3108_v40 = vld [vmem:[%s3715_s1 + $0xe0] sm:$0xff]   ;;  %v3110_v46 = vld [vmem:[%s3715_s1 + $0xe8] sm:$0xff]   ;;  %v3112_v51 = vld [vmem:[%s3715_s1 + $0xf0] sm:$0xff]   ;;  %s3729_s19 = smov (!%p362_p5, %s2407_s19), 63 }
   0xf   : > { %s2536_s20 = sshll.u32 %s3727_s30, 5  ;;  %v3109_v44 = vld [vmem:[%s3715_s1 + $0xa0] sm:$0xff]   ;;  %v3111_v48 = vld [vmem:[%s3715_s1 + $0xa8] sm:$0xff]   ;;  %v3113_v54 = vld [vmem:[%s3715_s1 + $0xb0] sm:$0xff]   ;;  %s2408_s23 = sshll.u32 %s3729_s19, 2 }
  0x10   : > { %3018 = vmatpush3.bf16.msra.mxu1 %v3089_v5  ;;  %2669 = vmatpush3.bf16.msra.mxu0 %v3089_v5  ;;  %s3257_s9 = scalar_lea.vmem %s3714_s0, %s2536_s20  ;;  %v3114_v55 = vld [vmem:[%s3715_s1 + $0xf8] sm:$0xff]   ;;  %s2410_s20 = sshll.u32 %s3729_s19, 3 }
  0x11   : > { %3011 = vmatprep.subr.bf16.mxu1 %v3090_v6  ;;  %2670 = vmatprep.subr.bf16.mxu0 %v3090_v6  ;;  %v434_v11 = vld [vmem:[%s3257_s9 + $0x88] sm:$0xff]  ;;  %v433_v18 = vld [vmem:[%s3257_s9 + $0x80] sm:$0xff]  ;;  %v3115_v59 = vld [vmem:[%s3715_s1 + $0xb8] sm:$0xff]   ;;  %s3347_s22 = scalar_lea.vmem %s3717_s3, %s2410_s20  ;;  %s3358_s8 = scalar_lea.vmem %s3716_s2, %s2408_s23 }
  0x12   : > { %v482_v12 = vunpack.c.l.s8.bf16 %v434_v11  ;;  %v481_v20 = vunpack.c.l.s8.bf16 %v433_v18  ;;  %v486_v21 = vunpack.c.h.s8.bf16 %v434_v11  ;;  %v418_v24 = vld [vmem:[%s3257_s9 + $0x8] sm:$0xff]  ;;  %v417_v28 = vld [vmem:[%s3257_s9] sm:$0xff]  ;;  %v485_v32 = vunpack.c.h.s8.bf16 %v433_v18  ;;  %v1225_v3 = vld [vmem:[%s3347_s22 + $0x10] sm:$0xff]  ;;  %s3659_s11 = scalar_lea.vmem %s3721_s7, %s2408_s23 }
  0x13   : > { %v450_v26 = vunpack.c.l.s8.bf16 %v418_v24  ;;  %v454_v27 = vunpack.c.h.s8.bf16 %v418_v24  ;;  %v438_v29 = vld [vmem:[%s3257_s9 + $0xa8] sm:$0xff]  ;;  %v449_v31 = vunpack.c.l.s8.bf16 %v417_v28  ;;  %v437_v37 = vld [vmem:[%s3257_s9 + $0xa0] sm:$0xff]  ;;  %v453_v39 = vunpack.c.h.s8.bf16 %v417_v28  ;;  %1267 = vperm.xlu1 %3083, %v1225_v3   ;;  %v1226_v11 = vld [vmem:[%s3347_s22 + $0x18] sm:$0xff] }
  0x14   : > { %3019 = vmatpush3.bf16.msra.mxu1 %v3091_v7  ;;  %2671 = vmatpush3.bf16.msra.mxu0 %v3091_v7  ;;  %v490_v33 = vunpack.c.l.s8.bf16 %v438_v29  ;;  %v422_v36 = vld [vmem:[%s3257_s9 + $0x28] sm:$0xff]  ;;  %v489_v42 = vunpack.c.l.s8.bf16 %v437_v37  ;;  %v494_v43 = vunpack.c.h.s8.bf16 %v438_v29  ;;  %v421_v45 = vld [vmem:[%s3257_s9 + $0x20] sm:$0xff]  ;;  %v493_v52 = vunpack.c.h.s8.bf16 %v437_v37  ;;  %v420_v24 = vld [vmem:[%s3257_s9 + $0x18] sm:$0xff] }
  0x15   : > { %3012 = vmatprep.subr.bf16.mxu1 %v3092_v8  ;;  %2672 = vmatprep.subr.bf16.mxu0 %v3092_v8  ;;  %v458_v41 = vunpack.c.l.s8.bf16 %v422_v36  ;;  %v457_v47 = vunpack.c.l.s8.bf16 %v421_v45  ;;  %v462_v49 = vunpack.c.h.s8.bf16 %v422_v36  ;;  %v442_v50 = vld [vmem:[%s3257_s9 + $0xc8] sm:$0xff]  ;;  %v461_v57 = vunpack.c.h.s8.bf16 %v421_v45  ;;  %v441_v58 = vld [vmem:[%s3257_s9 + $0xc0] sm:$0xff]  ;;  %v1233_v28 = vld [vmem:[%s3347_s22 + $0x50] sm:$0xff] }
  0x16   : > { %897 = vmatprep.mubr.bf16.mxu1 %v482_v12  ;;  %833 = vmatprep.mubr.bf16.mxu0 %v450_v26  ;;  %v498_v53 = vunpack.c.l.s8.bf16 %v442_v50  ;;  %v426_v56 = vld [vmem:[%s3257_s9 + $0x48] sm:$0xff]  ;;  %v497_v62 = vunpack.c.l.s8.bf16 %v441_v58  ;;  %v502_v63 = vunpack.c.h.s8.bf16 %v442_v50  ;;  %v425_v0 = vld [vmem:[%s3257_s9 + $0x40] sm:$0xff]  ;;  %v501_v7 = vunpack.c.h.s8.bf16 %v441_v58  ;;  %v1237_v36 = vld [vmem:[%s3347_s22 + $0x70] sm:$0xff] }
  0x17   : > { %v466_v60 = vunpack.c.l.s8.bf16 %v426_v56  ;;  %v465_v1 = vunpack.c.l.s8.bf16 %v425_v0  ;;  %v1223_v2 = vld [vmem:[%s3347_s22] sm:$0xff]  ;;  %v446_v4 = vld [vmem:[%s3257_s9 + $0xe8] sm:$0xff]  ;;  %v470_v5 = vunpack.c.h.s8.bf16 %v426_v56  ;;  %1272 = vperm.xlu1 %3083, %v1226_v11   ;;  %v1238_v37 = vld [vmem:[%s3347_s22 + $0x78] sm:$0xff] }
  0x18   : > { %3020 = vmatpush3.bf16.msra.mxu1 %v3093_v9  ;;  %2673 = vmatpush3.bf16.msra.mxu0 %v3093_v9  ;;  %v1224_v6 = vld [vmem:[%s3347_s22 + $0x8] sm:$0xff]  ;;  %v506_v9 = vunpack.c.l.s8.bf16 %v446_v4  ;;  %v1227_v12 = vld [vmem:[%s3347_s22 + $0x20] sm:$0xff]  ;;  %v510_v18 = vunpack.c.h.s8.bf16 %v446_v4  ;;  %v423_v45 = vld [vmem:[%s3257_s9 + $0x30] sm:$0xff] }
  0x19   : > { %3013 = vmatprep.subr.bf16.mxu1 %v3094_v10  ;;  %2674 = vmatprep.subr.bf16.mxu0 %v3094_v10  ;;  %v430_v8 = vld [vmem:[%s3257_s9 + $0x68] sm:$0xff]  ;;  %v469_v10 = vunpack.c.h.s8.bf16 %v425_v0  ;;  %v1245_v50 = vld [vmem:[%s3347_s22 + $0xb0] sm:$0xff]  ;;  %v1250_v58 = vld [vmem:[%s3347_s22 + $0xd8] sm:$0xff] }
  0x1a   : > { %1257 = vperm.xlu0 %3082, %v1223_v2   ;;  %v1253_v0 = vld [vmem:[%s3347_s22 + $0xf0] sm:$0xff]  ;;  %v432_v2 = vld [vmem:[%s3257_s9 + $0x78] sm:$0xff] }
  0x1b   : > { %v476_v4 = vunpack.c.l.s8.bf16 %v432_v2  ;;  %v435_v11 = vld [vmem:[%s3257_s9 + $0x90] sm:$0xff] }
  0x1c   : > { %3021 = vmatpush3.bf16.msra.mxu1 %v3095_v13  ;;  %2675 = vmatpush3.bf16.msra.mxu0 %v3095_v13  ;;  %v445_v13 = vld [vmem:[%s3257_s9 + $0xe0] sm:$0xff] }
  0x1d   : > { %3014 = vmatprep.subr.bf16.mxu1 %v3096_v14  ;;  %2676 = vmatprep.subr.bf16.mxu0 %v3096_v14  ;;  %v474_v14 = vunpack.c.l.s8.bf16 %v430_v8  ;;  %v509_v26 = vunpack.c.h.s8.bf16 %v445_v13 }
  0x1e   : > { %1262 = vperm.xlu0 %3082, %v1224_v6  }
  0x20   : > { %3022 = vmatpush3.bf16.msra.mxu1 %v3097_v15  ;;  %2677 = vmatpush3.bf16.msra.mxu0 %v3097_v15  ;;  %v1228_v15 = vld [vmem:[%s3347_s22 + $0x28] sm:$0xff] }
  0x21   : > { %3015 = vmatprep.subr.bf16.mxu1 %v3098_v16  ;;  %2678 = vmatprep.subr.bf16.mxu0 %v3098_v16  ;;  %v429_v16 = vld [vmem:[%s3257_s9 + $0x60] sm:$0xff] }
  0x22   : > { %1277 = vperm.xlu0 %3082, %v1227_v12   ;;  %1282 = vperm.xlu1 %3083, %v1228_v15   ;;  %v477_v29 = vunpack.c.h.s8.bf16 %v429_v16  ;;  %v483_v12 = vunpack.c.l.s8.bf16 %v435_v11  ;;  %v487_v15 = vunpack.c.h.s8.bf16 %v435_v11 }
  0x24   : > { %3023 = vmatpush3.bf16.msra.mxu1 %v3099_v17  ;;  %2679 = vmatpush3.bf16.msra.mxu0 %v3099_v17  ;;  %v505_v17 = vunpack.c.l.s8.bf16 %v445_v13 }
  0x25   : > { %2776 = vmatprep.subr.bf16.mxu1 %v3100_v19  ;;  %v1229_v19 = vld [vmem:[%s3347_s22 + $0x30] sm:$0xff] }
  0x26   : > { %1287 = vperm.xlu0 %3082, %v1229_v19  }
  0x27   : > { %898 = vmatmul.mubr.bf16.vlgmr.msra.gmra.mrb[0].mxu1 %v481_v20  ;;  %834 = vmatmul.mubr.bf16.vlgmr.msra.gmra.mrb[0].mxu0 %v449_v31  ;;  %v473_v20 = vunpack.c.l.s8.bf16 %v429_v16  ;;  %v419_v31 = vld [vmem:[%s3257_s9 + $0x10] sm:$0xff] }
  0x28   : > { %2777 = vmatpush3.bf16.msra.mxu1 %v3101_v22  ;;  %905 = vmatprep.mubr.bf16.mxu1 %v486_v21  ;;  %v1230_v21 = vld [vmem:[%s3347_s22 + $0x38] sm:$0xff]  ;;  %v478_v22 = vunpack.c.h.s8.bf16 %v430_v8 }
  0x29   : > { %2778 = vmatprep.subr.bf16.mxu1 %v3102_v23  ;;  %841 = vmatprep.mubr.bf16.mxu0 %v454_v27  ;;  %v1231_v23 = vld [vmem:[%s3347_s22 + $0x40] sm:$0xff]  ;;  %v452_v27 = vunpack.c.l.s8.bf16 %v420_v24  ;;  %v436_v8 = vld [vmem:[%s3257_s9 + $0x98] sm:$0xff] }
  0x2a   : > { %1292 = vperm.xlu1 %3083, %v1230_v21   ;;  %1297 = vperm.xlu0 %3082, %v1231_v23   ;;  %v488_v13 = vunpack.c.h.s8.bf16 %v436_v8  ;;  %v444_v21 = vld [vmem:[%s3257_s9 + $0xd8] sm:$0xff] }
  0x2b   : > { %v500_v23 = vunpack.c.l.s8.bf16 %v444_v21 }
  0x2c   : > { %2779 = vmatpush3.bf16.msra.mxu1 %v3103_v25  ;;  %v1232_v25 = vld [vmem:[%s3347_s22 + $0x48] sm:$0xff] }
  0x2d   : > { %2780 = vmatprep.subr.bf16.mxu1 %v3104_v30  ;;  %v1234_v30 = vld [vmem:[%s3347_s22 + $0x58] sm:$0xff] }
  0x2e   : > { %1302 = vperm.xlu1 %3083, %v1232_v25   ;;  %1307 = vperm.xlu0 %3082, %v1233_v28   ;;  %v448_v28 = vld [vmem:[%s3257_s9 + $0xf8] sm:$0xff] }
  0x2f   : > { %906 = vmatmul.mubr.bf16.gmra.mrb[4].mxu1 %v485_v32  ;;  %842 = vmatmul.mubr.bf16.gmra.mrb[4].mxu0 %v453_v39  ;;  %v1235_v32 = vld [vmem:[%s3347_s22 + $0x60] sm:$0xff]  ;;  %v424_v39 = vld [vmem:[%s3257_s9 + $0x38] sm:$0xff] }
  0x30   : > { %913 = vmatprep.mubr.bf16.mxu1 %v490_v33  ;;  %2781 = vmatpush3.bf16.msra.mxu1 %v3105_v34  ;;  %v1236_v33 = vld [vmem:[%s3347_s22 + $0x68] sm:$0xff]  ;;  %v451_v34 = vunpack.c.l.s8.bf16 %v419_v31 }
  0x31   : > { %2782 = vmatprep.subr.bf16.mxu1 %v3106_v35  ;;  %849 = vmatprep.mubr.bf16.mxu0 %v458_v41  ;;  %v456_v35 = vunpack.c.h.s8.bf16 %v420_v24  ;;  %v455_v41 = vunpack.c.h.s8.bf16 %v419_v31  ;;  %v443_v24 = vld [vmem:[%s3257_s9 + $0xd0] sm:$0xff]  ;;  %v508_v31 = vunpack.c.l.s8.bf16 %v448_v28 }
  0x32   : > { %1312 = vperm.xlu1 %3083, %v1234_v30   ;;  %1317 = vperm.xlu0 %3082, %v1235_v32   ;;  %v499_v25 = vunpack.c.l.s8.bf16 %v443_v24  ;;  %v503_v30 = vunpack.c.h.s8.bf16 %v443_v24  ;;  %v3118_v32 = vld [vmem:[%s3719_s5 + $0x10] sm:$0xff]  }
  0x34   : > { %2783 = vmatpush3.bf16.msra.mxu1 %v3107_v38  ;;  %v1239_v38 = vld [vmem:[%s3347_s22 + $0x80] sm:$0xff] }
  0x35   : > { %2784 = vmatprep.subr.bf16.mxu1 %v3108_v40  ;;  %v1240_v40 = vld [vmem:[%s3347_s22 + $0x88] sm:$0xff] }
  0x36   : > { %1322 = vperm.xlu1 %3083, %v1236_v33   ;;  %1327 = vperm.xlu0 %3082, %v1237_v36   ;;  %v447_v33 = vld [vmem:[%s3257_s9 + $0xf0] sm:$0xff]  ;;  %v512_v36 = vunpack.c.h.s8.bf16 %v448_v28 }
  0x37   : > { %914 = vmatmul.mubr.bf16.gmra.mrb[8].mxu1 %v489_v42  ;;  %850 = vmatmul.mubr.bf16.gmra.mrb[8].mxu0 %v457_v47  ;;  %v460_v42 = vunpack.c.l.s8.bf16 %v424_v39  ;;  %v1244_v47 = vld [vmem:[%s3347_s22 + $0xa8] sm:$0xff] }
  0x38   : > { %921 = vmatprep.mubr.bf16.mxu1 %v494_v43  ;;  %2785 = vmatpush3.bf16.msra.mxu1 %v3109_v44  ;;  %v1241_v43 = vld [vmem:[%s3347_s22 + $0x90] sm:$0xff]  ;;  %v1242_v44 = vld [vmem:[%s3347_s22 + $0x98] sm:$0xff] }
  0x39   : > { %2786 = vmatprep.subr.bf16.mxu1 %v3110_v46  ;;  %857 = vmatprep.mubr.bf16.mxu0 %v462_v49  ;;  %v1243_v46 = vld [vmem:[%s3347_s22 + $0xa0] sm:$0xff]  ;;  %v464_v49 = vunpack.c.h.s8.bf16 %v424_v39 }
  0x3a   : > { %1332 = vperm.xlu1 %3083, %v1238_v37   ;;  %1337 = vperm.xlu0 %3082, %v1239_v38   ;;  %v511_v37 = vunpack.c.h.s8.bf16 %v447_v33 }
  0x3c   : > { %2787 = vmatpush3.bf16.msra.mxu1 %v3111_v48  ;;  %v459_v48 = vunpack.c.l.s8.bf16 %v423_v45 }
  0x3d   : > { %2788 = vmatprep.subr.bf16.mxu1 %v3112_v51  ;;  %v1246_v51 = vld [vmem:[%s3347_s22 + $0xb8] sm:$0xff] }
  0x3e   : > { %1342 = vperm.xlu1 %3083, %v1240_v40   ;;  %1347 = vperm.xlu0 %3082, %v1241_v43  }
  0x3f   : > { %922 = vmatmul.mubr.bf16.gmra.mrb[12].mxu1 %v493_v52  ;;  %858 = vmatmul.mubr.bf16.gmra.mrb[12].mxu0 %v461_v57  ;;  %v428_v52 = vld [vmem:[%s3257_s9 + $0x58] sm:$0xff]  ;;  %v1249_v57 = vld [vmem:[%s3347_s22 + $0xd0] sm:$0xff] }
  0x40   : > { %929 = vmatprep.mubr.bf16.mxu1 %v498_v53  ;;  %2789 = vmatpush3.bf16.msra.mxu1 %v3113_v54  ;;  %v1247_v53 = vld [vmem:[%s3347_s22 + $0xc0] sm:$0xff]  ;;  %v463_v54 = vunpack.c.h.s8.bf16 %v423_v45  ;;  %v468_v56 = vunpack.c.l.s8.bf16 %v428_v52 }
  0x41   : > { %2790 = vmatprep.subr.bf16.mxu1 %v3114_v55  ;;  %865 = vmatprep.mubr.bf16.mxu0 %v466_v60  ;;  %v1248_v55 = vld [vmem:[%s3347_s22 + $0xc8] sm:$0xff]  ;;  %v1251_v60 = vld [vmem:[%s3347_s22 + $0xe0] sm:$0xff] }
  0x42   : > { %1352 = vperm.xlu1 %3083, %v1242_v44   ;;  %1357 = vperm.xlu0 %3082, %v1243_v46  }
  0x44   : > { %2791 = vmatpush3.bf16.msra.mxu1 %v3115_v59  ;;  %v427_v59 = vld [vmem:[%s3257_s9 + $0x50] sm:$0xff] }
  0x45   : > { %v467_v61 = vunpack.c.l.s8.bf16 %v427_v59  ;;  %v471_v3 = vunpack.c.h.s8.bf16 %v427_v59 }
  0x46   : > { %1362 = vperm.xlu1 %3083, %v1244_v47   ;;  %1367 = vperm.xlu0 %3082, %v1245_v50  }
  0x47   : > { %930 = vmatmul.mubr.bf16.gmra.mrb[16].mxu1 %v497_v62  ;;  %866 = vmatmul.mubr.bf16.gmra.mrb[16].mxu0 %v465_v1  ;;  %v1252_v62 = vld [vmem:[%s3347_s22 + $0xe8] sm:$0xff]  ;;  %v1254_v1 = vld [vmem:[%s3347_s22 + $0xf8] sm:$0xff] }
  0x48   : > { %937 = vmatprep.mubr.bf16.mxu1 %v502_v63  ;;  %873 = vmatprep.mubr.bf16.mxu0 %v470_v5  ;;  %v472_v63 = vunpack.c.h.s8.bf16 %v428_v52  ;;  %v431_v5 = vld [vmem:[%s3257_s9 + $0x70] sm:$0xff] }
  0x49   : > { %v475_v6 = vunpack.c.l.s8.bf16 %v431_v5 }
  0x4a   : > { %1372 = vperm.xlu1 %3083, %v1246_v51   ;;  %1377 = vperm.xlu0 %3082, %v1247_v53  }
  0x4e   : > { %1382 = vperm.xlu1 %3083, %v1248_v55   ;;  %1387 = vperm.xlu0 %3082, %v1249_v57  }
  0x4f   : > { %938 = vmatmul.mubr.bf16.gmra.mrb[20].mxu1 %v501_v7  ;;  %874 = vmatmul.mubr.bf16.gmra.mrb[20].mxu0 %v469_v10  ;;  %v480_v7 = vunpack.c.h.s8.bf16 %v432_v2  ;;  %v484_v10 = vunpack.c.l.s8.bf16 %v436_v8 }
  0x50   : > { %945 = vmatprep.mubr.bf16.mxu1 %v506_v9  ;;  %881 = vmatprep.mubr.bf16.mxu0 %v474_v14  ;;  %v479_v9 = vunpack.c.h.s8.bf16 %v431_v5  ;;  %v440_v14 = vld [vmem:[%s3257_s9 + $0xb8] sm:$0xff] }
  0x51   : > { %v492_v16 = vunpack.c.l.s8.bf16 %v440_v14  ;;  %v496_v19 = vunpack.c.h.s8.bf16 %v440_v14  ;;  %v3482_v14 = vld [vmem:[%s3718_s4] sm:$0xff]  }
  0x52   : > { %1392 = vperm.xlu1 %3083, %v1250_v58   ;;  %1397 = vperm.xlu0 %3082, %v1251_v60  }
  0x56   : > { %1402 = vperm.xlu1 %3083, %v1252_v62   ;;  %1407 = vperm.xlu0 %3082, %v1253_v0  }
  0x57   : > { %946 = vmatmul.mubr.bf16.gmra.mrb[24].mxu1 %v505_v17  ;;  %882 = vmatmul.mubr.bf16.gmra.mrb[24].mxu0 %v473_v20  ;;  %v439_v17 = vld [vmem:[%s3257_s9 + $0xb0] sm:$0xff]  ;;  %v3165_v20 = vmov 0.0  }
  0x58   : > { %953 = vmatprep.mubr.bf16.mxu1 %v510_v18  ;;  %889 = vmatprep.mubr.bf16.mxu0 %v478_v22  ;;  %v491_v18 = vunpack.c.l.s8.bf16 %v439_v17  ;;  %385 = vst.msk [vmem:[#allocation2] sm:$0xff] %vm384_vm0, %v3165_v20  ;;  %386 = vst.msk [vmem:[#allocation2 + $0x8] sm:$0xff] %vm384_vm0, %v3165_v20  ;;  %v495_v22 = vunpack.c.h.s8.bf16 %v439_v17 }
  0x59   : > { %387 = vst.msk [vmem:[#allocation2 + $0x10] sm:$0xff] %vm384_vm0, %v3165_v20  ;;  %388 = vst.msk [vmem:[#allocation2 + $0x18] sm:$0xff] %vm384_vm0, %v3165_v20 }
  0x5a   : > { %1412 = vperm.xlu1 %3083, %v1254_v1   ;;  %389 = vst.msk [vmem:[#allocation2 + $0x20] sm:$0xff] %vm384_vm0, %v3165_v20  ;;  %390 = vst.msk [vmem:[#allocation2 + $0x28] sm:$0xff] %vm384_vm0, %v3165_v20 }
  0x5b   : > { %391 = vst.msk [vmem:[#allocation2 + $0x30] sm:$0xff] %vm384_vm0, %v3165_v20  ;;  %392 = vst.msk [vmem:[#allocation2 + $0x38] sm:$0xff] %vm384_vm0, %v3165_v20 }
  0x5c   : > { %393 = vst.msk [vmem:[#allocation2 + $0x40] sm:$0xff] %vm384_vm0, %v3165_v20  ;;  %394 = vst.msk [vmem:[#allocation2 + $0x48] sm:$0xff] %vm384_vm0, %v3165_v20 }
  0x5d   : > { %395 = vst.msk [vmem:[#allocation2 + $0x50] sm:$0xff] %vm384_vm0, %v3165_v20  ;;  %396 = vst.msk [vmem:[#allocation2 + $0x58] sm:$0xff] %vm384_vm0, %v3165_v20 }
  0x5e   : > { %397 = vst.msk [vmem:[#allocation2 + $0x60] sm:$0xff] %vm384_vm0, %v3165_v20  ;;  %398 = vst.msk [vmem:[#allocation2 + $0x68] sm:$0xff] %vm384_vm0, %v3165_v20 }
  0x5f   : > { %954 = vmatmul.mubr.bf16.gmra.mrb[28].mxu1 %v509_v26  ;;  %890 = vmatmul.mubr.bf16.gmra.mrb[28].mxu0 %v477_v29  ;;  %399 = vst.msk [vmem:[#allocation2 + $0x70] sm:$0xff] %vm384_vm0, %v3165_v20  ;;  %400 = vst.msk [vmem:[#allocation2 + $0x78] sm:$0xff] %vm384_vm0, %v3165_v20  ;;  %v504_v26 = vunpack.c.h.s8.bf16 %v444_v21  ;;  %v3117_v29 = vld [vmem:[%s3719_s5 + $0x8] sm:$0xff]  }
  0x60   : > { %994 = vmatprep.mubr.bf16.mxu1 %v452_v27  ;;  %401 = vst.msk [vmem:[#allocation2 + $0x80] sm:$0xff] %vm384_vm0, %v3165_v20  ;;  %402 = vst.msk [vmem:[#allocation2 + $0x88] sm:$0xff] %vm384_vm0, %v3165_v20  ;;  %v3116_v27 = vld [vmem:[%s3719_s5] sm:$0xff]  }
  0x61   : > { %403 = vst.msk [vmem:[#allocation2 + $0x90] sm:$0xff] %vm384_vm0, %v3165_v20  ;;  %404 = vst.msk [vmem:[#allocation2 + $0x98] sm:$0xff] %vm384_vm0, %v3165_v20  ;;  %2928 = vmatprep.subr.bf16.mxu0 %v3116_v27 }
  0x62   : > { %405 = vst.msk [vmem:[#allocation2 + $0xa0] sm:$0xff] %vm384_vm0, %v3165_v20  ;;  %406 = vst.msk [vmem:[#allocation2 + $0xa8] sm:$0xff] %vm384_vm0, %v3165_v20  ;;  %2929 = vmatpush3.bf16.msra.mxu0 %v3116_v27 }
  0x63   : > { %407 = vst.msk [vmem:[#allocation2 + $0xb0] sm:$0xff] %vm384_vm0, %v3165_v20  ;;  %408 = vst.msk [vmem:[#allocation2 + $0xb8] sm:$0xff] %vm384_vm0, %v3165_v20  ;;  %2930 = vmatprep.subr.bf16.mxu0 %v3117_v29 }
  0x64   : > { %409 = vst.msk [vmem:[#allocation2 + $0xc0] sm:$0xff] %vm384_vm0, %v3165_v20  ;;  %410 = vst.msk [vmem:[#allocation2 + $0xc8] sm:$0xff] %vm384_vm0, %v3165_v20 }
  0x65   : > { %411 = vst.msk [vmem:[#allocation2 + $0xd0] sm:$0xff] %vm384_vm0, %v3165_v20  ;;  %412 = vst.msk [vmem:[#allocation2 + $0xd8] sm:$0xff] %vm384_vm0, %v3165_v20 }
  0x66   : > { %413 = vst.msk [vmem:[#allocation2 + $0xe0] sm:$0xff] %vm384_vm0, %v3165_v20  ;;  %414 = vst.msk [vmem:[#allocation2 + $0xe8] sm:$0xff] %vm384_vm0, %v3165_v20  ;;  %2931 = vmatpush3.bf16.msra.mxu0 %v3117_v29 }
  0x67   : > { %995 = vmatmul.mubr.bf16.vlgmr.msra.gmra.mrb[32].mxu1 %v451_v34  ;;  %415 = vst.msk [vmem:[#allocation2 + $0xf0] sm:$0xff] %vm384_vm0, %v3165_v20  ;;  %416 = vst.msk [vmem:[#allocation2 + $0xf8] sm:$0xff] %vm384_vm0, %v3165_v20  ;;  %2932 = vmatprep.subr.bf16.mxu0 %v3118_v32  ;;  %v3119_v34 = vld [vmem:[%s3719_s5 + $0x18] sm:$0xff]  }
  0x68   : > { %1002 = vmatprep.mubr.bf16.mxu1 %v456_v35  ;;  %v507_v35 = vunpack.c.l.s8.bf16 %v447_v33 }
  0x6a   : > { %2933 = vmatpush3.bf16.msra.mxu0 %v3118_v32 }
  0x6b   : > { %2934 = vmatprep.subr.bf16.mxu0 %v3119_v34 }
  0x6e   : > { %2935 = vmatpush3.bf16.msra.mxu0 %v3119_v34 }
  0x6f   : > { %1003 = vmatmul.mubr.bf16.gmra.mrb[36].mxu1 %v455_v41  ;;  %2968 = vmatprep.subr.bf16.mxu0 %v3482_v14 }
  0x70   : > { %1010 = vmatprep.mubr.bf16.mxu1 %v460_v42 }
  0x77   : > { %1011 = vmatmul.mubr.bf16.gmra.mrb[40].mxu1 %v459_v48 }
  0x78   : > { %1018 = vmatprep.mubr.bf16.mxu1 %v464_v49 }
  0x7f   : > { %1019 = vmatmul.mubr.bf16.gmra.mrb[44].mxu1 %v463_v54 }
  0x80   : > { %1026 = vmatprep.mubr.bf16.mxu1 %v468_v56 }
  0x87   : > { %1027 = vmatmul.mubr.bf16.gmra.mrb[48].mxu1 %v467_v61 }
  0x88   : > { %1034 = vmatprep.mubr.bf16.mxu1 %v472_v63 }
  0x8f   : > { %1035 = vmatmul.mubr.bf16.gmra.mrb[52].mxu1 %v471_v3 }
  0x90   : > { %1042 = vmatprep.mubr.bf16.mxu1 %v476_v4 }
  0x97   : > { %1043 = vmatmul.mubr.bf16.gmra.mrb[56].mxu1 %v475_v6 }
  0x98   : > { %1050 = vmatprep.mubr.bf16.mxu1 %v480_v7 }
  0x9f   : > { %1051 = vmatmul.mubr.bf16.gmra.mrb[60].mxu1 %v479_v9 }
  0xa0   : > { %1058 = vmatprep.mubr.bf16.mxu1 %v484_v10 }
  0xa7   : > { %1059 = vmatmul.mubr.bf16.gmra.mrb[64].mxu1 %v483_v12 }
  0xa8   : > { %1066 = vmatprep.mubr.bf16.mxu1 %v488_v13 }
  0xaf   : > { %1067 = vmatmul.mubr.bf16.gmra.mrb[68].mxu1 %v487_v15 }
  0xb0   : > { %1074 = vmatprep.mubr.bf16.mxu1 %v492_v16 }
  0xb7   : > { %1075 = vmatmul.mubr.bf16.gmra.mrb[72].mxu1 %v491_v18 }
  0xb8   : > { %1082 = vmatprep.mubr.bf16.mxu1 %v496_v19 }
  0xbf   : > { %1083 = vmatmul.mubr.bf16.gmra.mrb[76].mxu1 %v495_v22 }
  0xc0   : > { %1090 = vmatprep.mubr.bf16.mxu1 %v500_v23 }
  0xc7   : > { %1091 = vmatmul.mubr.bf16.gmra.mrb[80].mxu1 %v499_v25 }
  0xc8   : > { %1098 = vmatprep.mubr.bf16.mxu1 %v504_v26 }
  0xcf   : > { %1099 = vmatmul.mubr.bf16.gmra.mrb[84].mxu1 %v503_v30 }
  0xd0   : > { %1106 = vmatprep.mubr.bf16.mxu1 %v508_v31 }
  0xd7   : > { %1107 = vmatmul.mubr.bf16.gmra.mrb[88].mxu1 %v507_v35 }
  0xd8   : > { %1114 = vmatprep.mubr.bf16.mxu1 %v512_v36 }
  0xdf   : > { %1115 = vmatmul.mubr.bf16.gmra.mrb[92].mxu1 %v511_v37 }
  0xfa   : > { %v2728_v38 = vpop.f32.mrb[0].mxu1  ;;  %v2680_v44 = vpop.f32.mrb[0].mxu0 }
  0xfb   : > { %v2729_v39 = vpop.f32.mrb[1].mxu1  ;;  %v2681_v45 = vpop.f32.mrb[1].mxu0 }
  0xfc   : > { %v3453_v40 = vadd.f32 %v2729_v39, %v2728_v38  ;;  %v2731_v41 = vpop.f32.mrb[2].mxu1  ;;  %v3457_v46 = vadd.f32 %v2681_v45, %v2680_v44  ;;  %v2683_v47 = vpop.f32.mrb[2].mxu0 }
  0xfd   : > { %v2732_v42 = vpop.f32.mrb[3].mxu1  ;;  %v2684_v48 = vpop.f32.mrb[3].mxu0 }
  0xfe   : > { %v3455_v43 = vadd.f32 %v2732_v42, %v2731_v41  ;;  %v3459_v50 = vadd.f32 %v2684_v48, %v2683_v47 }
 0x102   : > { %v2734_v49 = vpop.f32.mrb[4].mxu1  ;;  %v2686_v56 = vpop.f32.mrb[4].mxu0 }
 0x103   : > { %v2735_v51 = vpop.f32.mrb[5].mxu1  ;;  %v2687_v57 = vpop.f32.mrb[5].mxu0 }
 0x104   : > { %v3461_v52 = vadd.f32 %v2735_v51, %v2734_v49  ;;  %v2737_v53 = vpop.f32.mrb[6].mxu1  ;;  %v3465_v58 = vadd.f32 %v2687_v57, %v2686_v56  ;;  %v2689_v59 = vpop.f32.mrb[6].mxu0 }
 0x105   : > { %v2738_v54 = vpop.f32.mrb[7].mxu1  ;;  %v2690_v60 = vpop.f32.mrb[7].mxu0 }
 0x106   : > { %v3463_v55 = vadd.f32 %v2738_v54, %v2737_v53  ;;  %v3467_v62 = vadd.f32 %v2690_v60, %v2689_v59 }
 0x10a   : > { %v2740_v61 = vpop.f32.mrb[8].mxu1  ;;  %v2692_v4 = vpop.f32.mrb[8].mxu0 }
 0x10b   : > { %v2741_v63 = vpop.f32.mrb[9].mxu1  ;;  %v2693_v5 = vpop.f32.mrb[9].mxu0 }
 0x10c   : > { %v3469_v0 = vadd.f32 %v2741_v63, %v2740_v61  ;;  %v2743_v1 = vpop.f32.mrb[10].mxu1  ;;  %v3473_v6 = vadd.f32 %v2693_v5, %v2692_v4  ;;  %v2695_v7 = vpop.f32.mrb[10].mxu0 }
 0x10d   : > { %v2744_v2 = vpop.f32.mrb[11].mxu1  ;;  %v2696_v8 = vpop.f32.mrb[11].mxu0 }
 0x10e   : > { %v3471_v3 = vadd.f32 %v2744_v2, %v2743_v1  ;;  %v3475_v10 = vadd.f32 %v2696_v8, %v2695_v7 }
 0x112   : > { %v2746_v9 = vpop.f32.mrb[12].mxu1  ;;  %v2698_v17 = vpop.f32.mrb[12].mxu0 }
 0x113   : > { %v2747_v11 = vpop.f32.mrb[13].mxu1  ;;  %v2699_v18 = vpop.f32.mrb[13].mxu0 }
 0x114   : > { %v3477_v12 = vadd.f32 %v2747_v11, %v2746_v9  ;;  %v2749_v13 = vpop.f32.mrb[14].mxu1  ;;  %v3487_v19 = vadd.f32 %v2699_v18, %v2698_v17  ;;  %v2701_v20 = vpop.f32.mrb[14].mxu0 }
 0x115   : > { %v2750_v15 = vpop.f32.mrb[15].mxu1  ;;  %v2702_v21 = vpop.f32.mrb[15].mxu0 }
 0x116   : > { %v3484_v16 = vadd.f32 %v2750_v15, %v2749_v13  ;;  %v3489_v23 = vadd.f32 %v2702_v21, %v2701_v20 }
 0x11a   : > { %v2752_v22 = vpop.f32.mrb[16].mxu1  ;;  %v2704_v29 = vpop.f32.mrb[16].mxu0 }
 0x11b   : > { %v2753_v24 = vpop.f32.mrb[17].mxu1  ;;  %v2705_v30 = vpop.f32.mrb[17].mxu0 }
 0x11c   : > { %v3491_v25 = vadd.f32 %v2753_v24, %v2752_v22  ;;  %v2755_v26 = vpop.f32.mrb[18].mxu1  ;;  %v3495_v31 = vadd.f32 %v2705_v30, %v2704_v29  ;;  %v2707_v32 = vpop.f32.mrb[18].mxu0  ;;  %v513_v30 = vld [vmem:[#allocation2] sm:$0xff] }
 0x11d   : > { %v2756_v27 = vpop.f32.mrb[19].mxu1  ;;  %v2708_v33 = vpop.f32.mrb[19].mxu0 }
 0x11e   : > { %v3493_v28 = vadd.f32 %v2756_v27, %v2755_v26  ;;  %v3497_v35 = vadd.f32 %v2708_v33, %v2707_v32 }
 0x122   : > { %v2758_v34 = vpop.f32.mrb[20].mxu1  ;;  %v2710_v42 = vpop.f32.mrb[20].mxu0 }
 0x123   : > { %v2759_v36 = vpop.f32.mrb[21].mxu1  ;;  %v2711_v44 = vpop.f32.mrb[21].mxu0 }
 0x124   : > { %v3499_v37 = vadd.f32 %v2759_v36, %v2758_v34  ;;  %v2761_v38 = vpop.f32.mrb[22].mxu1  ;;  %v3503_v45 = vadd.f32 %v2711_v44, %v2710_v42  ;;  %v2713_v47 = vpop.f32.mrb[22].mxu0  ;;  %v514_v36 = vld [vmem:[#allocation2 + $0x8] sm:$0xff] }
 0x125   : > { %v2762_v39 = vpop.f32.mrb[23].mxu1  ;;  %v2714_v48 = vpop.f32.mrb[23].mxu0 }
 0x126   : > { %v3501_v41 = vadd.f32 %v2762_v39, %v2761_v38  ;;  %v3505_v51 = vadd.f32 %v2714_v48, %v2713_v47  ;;  %v1258_v48 = vpop.permute.xlu0 %1257 }
 0x12a   : > { %v2764_v49 = vpop.f32.mrb[24].mxu1  ;;  %v2716_v60 = vpop.f32.mrb[24].mxu0 }
 0x12b   : > { %v2765_v53 = vpop.f32.mrb[25].mxu1  ;;  %v2717_v61 = vpop.f32.mrb[25].mxu0 }
 0x12c   : > { %v3507_v54 = vadd.f32 %v2765_v53, %v2764_v49  ;;  %v2767_v56 = vpop.f32.mrb[26].mxu1  ;;  %v3511_v63 = vadd.f32 %v2717_v61, %v2716_v60  ;;  %v2719_v1 = vpop.f32.mrb[26].mxu0  ;;  %v516_v61 = vld [vmem:[#allocation2 + $0x18] sm:$0xff] }
 0x12d   : > { %v2768_v57 = vpop.f32.mrb[27].mxu1  ;;  %v2720_v2 = vpop.f32.mrb[27].mxu0 }
 0x12e   : > { %v3509_v59 = vadd.f32 %v2768_v57, %v2767_v56  ;;  %v3513_v5 = vadd.f32 %v2720_v2, %v2719_v1  ;;  %v515_v56 = vld [vmem:[#allocation2 + $0x10] sm:$0xff] }
 0x132   : > { %v2770_v4 = vpop.f32.mrb[28].mxu1  ;;  %v2722_v15 = vpop.f32.mrb[28].mxu0 }
 0x133   : > { %v2771_v7 = vpop.f32.mrb[29].mxu1  ;;  %v2723_v17 = vpop.f32.mrb[29].mxu0 }
 0x134   : > { %v3515_v8 = vadd.f32 %v2771_v7, %v2770_v4  ;;  %v2773_v9 = vpop.f32.mrb[30].mxu1  ;;  %v3519_v18 = vadd.f32 %v2723_v17, %v2722_v15  ;;  %v2725_v20 = vpop.f32.mrb[30].mxu0 }
 0x135   : > { %v2774_v11 = vpop.f32.mrb[31].mxu1  ;;  %v2726_v21 = vpop.f32.mrb[31].mxu0 }
 0x136   : > { %v3517_v13 = vadd.f32 %v2774_v11, %v2773_v9  ;;  %v3521_v24 = vadd.f32 %v2726_v21, %v2725_v20  ;;  %v1263_v4 = vpop.permute.xlu0 %1262 }
 0x13a   : > { %v2792_v22 = vpop.f32.mrb[32].mxu1 }
 0x13b   : > { %v2793_v26 = vpop.f32.mrb[33].mxu1 }
 0x13c   : > { %v2794_v27 = vadd.f32 %v2793_v26, %v2792_v22  ;;  %v2795_v29 = vpop.f32.mrb[34].mxu1  ;;  %v1268_v26 = vpop.permute.xlu1 %1267 }
 0x13d   : > { %v2796_v32 = vpop.f32.mrb[35].mxu1 }
 0x13e   : > { %v997_v33 = vadd.f32 %v2794_v27, %v3457_v46  ;;  %v2797_v34 = vadd.f32 %v2796_v32, %v2795_v29  ;;  %v518_v32 = vld [vmem:[#allocation2 + $0x28] sm:$0xff] }
 0x140   : > { %v1123_v38 = vadd.f32 %v997_v33, %v513_v30  ;;  %v1000_v39 = vadd.f32 %v2797_v34, %v3459_v50 }
 0x142   : > { %1156 = vst.msk [vmem:[#allocation2] sm:$0xff] %vm384_vm0, %v1123_v38  ;;  %v1124_v42 = vadd.f32 %v1000_v39, %v514_v36  ;;  %v2798_v44 = vpop.f32.mrb[36].mxu1 }
 0x143   : > { %v2799_v47 = vpop.f32.mrb[37].mxu1 }
 0x144   : > { %1157 = vst.msk [vmem:[#allocation2 + $0x8] sm:$0xff] %vm384_vm0, %v1124_v42  ;;  %v2800_v49 = vadd.f32 %v2799_v47, %v2798_v44  ;;  %v2801_v53 = vpop.f32.mrb[38].mxu1  ;;  %v1273_v42 = vpop.permute.xlu1 %1272 }
 0x145   : > { %v2802_v57 = vpop.f32.mrb[39].mxu1 }
 0x146   : > { %v1005_v60 = vadd.f32 %v2800_v49, %v3465_v58  ;;  %v2803_v46 = vadd.f32 %v2802_v57, %v2801_v53  ;;  %v517_v58 = vld [vmem:[#allocation2 + $0x20] sm:$0xff] }
 0x148   : > { %v1125_v1 = vadd.f32 %v1005_v60, %v515_v56  ;;  %v1008_v2 = vadd.f32 %v2803_v46, %v3467_v62  ;;  %v519_v56 = vld [vmem:[#allocation2 + $0x30] sm:$0xff] }
 0x149   : > { %v1191_v50 = vld [vmem:[#allocation2] sm:$0xff] }
 0x14a   : > { %1158 = vst.msk [vmem:[#allocation2 + $0x10] sm:$0xff] %vm384_vm0, %v1125_v1  ;;  %v1126_v7 = vadd.f32 %v1008_v2, %v516_v61  ;;  %v2804_v9 = vpop.f32.mrb[40].mxu1  ;;  %v1415_v17 = vmul.f32 %v1258_v48, %v1191_v50  ;;  %v3121_v61 = vld [vmem:[%s3718_s4 + $0x8] sm:$0xff]   ;;  %v520_v1 = vld [vmem:[#allocation2 + $0x38] sm:$0xff] }
 0x14b   : > { %v1192_v11 = vld [vmem:[#allocation2 + $0x8] sm:$0xff]  ;;  %v2805_v15 = vpop.f32.mrb[41].mxu1 }
 0x14c   : > { %1159 = vst.msk [vmem:[#allocation2 + $0x18] sm:$0xff] %vm384_vm0, %v1126_v7  ;;  %v1416_v20 = vmul.f32 %v1263_v4, %v1192_v11  ;;  %v2806_v21 = vadd.f32 %v2805_v15, %v2804_v9  ;;  %v2807_v22 = vpop.f32.mrb[42].mxu1  ;;  %v1278_v7 = vpop.permute.xlu0 %1277 }
 0x14d   : > { %v2808_v27 = vpop.f32.mrb[43].mxu1  ;;  %v1283_v15 = vpop.permute.xlu1 %1282 }
 0x14e   : > { %v1447_v29 = vpack.c.bf16 %v1416_v20, %v1415_v17  ;;  %v1013_v62 = vadd.f32 %v2806_v21, %v3473_v6  ;;  %v2809_v30 = vadd.f32 %v2808_v27, %v2807_v22 }
 0x150   : > { %v1127_v33 = vadd.f32 %v1013_v62, %v517_v58  ;;  %v1016_v34 = vadd.f32 %v2809_v30, %v3475_v10  ;;  %2936 = vmatprep.mubr.msk.bf16.mxu0 %vm384_vm0, %v1447_v29  ;;  %v3123_v30 = vld [vmem:[%s3718_s4 + $0x18] sm:$0xff]  }
 0x151   : > { %v1193_v36 = vld [vmem:[#allocation2 + $0x10] sm:$0xff] }
 0x152   : > { %1160 = vst.msk [vmem:[#allocation2 + $0x20] sm:$0xff] %vm384_vm0, %v1127_v33  ;;  %v1128_v38 = vadd.f32 %v1016_v34, %v518_v32  ;;  %v2810_v39 = vpop.f32.mrb[44].mxu1  ;;  %v1417_v48 = vmul.f32 %v1268_v26, %v1193_v36  ;;  %v522_v32 = vld [vmem:[#allocation2 + $0x48] sm:$0xff] }
 0x153   : > { %v1194_v44 = vld [vmem:[#allocation2 + $0x18] sm:$0xff]  ;;  %v2811_v47 = vpop.f32.mrb[45].mxu1 }
 0x154   : > { %1161 = vst.msk [vmem:[#allocation2 + $0x28] sm:$0xff] %vm384_vm0, %v1128_v38  ;;  %v1418_v49 = vmul.f32 %v1273_v42, %v1194_v44  ;;  %v2812_v6 = vadd.f32 %v2811_v47, %v2810_v39  ;;  %v2813_v53 = vpop.f32.mrb[46].mxu1  ;;  %v1288_v38 = vpop.permute.xlu0 %1287 }
 0x155   : > { %v2814_v57 = vpop.f32.mrb[47].mxu1 }
 0x156   : > { %v1448_v60 = vpack.c.bf16 %v1418_v49, %v1417_v48  ;;  %v1021_v10 = vadd.f32 %v2812_v6, %v3487_v19  ;;  %v2815_v46 = vadd.f32 %v2814_v57, %v2813_v53  ;;  %v3122_v19 = vld [vmem:[%s3718_s4 + $0x10] sm:$0xff]  }
 0x158   : > { %v1129_v2 = vadd.f32 %v1021_v10, %v519_v56  ;;  %v1024_v50 = vadd.f32 %v2815_v46, %v3489_v23  ;;  %2937 = vmatmul.mubr.msk.bf16.vlgmr.msra.gmra.mrb[32].mxu0 %vm384_vm0, %v1448_v60  ;;  %v524_v46 = vld [vmem:[#allocation2 + $0x58] sm:$0xff] }
 0x159   : > { %v1195_v4 = vld [vmem:[#allocation2 + $0x20] sm:$0xff]  ;;  %2969 = vmatpush3.bf16.msra.mxu0 %v3482_v14 }
 0x15a   : > { %1162 = vst.msk [vmem:[#allocation2 + $0x30] sm:$0xff] %vm384_vm0, %v1129_v2  ;;  %v1130_v9 = vadd.f32 %v1024_v50, %v520_v1  ;;  %v2816_v11 = vpop.f32.mrb[48].mxu1  ;;  %2970 = vmatprep.subr.bf16.mxu0 %v3121_v61  ;;  %v1419_v21 = vmul.f32 %v1278_v7, %v1195_v4  ;;  %v521_v14 = vld [vmem:[#allocation2 + $0x40] sm:$0xff]  ;;  %v1298_v50 = vpop.permute.xlu0 %1297 }
 0x15b   : > { %v1196_v17 = vld [vmem:[#allocation2 + $0x28] sm:$0xff]  ;;  %v2817_v20 = vpop.f32.mrb[49].mxu1 }
 0x15c   : > { %v1420_v23 = vmul.f32 %v1283_v15, %v1196_v17  ;;  %1163 = vst.msk [vmem:[#allocation2 + $0x38] sm:$0xff] %vm384_vm0, %v1130_v9  ;;  %v2818_v22 = vadd.f32 %v2817_v20, %v2816_v11  ;;  %v2819_v58 = vpop.f32.mrb[50].mxu1 }
 0x15d   : > { %v2820_v26 = vpop.f32.mrb[51].mxu1  ;;  %2971 = vmatpush3.bf16.msra.mxu0 %v3121_v61 }
 0x15e   : > { %v1449_v27 = vpack.c.bf16 %v1420_v23, %v1419_v21  ;;  %v1029_v29 = vadd.f32 %v2818_v22, %v3495_v31  ;;  %v2821_v62 = vadd.f32 %v2820_v26, %v2819_v58  ;;  %2972 = vmatprep.subr.bf16.mxu0 %v3122_v19  ;;  %v1293_v31 = vpop.permute.xlu1 %1292  ;;  %v525_v21 = vld [vmem:[#allocation2 + $0x60] sm:$0xff] }
 0x160   : > { %v1131_v33 = vadd.f32 %v1029_v29, %v521_v14  ;;  %v1032_v34 = vadd.f32 %v2821_v62, %v3497_v35  ;;  %2940 = vmatprep.mubr.msk.bf16.mxu0 %vm384_vm0, %v1449_v27  ;;  %v523_v35 = vld [vmem:[#allocation2 + $0x50] sm:$0xff]  ;;  %v526_v14 = vld [vmem:[#allocation2 + $0x68] sm:$0xff]  ;;  %v1308_v62 = vpop.permute.xlu0 %1307 }
 0x161   : > { %v1197_v36 = vld [vmem:[#allocation2 + $0x30] sm:$0xff]  ;;  %2973 = vmatpush3.bf16.msra.mxu0 %v3122_v19 }
 0x162   : > { %1164 = vst.msk [vmem:[#allocation2 + $0x40] sm:$0xff] %vm384_vm0, %v1131_v33  ;;  %v1132_v39 = vadd.f32 %v1032_v34, %v522_v32  ;;  %v2822_v42 = vpop.f32.mrb[52].mxu1  ;;  %2974 = vmatprep.subr.bf16.mxu0 %v3123_v30  ;;  %v1421_v48 = vmul.f32 %v1288_v38, %v1197_v36  ;;  %v1303_v9 = vpop.permute.xlu1 %1302 }
 0x163   : > { %v1198_v44 = vld [vmem:[#allocation2 + $0x38] sm:$0xff]  ;;  %v2823_v47 = vpop.f32.mrb[53].mxu1 }
 0x164   : > { %v1422_v49 = vmul.f32 %v1293_v31, %v1198_v44  ;;  %1165 = vst.msk [vmem:[#allocation2 + $0x48] sm:$0xff] %vm384_vm0, %v1132_v39  ;;  %v2824_v6 = vadd.f32 %v2823_v47, %v2822_v42  ;;  %v2825_v53 = vpop.f32.mrb[54].mxu1  ;;  %v527_v31 = vld [vmem:[#allocation2 + $0x70] sm:$0xff] }
 0x165   : > { %v2826_v56 = vpop.f32.mrb[55].mxu1  ;;  %2975 = vmatpush3.bf16.msra.mxu0 %v3123_v30 }
 0x166   : > { %v1450_v57 = vpack.c.bf16 %v1422_v49, %v1421_v48  ;;  %v1037_v60 = vadd.f32 %v2824_v6, %v3503_v45  ;;  %v2827_v10 = vadd.f32 %v2826_v56, %v2825_v53  ;;  %v1313_v33 = vpop.permute.xlu1 %1312  ;;  %v528_v49 = vld [vmem:[#allocation2 + $0x78] sm:$0xff]  ;;  %v1318_v56 = vpop.permute.xlu0 %1317 }
 0x168   : > { %v1133_v61 = vadd.f32 %v1037_v60, %v523_v35  ;;  %v1040_v1 = vadd.f32 %v2827_v10, %v3505_v51  ;;  %2941 = vmatmul.mubr.msk.bf16.gmra.mrb[36].mxu0 %vm384_vm0, %v1450_v57 }
 0x169   : > { %v1199_v2 = vld [vmem:[#allocation2 + $0x40] sm:$0xff] }
 0x16a   : > { %1166 = vst.msk [vmem:[#allocation2 + $0x50] sm:$0xff] %vm384_vm0, %v1133_v61  ;;  %v1134_v4 = vadd.f32 %v1040_v1, %v524_v46  ;;  %v2828_v7 = vpop.f32.mrb[56].mxu1  ;;  %v1423_v17 = vmul.f32 %v1298_v50, %v1199_v2  ;;  %v1323_v10 = vpop.permute.xlu1 %1322 }
 0x16b   : > { %v2829_v11 = vpop.f32.mrb[57].mxu1  ;;  %v1200_v19 = vld [vmem:[#allocation2 + $0x48] sm:$0xff] }
 0x16c   : > { %1167 = vst.msk [vmem:[#allocation2 + $0x58] sm:$0xff] %vm384_vm0, %v1134_v4  ;;  %v2830_v15 = vadd.f32 %v2829_v11, %v2828_v7  ;;  %v2831_v45 = vpop.f32.mrb[58].mxu1  ;;  %v1424_v20 = vmul.f32 %v1303_v9, %v1200_v19  ;;  %v529_v4 = vld [vmem:[#allocation2 + $0x80] sm:$0xff]  ;;  %v530_v19 = vld [vmem:[#allocation2 + $0x88] sm:$0xff] }
 0x16d   : > { %v2832_v23 = vpop.f32.mrb[59].mxu1 }
 0x16e   : > { %v1045_v51 = vadd.f32 %v2830_v15, %v3511_v63  ;;  %v2833_v22 = vadd.f32 %v2832_v23, %v2831_v45  ;;  %v1451_v58 = vpack.c.bf16 %v1424_v20, %v1423_v17  ;;  %v1328_v20 = vpop.permute.xlu0 %1327 }
 0x170   : > { %v1135_v26 = vadd.f32 %v1045_v51, %v525_v21  ;;  %v1048_v27 = vadd.f32 %v2833_v22, %v3513_v5  ;;  %2944 = vmatprep.mubr.msk.bf16.mxu0 %vm384_vm0, %v1451_v58  ;;  %v1333_v51 = vpop.permute.xlu1 %1332 }
 0x171   : > { %v1201_v29 = vld [vmem:[#allocation2 + $0x50] sm:$0xff] }
 0x172   : > { %1168 = vst.msk [vmem:[#allocation2 + $0x60] sm:$0xff] %vm384_vm0, %v1135_v26  ;;  %v1136_v30 = vadd.f32 %v1048_v27, %v526_v14  ;;  %v2834_v32 = vpop.f32.mrb[60].mxu1  ;;  %v1425_v39 = vmul.f32 %v1308_v62, %v1201_v29  ;;  %v531_v29 = vld [vmem:[#allocation2 + $0x90] sm:$0xff] }
 0x173   : > { %v2835_v34 = vpop.f32.mrb[61].mxu1  ;;  %v1202_v36 = vld [vmem:[#allocation2 + $0x58] sm:$0xff] }
 0x174   : > { %1169 = vst.msk [vmem:[#allocation2 + $0x68] sm:$0xff] %vm384_vm0, %v1136_v30  ;;  %v2836_v63 = vadd.f32 %v2835_v34, %v2834_v32  ;;  %v2837_v38 = vpop.f32.mrb[62].mxu1  ;;  %v1426_v42 = vmul.f32 %v1313_v33, %v1202_v36  ;;  %v532_v33 = vld [vmem:[#allocation2 + $0x98] sm:$0xff] }
 0x175   : > { %v2838_v44 = vpop.f32.mrb[63].mxu1 }
 0x176   : > { %v1053_v5 = vadd.f32 %v2836_v63, %v3519_v18  ;;  %v2839_v47 = vadd.f32 %v2838_v44, %v2837_v38  ;;  %v1452_v48 = vpack.c.bf16 %v1426_v42, %v1425_v39  ;;  %v1338_v38 = vpop.permute.xlu0 %1337 }
 0x178   : > { %v1137_v6 = vadd.f32 %v1053_v5, %v527_v31  ;;  %v1056_v53 = vadd.f32 %v2839_v47, %v3521_v24  ;;  %2945 = vmatmul.mubr.msk.bf16.gmra.mrb[40].mxu0 %vm384_vm0, %v1452_v48  ;;  %v1343_v31 = vpop.permute.xlu1 %1342 }
 0x179   : > { %v1203_v35 = vld [vmem:[#allocation2 + $0x60] sm:$0xff] }
 0x17a   : > { %1170 = vst.msk [vmem:[#allocation2 + $0x70] sm:$0xff] %vm384_vm0, %v1137_v6  ;;  %v1138_v57 = vadd.f32 %v1056_v53, %v528_v49  ;;  %v2840_v60 = vpop.f32.mrb[64].mxu1  ;;  %v1427_v2 = vmul.f32 %v1318_v56, %v1203_v35  ;;  %v533_v6 = vld [vmem:[#allocation2 + $0xa0] sm:$0xff] }
 0x17b   : > { %v2841_v46 = vpop.f32.mrb[65].mxu1  ;;  %v1204_v61 = vld [vmem:[#allocation2 + $0x68] sm:$0xff] }
 0x17c   : > { %1171 = vst.msk [vmem:[#allocation2 + $0x78] sm:$0xff] %vm384_vm0, %v1138_v57  ;;  %v2842_v18 = vadd.f32 %v2841_v46, %v2840_v60  ;;  %v2843_v1 = vpop.f32.mrb[66].mxu1  ;;  %v1428_v50 = vmul.f32 %v1323_v10, %v1204_v61  ;;  %v534_v57 = vld [vmem:[#allocation2 + $0xa8] sm:$0xff]  ;;  %v1348_v61 = vpop.permute.xlu0 %1347 }
 0x17d   : > { %v2844_v7 = vpop.f32.mrb[67].mxu1 }
 0x17e   : > { %v1061_v24 = vadd.f32 %v2842_v18, %v3453_v40  ;;  %v2845_v9 = vadd.f32 %v2844_v7, %v2843_v1  ;;  %v1453_v11 = vpack.c.bf16 %v1428_v50, %v1427_v2  ;;  %v1353_v2 = vpop.permute.xlu1 %1352 }
 0x180   : > { %v1139_v15 = vadd.f32 %v1061_v24, %v529_v4  ;;  %v1064_v45 = vadd.f32 %v2845_v9, %v3455_v43  ;;  %2948 = vmatprep.mubr.msk.bf16.mxu0 %vm384_vm0, %v1453_v11  ;;  %v535_v11 = vld [vmem:[#allocation2 + $0xb0] sm:$0xff] }
 0x181   : > { %v1205_v17 = vld [vmem:[#allocation2 + $0x70] sm:$0xff] }
 0x182   : > { %1172 = vst.msk [vmem:[#allocation2 + $0x80] sm:$0xff] %vm384_vm0, %v1139_v15  ;;  %v1140_v21 = vadd.f32 %v1064_v45, %v530_v19  ;;  %v2846_v23 = vpop.f32.mrb[68].mxu1  ;;  %v1429_v26 = vmul.f32 %v1328_v20, %v1205_v17  ;;  %v536_v17 = vld [vmem:[#allocation2 + $0xb8] sm:$0xff] }
 0x183   : > { %v2847_v22 = vpop.f32.mrb[69].mxu1  ;;  %v1206_v58 = vld [vmem:[#allocation2 + $0x78] sm:$0xff] }
 0x184   : > { %1173 = vst.msk [vmem:[#allocation2 + $0x88] sm:$0xff] %vm384_vm0, %v1140_v21  ;;  %v2848_v40 = vadd.f32 %v2847_v22, %v2846_v23  ;;  %v2849_v14 = vpop.f32.mrb[70].mxu1  ;;  %v1430_v27 = vmul.f32 %v1333_v51, %v1206_v58  ;;  %v1358_v51 = vpop.permute.xlu0 %1357 }
 0x185   : > { %v2850_v62 = vpop.f32.mrb[71].mxu1 }
 0x186   : > { %v1069_v43 = vadd.f32 %v2848_v40, %v3461_v52  ;;  %v2851_v30 = vadd.f32 %v2850_v62, %v2849_v14  ;;  %v1454_v32 = vpack.c.bf16 %v1430_v27, %v1429_v26  ;;  %v1363_v40 = vpop.permute.xlu1 %1362 }
 0x188   : > { %v1141_v34 = vadd.f32 %v1069_v43, %v531_v29  ;;  %v1072_v36 = vadd.f32 %v2851_v30, %v3463_v55  ;;  %2949 = vmatmul.mubr.msk.bf16.gmra.mrb[44].mxu0 %vm384_vm0, %v1454_v32  ;;  %v537_v43 = vld [vmem:[#allocation2 + $0xc0] sm:$0xff] }
 0x189   : > { %v1207_v63 = vld [vmem:[#allocation2 + $0x80] sm:$0xff] }
 0x18a   : > { %1174 = vst.msk [vmem:[#allocation2 + $0x90] sm:$0xff] %vm384_vm0, %v1141_v34  ;;  %v1142_v39 = vadd.f32 %v1072_v36, %v532_v33  ;;  %v2852_v42 = vpop.f32.mrb[72].mxu1  ;;  %v1431_v48 = vmul.f32 %v1338_v38, %v1207_v63  ;;  %v538_v34 = vld [vmem:[#allocation2 + $0xc8] sm:$0xff] }
 0x18b   : > { %v2853_v44 = vpop.f32.mrb[73].mxu1  ;;  %v1208_v5 = vld [vmem:[#allocation2 + $0x88] sm:$0xff] }
 0x18c   : > { %1175 = vst.msk [vmem:[#allocation2 + $0x98] sm:$0xff] %vm384_vm0, %v1142_v39  ;;  %v2854_v52 = vadd.f32 %v2853_v44, %v2852_v42  ;;  %v2855_v47 = vpop.f32.mrb[74].mxu1  ;;  %v1432_v49 = vmul.f32 %v1343_v31, %v1208_v5  ;;  %v1368_v39 = vpop.permute.xlu0 %1367 }
 0x18d   : > { %v2856_v53 = vpop.f32.mrb[75].mxu1  ;;  %v1373_v44 = vpop.permute.xlu1 %1372 }
 0x18e   : > { %v1077_v55 = vadd.f32 %v2854_v52, %v3469_v0  ;;  %v2857_v35 = vadd.f32 %v2856_v53, %v2855_v47  ;;  %v1455_v56 = vpack.c.bf16 %v1432_v49, %v1431_v48 }
 0x190   : > { %v1143_v60 = vadd.f32 %v1077_v55, %v533_v6  ;;  %v1080_v10 = vadd.f32 %v2857_v35, %v3471_v3  ;;  %2952 = vmatprep.mubr.msk.bf16.mxu0 %vm384_vm0, %v1455_v56  ;;  %v539_v6 = vld [vmem:[#allocation2 + $0xd0] sm:$0xff]  ;;  %v540_v56 = vld [vmem:[#allocation2 + $0xd8] sm:$0xff] }
 0x191   : > { %v1209_v46 = vld [vmem:[#allocation2 + $0x90] sm:$0xff] }
 0x192   : > { %1176 = vst.msk [vmem:[#allocation2 + $0xa0] sm:$0xff] %vm384_vm0, %v1143_v60  ;;  %v1144_v18 = vadd.f32 %v1080_v10, %v534_v57  ;;  %v2858_v1 = vpop.f32.mrb[76].mxu1  ;;  %v1433_v24 = vmul.f32 %v1348_v61, %v1209_v46  ;;  %v1378_v46 = vpop.permute.xlu0 %1377 }
 0x193   : > { %v2859_v50 = vpop.f32.mrb[77].mxu1  ;;  %v1210_v4 = vld [vmem:[#allocation2 + $0x98] sm:$0xff] }
 0x194   : > { %1177 = vst.msk [vmem:[#allocation2 + $0xa8] sm:$0xff] %vm384_vm0, %v1144_v18  ;;  %v2860_v0 = vadd.f32 %v2859_v50, %v2858_v1  ;;  %v2861_v7 = vpop.f32.mrb[78].mxu1  ;;  %v1434_v9 = vmul.f32 %v1353_v2, %v1210_v4  ;;  %v1383_v1 = vpop.permute.xlu1 %1382 }
 0x195   : > { %v2862_v19 = vpop.f32.mrb[79].mxu1 }
 0x196   : > { %v1085_v3 = vadd.f32 %v2860_v0, %v3477_v12  ;;  %v2863_v15 = vadd.f32 %v2862_v19, %v2861_v7  ;;  %v1456_v45 = vpack.c.bf16 %v1434_v9, %v1433_v24  ;;  %v541_v24 = vld [vmem:[#allocation2 + $0xe0] sm:$0xff] }
 0x198   : > { %v1145_v20 = vadd.f32 %v1085_v3, %v535_v11  ;;  %v1088_v21 = vadd.f32 %v2863_v15, %v3484_v16  ;;  %2953 = vmatmul.mubr.msk.bf16.gmra.mrb[48].mxu0 %vm384_vm0, %v1456_v45  ;;  %v542_v3 = vld [vmem:[#allocation2 + $0xe8] sm:$0xff] }
 0x199   : > { %v1211_v23 = vld [vmem:[#allocation2 + $0xa0] sm:$0xff] }
 0x19a   : > { %1178 = vst.msk [vmem:[#allocation2 + $0xb0] sm:$0xff] %vm384_vm0, %v1145_v20  ;;  %v1146_v22 = vadd.f32 %v1088_v21, %v536_v17  ;;  %v2864_v58 = vpop.f32.mrb[80].mxu1  ;;  %v1435_v29 = vmul.f32 %v1358_v51, %v1211_v23  ;;  %v1388_v20 = vpop.permute.xlu0 %1387 }
 0x19b   : > { %v2865_v14 = vpop.f32.mrb[81].mxu1  ;;  %v1212_v26 = vld [vmem:[#allocation2 + $0xa8] sm:$0xff]  ;;  %v1393_v51 = vpop.permute.xlu1 %1392 }
 0x19c   : > { %1179 = vst.msk [vmem:[#allocation2 + $0xb8] sm:$0xff] %vm384_vm0, %v1146_v22  ;;  %v2866_v12 = vadd.f32 %v2865_v14, %v2864_v58  ;;  %v2867_v27 = vpop.f32.mrb[82].mxu1  ;;  %v1436_v62 = vmul.f32 %v1363_v40, %v1212_v26 }
 0x19d   : > { %v2868_v30 = vpop.f32.mrb[83].mxu1 }
 0x19e   : > { %v1093_v16 = vadd.f32 %v2866_v12, %v3491_v25  ;;  %v2869_v32 = vadd.f32 %v2868_v30, %v2867_v27  ;;  %v1457_v33 = vpack.c.bf16 %v1436_v62, %v1435_v29  ;;  %v543_v12 = vld [vmem:[#allocation2 + $0xf0] sm:$0xff] }
 0x1a0   : > { %v1147_v36 = vadd.f32 %v1093_v16, %v537_v43  ;;  %v1096_v63 = vadd.f32 %v2869_v32, %v3493_v28  ;;  %2956 = vmatprep.mubr.msk.bf16.mxu0 %vm384_vm0, %v1457_v33  ;;  %v544_v43 = vld [vmem:[#allocation2 + $0xf8] sm:$0xff] }
 0x1a1   : > { %v1213_v38 = vld [vmem:[#allocation2 + $0xb0] sm:$0xff] }
 0x1a2   : > { %1180 = vst.msk [vmem:[#allocation2 + $0xc0] sm:$0xff] %vm384_vm0, %v1147_v36  ;;  %v1148_v42 = vadd.f32 %v1096_v63, %v538_v34  ;;  %v2870_v31 = vpop.f32.mrb[84].mxu1  ;;  %v1437_v48 = vmul.f32 %v1368_v39, %v1213_v38  ;;  %v1398_v34 = vpop.permute.xlu0 %1397 }
 0x1a3   : > { %v2871_v5 = vpop.f32.mrb[85].mxu1  ;;  %v1214_v52 = vld [vmem:[#allocation2 + $0xb8] sm:$0xff]  ;;  %v1403_v36 = vpop.permute.xlu1 %1402 }
 0x1a4   : > { %1181 = vst.msk [vmem:[#allocation2 + $0xc8] sm:$0xff] %vm384_vm0, %v1148_v42  ;;  %v2872_v25 = vadd.f32 %v2871_v5, %v2870_v31  ;;  %v2873_v47 = vpop.f32.mrb[86].mxu1  ;;  %v1438_v49 = vmul.f32 %v1373_v44, %v1214_v52 }
 0x1a5   : > { %v2874_v53 = vpop.f32.mrb[87].mxu1 }
 0x1a6   : > { %v1101_v28 = vadd.f32 %v2872_v25, %v3499_v37  ;;  %v2875_v55 = vadd.f32 %v2874_v53, %v2873_v47  ;;  %v1458_v35 = vpack.c.bf16 %v1438_v49, %v1437_v48  ;;  %v1408_v42 = vpop.permute.xlu0 %1407  ;;  %v3124_v25 = vld [vmem:[%s3358_s8] sm:$0xff]   ;;  %v3125_v48 = vld [vmem:[%s3358_s8 + $0x8] sm:$0xff]   ;;  %v3126_v49 = vld [vmem:[%s3358_s8 + $0x10] sm:$0xff]  }
 0x1a7   : > { %v1413_v31 = vpop.permute.xlu1 %1412  ;;  %v3128_v53 = vld [vmem:[%s3358_s8 + $0x20] sm:$0xff]  }
 0x1a8   : > { %v1149_v57 = vadd.f32 %v1101_v28, %v539_v6  ;;  %v1104_v60 = vadd.f32 %v2875_v55, %v3501_v41  ;;  %2957 = vmatmul.mubr.msk.bf16.gmra.mrb[52].mxu0 %vm384_vm0, %v1458_v35  ;;  %v3127_v6 = vld [vmem:[%s3358_s8 + $0x18] sm:$0xff]   ;;  %v3129_v28 = vld [vmem:[%s3358_s8 + $0x28] sm:$0xff]   ;;  %v3130_v55 = vld [vmem:[%s3358_s8 + $0x30] sm:$0xff]  }
 0x1a9   : > { %v1215_v10 = vld [vmem:[#allocation2 + $0xc0] sm:$0xff]  ;;  %v3131_v35 = vld [vmem:[%s3358_s8 + $0x38] sm:$0xff]  }
 0x1aa   : > { %1182 = vst.msk [vmem:[#allocation2 + $0xd0] sm:$0xff] %vm384_vm0, %v1149_v57  ;;  %v1150_v61 = vadd.f32 %v1104_v60, %v540_v56  ;;  %v2876_v18 = vpop.f32.mrb[88].mxu1  ;;  %v1439_v0 = vmul.f32 %v1378_v46, %v1215_v10  ;;  %v3132_v56 = vld [vmem:[%s3358_s8 + $0x40] sm:$0xff]   ;;  %v3133_v57 = vld [vmem:[%s3358_s8 + $0x48] sm:$0xff]   ;;  %v3134_v60 = vld [vmem:[%s3358_s8 + $0x50] sm:$0xff]  }
 0x1ab   : > { %v2877_v2 = vpop.f32.mrb[89].mxu1  ;;  %v1216_v50 = vld [vmem:[#allocation2 + $0xc8] sm:$0xff]  ;;  %v3135_v10 = vld [vmem:[%s3358_s8 + $0x58] sm:$0xff]   ;;  %v3136_v46 = vld [vmem:[%s3358_s8 + $0x60] sm:$0xff]  }
 0x1ac   : > { %1183 = vst.msk [vmem:[#allocation2 + $0xd8] sm:$0xff] %vm384_vm0, %v1150_v61  ;;  %v2878_v37 = vadd.f32 %v2877_v2, %v2876_v18  ;;  %v2879_v4 = vpop.f32.mrb[90].mxu1  ;;  %v1440_v7 = vmul.f32 %v1383_v1, %v1216_v50  ;;  %v3137_v61 = vld [vmem:[%s3358_s8 + $0x68] sm:$0xff]   ;;  %v3138_v18 = vld [vmem:[%s3358_s8 + $0x70] sm:$0xff]   ;;  %v3139_v1 = vld [vmem:[%s3358_s8 + $0x78] sm:$0xff]  }
 0x1ad   : > { %v2880_v9 = vpop.f32.mrb[91].mxu1  ;;  %v3648_v2 = vld [vmem:[%s3720_s6] ss:$0 sm:$0xff] }
 0x1ae   : > { %v1109_v41 = vadd.f32 %v2878_v37, %v3507_v54  ;;  %v2881_v11 = vadd.f32 %v2880_v9, %v2879_v4  ;;  %v1459_v19 = vpack.c.bf16 %v1440_v7, %v1439_v0 }
 0x1b0   : > { %v1151_v15 = vadd.f32 %v1109_v41, %v541_v24  ;;  %v1112_v45 = vadd.f32 %v2881_v11, %v3509_v59  ;;  %2960 = vmatprep.mubr.msk.bf16.mxu0 %vm384_vm0, %v1459_v19 }
 0x1b1   : > { %v1217_v17 = vld [vmem:[#allocation2 + $0xd0] sm:$0xff] }
 0x1b2   : > { %1184 = vst.msk [vmem:[#allocation2 + $0xe0] sm:$0xff] %vm384_vm0, %v1151_v15  ;;  %v1152_v21 = vadd.f32 %v1112_v45, %v542_v3  ;;  %v2882_v23 = vpop.f32.mrb[92].mxu1  ;;  %v1441_v14 = vmul.f32 %v1388_v20, %v1217_v17 }
 0x1b3   : > { %v2883_v22 = vpop.f32.mrb[93].mxu1  ;;  %v1218_v58 = vld [vmem:[#allocation2 + $0xd8] sm:$0xff] }
 0x1b4   : > { %1185 = vst.msk [vmem:[#allocation2 + $0xe8] sm:$0xff] %vm384_vm0, %v1152_v21  ;;  %v2884_v54 = vadd.f32 %v2883_v22, %v2882_v23  ;;  %v2885_v40 = vpop.f32.mrb[94].mxu1  ;;  %v1442_v26 = vmul.f32 %v1393_v51, %v1218_v58 }
 0x1b5   : > { %v2886_v27 = vpop.f32.mrb[95].mxu1 }
 0x1b6   : > { %v1117_v59 = vadd.f32 %v2884_v54, %v3515_v8  ;;  %v2887_v29 = vadd.f32 %v2886_v27, %v2885_v40  ;;  %v1460_v62 = vpack.c.bf16 %v1442_v26, %v1441_v14 }
 0x1b8   : > { %v1153_v30 = vadd.f32 %v1117_v59, %v543_v12  ;;  %v1120_v16 = vadd.f32 %v2887_v29, %v3517_v13  ;;  %2961 = vmatmul.mubr.msk.bf16.gmra.mrb[56].mxu0 %vm384_vm0, %v1460_v62 }
 0x1b9   : > { %v1219_v32 = vld [vmem:[#allocation2 + $0xe0] sm:$0xff] }
 0x1ba   : > { %1186 = vst.msk [vmem:[#allocation2 + $0xf0] sm:$0xff] %vm384_vm0, %v1153_v30  ;;  %v1154_v33 = vadd.f32 %v1120_v16, %v544_v43  ;;  %v1443_v8 = vmul.f32 %v1398_v34, %v1219_v32 }
 0x1bb   : > { %v1220_v63 = vld [vmem:[#allocation2 + $0xe8] sm:$0xff] }
 0x1bc   : > { %1187 = vst.msk [vmem:[#allocation2 + $0xf8] sm:$0xff] %vm384_vm0, %v1154_v33  ;;  %v1444_v38 = vmul.f32 %v1403_v36, %v1220_v63 }
 0x1be   : > { %v1461_v39 = vpack.c.bf16 %v1444_v38, %v1443_v8 }
 0x1c0   : > { %2964 = vmatprep.mubr.msk.bf16.mxu0 %vm384_vm0, %v1461_v39 }
 0x1c1   : > { %v1221_v13 = vld [vmem:[#allocation2 + $0xf0] sm:$0xff] }
 0x1c2   : > { %v1445_v5 = vmul.f32 %v1408_v42, %v1221_v13 }
 0x1c3   : > { %v1222_v44 = vld [vmem:[#allocation2 + $0xf8] sm:$0xff] }
 0x1c4   : > { %v1446_v52 = vmul.f32 %v1413_v31, %v1222_v44 }
 0x1c6   : > { %v1462_v47 = vpack.c.bf16 %v1446_v52, %v1445_v5 }
 0x1c8   : > { %2965 = vmatmul.mubr.msk.bf16.gmra.mrb[60].mxu0 %vm384_vm0, %v1462_v47 }
 0x1c9   : > { %2976 = vmatprep.mubr.msk.bf16.mxu0 %vm384_vm0, %v3124_v25 }
 0x1d0   : > { %2977 = vmatmul.mubr.msk.bf16.vlgmr.msra.gmra.mrb[32].mxu0 %vm384_vm0, %v3125_v48 }
 0x1d1   : > { %2980 = vmatprep.mubr.msk.bf16.mxu0 %vm384_vm0, %v3126_v49 }
 0x1d8   : > { %2981 = vmatmul.mubr.msk.bf16.gmra.mrb[36].mxu0 %vm384_vm0, %v3127_v6 }
 0x1d9   : > { %2984 = vmatprep.mubr.msk.bf16.mxu0 %vm384_vm0, %v3128_v53 }
 0x1e0   : > { %2985 = vmatmul.mubr.msk.bf16.gmra.mrb[40].mxu0 %vm384_vm0, %v3129_v28 }
 0x1e1   : > { %2988 = vmatprep.mubr.msk.bf16.mxu0 %vm384_vm0, %v3130_v55 }
 0x1e8   : > { %2989 = vmatmul.mubr.msk.bf16.gmra.mrb[44].mxu0 %vm384_vm0, %v3131_v35 }
 0x1e9   : > { %2992 = vmatprep.mubr.msk.bf16.mxu0 %vm384_vm0, %v3132_v56 }
 0x1f0   : > { %2993 = vmatmul.mubr.msk.bf16.gmra.mrb[48].mxu0 %vm384_vm0, %v3133_v57 }
 0x1f1   : > { %2996 = vmatprep.mubr.msk.bf16.mxu0 %vm384_vm0, %v3134_v60 }
 0x1f8   : > { %2997 = vmatmul.mubr.msk.bf16.gmra.mrb[52].mxu0 %vm384_vm0, %v3135_v10 }
 0x1f9   : > { %3000 = vmatprep.mubr.msk.bf16.mxu0 %vm384_vm0, %v3136_v46 }
 0x200   : > { %3001 = vmatmul.mubr.msk.bf16.gmra.mrb[56].mxu0 %vm384_vm0, %v3137_v61 }
 0x201   : > { %3004 = vmatprep.mubr.msk.bf16.mxu0 %vm384_vm0, %v3138_v18 }
 0x208   : > { %3005 = vmatmul.mubr.msk.bf16.gmra.mrb[60].mxu0 %vm384_vm0, %v3139_v1 }
 0x2a3   : > { %v2978_v50 = vpop.f32.mrb[32].mxu0 }
 0x2a4   : > { %v2066_v37 = vadd.f32 %v2978_v50, %v3648_v2  ;;  %v1930_v4 = vpop.f32.mrb[33].mxu0 }
 0x2a5   : > { %v2064_v0 = vadd.f32 %v3648_v2, %v1930_v4  ;;  %v2979_v7 = vpop.f32.mrb[34].mxu0 }
 0x2a6   : > { %v2067_v24 = vadd.f32 %v2979_v7, %v3648_v2  ;;  %v1933_v9 = vpop.f32.mrb[35].mxu0  ;;  %v2098_v11 = vmax.f32 %v2066_v37, 0.0 }
 0x2a7   : > { %v2065_v41 = vadd.f32 %v3648_v2, %v1933_v9  ;;  %v2096_v3 = vmax.f32 %v2064_v0, 0.0 }
 0x2a8   : > { %v2099_v19 = vmax.f32 %v2067_v24, 0.0 }
 0x2a9   : > { %v2097_v15 = vmax.f32 %v2065_v41, 0.0 }
 0x2aa   : > { %v2577_v45 = vpack.c.bf16 %v2099_v19, %v2098_v11 }
 0x2ab   : > { %v2572_v17 = vpack.c.bf16 %v2097_v15, %v2096_v3  ;;  %v2982_v20 = vpop.f32.mrb[36].mxu0 }
 0x2ac   : > { %2649 = vst [vmem:[%s3659_s11 + $0x8] sm:$0xff] %v2577_v45   ;;  %v2070_v21 = vadd.f32 %v2982_v20, %v3648_v2  ;;  %v1946_v23 = vpop.f32.mrb[37].mxu0 }
 0x2ad   : > { %2573 = vst [vmem:[%s3659_s11] sm:$0xff] %v2572_v17   ;;  %v2068_v51 = vadd.f32 %v3648_v2, %v1946_v23  ;;  %v2983_v22 = vpop.f32.mrb[38].mxu0 }
 0x2ae   : > { %v2071_v58 = vadd.f32 %v2983_v22, %v3648_v2  ;;  %v1949_v54 = vpop.f32.mrb[39].mxu0  ;;  %v2102_v14 = vmax.f32 %v2070_v21, 0.0 }
 0x2af   : > { %v2069_v40 = vadd.f32 %v3648_v2, %v1949_v54  ;;  %v2100_v12 = vmax.f32 %v2068_v51, 0.0 }
 0x2b0   : > { %v2103_v26 = vmax.f32 %v2071_v58, 0.0 }
 0x2b1   : > { %v2101_v27 = vmax.f32 %v2069_v40, 0.0 }
 0x2b2   : > { %v2587_v59 = vpack.c.bf16 %v2103_v26, %v2102_v14 }
 0x2b3   : > { %v2582_v29 = vpack.c.bf16 %v2101_v27, %v2100_v12  ;;  %v2986_v62 = vpop.f32.mrb[40].mxu0 }
 0x2b4   : > { %2651 = vst [vmem:[%s3659_s11 + $0x18] sm:$0xff] %v2587_v59   ;;  %v2074_v43 = vadd.f32 %v2986_v62, %v3648_v2  ;;  %v1962_v30 = vpop.f32.mrb[41].mxu0 }
 0x2b5   : > { %2650 = vst [vmem:[%s3659_s11 + $0x10] sm:$0xff] %v2582_v29   ;;  %v2072_v16 = vadd.f32 %v3648_v2, %v1962_v30  ;;  %v2987_v32 = vpop.f32.mrb[42].mxu0 }
 0x2b6   : > { %v2075_v33 = vadd.f32 %v2987_v32, %v3648_v2  ;;  %v1965_v34 = vpop.f32.mrb[43].mxu0  ;;  %v2106_v63 = vmax.f32 %v2074_v43, 0.0 }
 0x2b7   : > { %v2073_v36 = vadd.f32 %v3648_v2, %v1965_v34  ;;  %v2104_v38 = vmax.f32 %v2072_v16, 0.0 }
 0x2b8   : > { %v2107_v8 = vmax.f32 %v2075_v33, 0.0 }
 0x2b9   : > { %v2105_v39 = vmax.f32 %v2073_v36, 0.0 }
 0x2ba   : > { %v2597_v13 = vpack.c.bf16 %v2107_v8, %v2106_v63 }
 0x2bb   : > { %v2592_v42 = vpack.c.bf16 %v2105_v39, %v2104_v38  ;;  %v2990_v31 = vpop.f32.mrb[44].mxu0 }
 0x2bc   : > { %2653 = vst [vmem:[%s3659_s11 + $0x28] sm:$0xff] %v2597_v13   ;;  %v2078_v44 = vadd.f32 %v2990_v31, %v3648_v2  ;;  %v1978_v5 = vpop.f32.mrb[45].mxu0 }
 0x2bd   : > { %2652 = vst [vmem:[%s3659_s11 + $0x20] sm:$0xff] %v2592_v42   ;;  %v2076_v52 = vadd.f32 %v3648_v2, %v1978_v5  ;;  %v2991_v25 = vpop.f32.mrb[46].mxu0 }
 0x2be   : > { %v2079_v47 = vadd.f32 %v2991_v25, %v3648_v2  ;;  %v1981_v48 = vpop.f32.mrb[47].mxu0  ;;  %v2110_v6 = vmax.f32 %v2078_v44, 0.0 }
 0x2bf   : > { %v2077_v49 = vadd.f32 %v3648_v2, %v1981_v48  ;;  %v2108_v28 = vmax.f32 %v2076_v52, 0.0 }
 0x2c0   : > { %v2111_v53 = vmax.f32 %v2079_v47, 0.0 }
 0x2c1   : > { %v2109_v55 = vmax.f32 %v2077_v49, 0.0 }
 0x2c2   : > { %v2607_v35 = vpack.c.bf16 %v2111_v53, %v2110_v6 }
 0x2c3   : > { %v2602_v56 = vpack.c.bf16 %v2109_v55, %v2108_v28  ;;  %v2994_v57 = vpop.f32.mrb[48].mxu0 }
 0x2c4   : > { %2655 = vst [vmem:[%s3659_s11 + $0x38] sm:$0xff] %v2607_v35   ;;  %v2082_v60 = vadd.f32 %v2994_v57, %v3648_v2  ;;  %v1994_v10 = vpop.f32.mrb[49].mxu0 }
 0x2c5   : > { %2654 = vst [vmem:[%s3659_s11 + $0x30] sm:$0xff] %v2602_v56   ;;  %v2080_v46 = vadd.f32 %v3648_v2, %v1994_v10  ;;  %v2995_v61 = vpop.f32.mrb[50].mxu0 }
 0x2c6   : > { %v2083_v18 = vadd.f32 %v2995_v61, %v3648_v2  ;;  %v1997_v1 = vpop.f32.mrb[51].mxu0  ;;  %v2114_v37 = vmax.f32 %v2082_v60, 0.0 }
 0x2c7   : > { %v2081_v50 = vadd.f32 %v3648_v2, %v1997_v1  ;;  %v2112_v0 = vmax.f32 %v2080_v46, 0.0 }
 0x2c8   : > { %v2115_v4 = vmax.f32 %v2083_v18, 0.0 }
 0x2c9   : > { %v2113_v7 = vmax.f32 %v2081_v50, 0.0 }
 0x2ca   : > { %v2617_v24 = vpack.c.bf16 %v2115_v4, %v2114_v37 }
 0x2cb   : > { %v2612_v9 = vpack.c.bf16 %v2113_v7, %v2112_v0  ;;  %v2998_v41 = vpop.f32.mrb[52].mxu0 }
 0x2cc   : > { %2657 = vst [vmem:[%s3659_s11 + $0x48] sm:$0xff] %v2617_v24   ;;  %v2086_v11 = vadd.f32 %v2998_v41, %v3648_v2  ;;  %v2010_v19 = vpop.f32.mrb[53].mxu0 }
 0x2cd   : > { %2656 = vst [vmem:[%s3659_s11 + $0x40] sm:$0xff] %v2612_v9   ;;  %v2084_v3 = vadd.f32 %v3648_v2, %v2010_v19  ;;  %v2999_v15 = vpop.f32.mrb[54].mxu0 }
 0x2ce   : > { %v2087_v45 = vadd.f32 %v2999_v15, %v3648_v2  ;;  %v2013_v17 = vpop.f32.mrb[55].mxu0  ;;  %v2118_v21 = vmax.f32 %v2086_v11, 0.0 }
 0x2cf   : > { %v2085_v20 = vadd.f32 %v3648_v2, %v2013_v17  ;;  %v2116_v51 = vmax.f32 %v2084_v3, 0.0 }
 0x2d0   : > { %v2119_v23 = vmax.f32 %v2087_v45, 0.0 }
 0x2d1   : > { %v2117_v22 = vmax.f32 %v2085_v20, 0.0 }
 0x2d2   : > { %v2627_v58 = vpack.c.bf16 %v2119_v23, %v2118_v21 }
 0x2d3   : > { %v2622_v54 = vpack.c.bf16 %v2117_v22, %v2116_v51  ;;  %v3002_v40 = vpop.f32.mrb[56].mxu0 }
 0x2d4   : > { %2659 = vst [vmem:[%s3659_s11 + $0x58] sm:$0xff] %v2627_v58   ;;  %v2090_v14 = vadd.f32 %v3002_v40, %v3648_v2  ;;  %v2026_v26 = vpop.f32.mrb[57].mxu0 }
 0x2d5   : > { %2658 = vst [vmem:[%s3659_s11 + $0x50] sm:$0xff] %v2622_v54   ;;  %v2088_v12 = vadd.f32 %v3648_v2, %v2026_v26  ;;  %v3003_v27 = vpop.f32.mrb[58].mxu0 }
 0x2d6   : > { %v2091_v59 = vadd.f32 %v3003_v27, %v3648_v2  ;;  %v2029_v29 = vpop.f32.mrb[59].mxu0  ;;  %v2122_v43 = vmax.f32 %v2090_v14, 0.0 }
 0x2d7   : > { %v2089_v62 = vadd.f32 %v3648_v2, %v2029_v29  ;;  %v2120_v16 = vmax.f32 %v2088_v12, 0.0 }
 0x2d8   : > { %v2123_v30 = vmax.f32 %v2091_v59, 0.0 }
 0x2d9   : > { %v2121_v32 = vmax.f32 %v2089_v62, 0.0 }
 0x2da   : > { %v2637_v33 = vpack.c.bf16 %v2123_v30, %v2122_v43 }
 0x2db   : > { %v2632_v34 = vpack.c.bf16 %v2121_v32, %v2120_v16  ;;  %v3006_v36 = vpop.f32.mrb[60].mxu0 }
 0x2dc   : > { %2661 = vst [vmem:[%s3659_s11 + $0x68] sm:$0xff] %v2637_v33   ;;  %v2094_v63 = vadd.f32 %v3006_v36, %v3648_v2  ;;  %v2042_v8 = vpop.f32.mrb[61].mxu0 }
 0x2dd   : > { %2660 = vst [vmem:[%s3659_s11 + $0x60] sm:$0xff] %v2632_v34   ;;  %v2092_v38 = vadd.f32 %v3648_v2, %v2042_v8  ;;  %v3007_v39 = vpop.f32.mrb[62].mxu0 }
 0x2de   : > { %v2095_v13 = vadd.f32 %v3007_v39, %v3648_v2  ;;  %v2045_v42 = vpop.f32.mrb[63].mxu0  ;;  %v2126_v44 = vmax.f32 %v2094_v63, 0.0 }
 0x2df   : > { %v2093_v31 = vadd.f32 %v3648_v2, %v2045_v42  ;;  %v2124_v52 = vmax.f32 %v2092_v38, 0.0 }
 0x2e0   : > { %v2127_v5 = vmax.f32 %v2095_v13, 0.0 }
 0x2e1   : > { %v2125_v25 = vmax.f32 %v2093_v31, 0.0 }
 0x2e2   : > { %v2647_v47 = vpack.c.bf16 %v2127_v5, %v2126_v44 }
 0x2e3   : > { %v2642_v48 = vpack.c.bf16 %v2125_v25, %v2124_v52 }
 0x2e4   : > { %2663 = vst [vmem:[%s3659_s11 + $0x78] sm:$0xff] %v2647_v47  }
 0x2e5   : > { %2662 = vst [vmem:[%s3659_s11 + $0x70] sm:$0xff] %v2642_v48  }
 0x2e6 PF: > { %s17_s26 = sadd.s32 1, %s3162_s26   ;;  %s3722_s24 = smov %s3158_s25 }
 0x2e7   : > { %p14_p6 = scmp.ge.s32.totalorder %s17_s26, 4   ;;  %s3723_s25 = smov %s3725_s27 }
 0x2e9   :  { %16 = sbr.rel (!%p14_p6) target bundleno = 2 (0x2), region = 95 }

// kernel: cluster_gcn_forward.3
= control target key start
LH: loop header
LB: loop body
LE: loop exit
PB: predicated region body
PF: predicated region fallthrough
CT: control target
= control target key end

     0   :  { %s3323_s24 = smov 0   ;;  %s3325_s25 = smov 0   ;;  %s4031_s0 = inlined_call_operand.vmem [shape: s8[512,512], index: 0, kind: input, shape index: {}]   ;;  %s4032_s1 = inlined_call_operand.vmem [shape: bf16[512,128], index: 1, kind: input, shape index: {}, may-alias: {1,2}]   ;;  %s4033_s2 = inlined_call_operand.vmem [shape: bf16[512,128], index: 2, kind: input, shape index: {}, may-alias: {1,2}]   ;;  %s4034_s3 = inlined_call_operand.vmem [shape: f32[512,1], index: 3, kind: input, shape index: {}]   ;;  %s4035_s4 = inlined_call_operand.vmem [shape: bf16[128,128], index: 4, kind: input, shape index: {}]   ;;  %s4036_s5 = inlined_call_operand.vmem [shape: bf16[128,128], index: 5, kind: input, shape index: {}]   ;;  %s4037_s6 = inlined_call_operand.vmem [shape: f32[1,128], index: 6, kind: input, shape index: {}]   ;;  %s4038_s7 = inlined_call_operand.vmem [shape: f32[512,128], index: 7, kind: output, shape index: {}]  }
   0x1   :  { %s3327_s26 = smov 0  }
   0x2 LB: > { %s29_s27 = sadd.s32 1, %s3276_s25  ;;  %p2545_p0 = scmp.ge.s32.totalorder %s3280_s26, 1  ;;  %s3280_s26 = sphi %s3327_s26, %s17_s26   ;;  %s3276_s25 = sphi %s3325_s25, %s4040_s25   ;;  %s3272_s24 = sphi %s3323_s24, %s4039_s24  }
   0x3   : > { %p31_p1 = scmp.ge.s32.totalorder %s29_s27, 2  ;;  %p291_p2 = scmp.lt.s32.totalorder %s3280_s26, 3 }
   0x5   : > { %s4042_s27 = smov (%p31_p1, %s29_s27), 0  ;;  %p292_p3 = pnand %p2545_p0, %p291_p2 }
   0x6   : > { %v3066_v0 = vld [vmem:[%s4032_s1 + $0x40] sm:$0xff] (!%p292_p3)   ;;  %s2546_s30 = sshll.u32 (!%p292_p3), %s3272_s24, 3  ;;  %v3068_v2 = vld [vmem:[%s4032_s1 + $0x48] sm:$0xff] (!%p292_p3)   ;;  %v3070_v4 = vld [vmem:[%s4032_s1 + $0x50] sm:$0xff] (!%p292_p3)   ;;  %s2549_s11 = sshll.u32 (!%p292_p3), %s3272_s24, 5  ;;  %v3282_v52 = vmov (!%p292_p3), 0  }
   0x7   : > { %295 = sbr.rel (%p292_p3) target bundleno = 1051 (0x41b), region = 48  ;;  %v3067_v1 = vld [vmem:[%s4032_s1] sm:$0xff] (!%p292_p3)   ;;  %2991 = vmatprep.subr.bf16.mxu1 (!%p292_p3), %v3066_v0  ;;  %p345_p4 = scmp.lt.s32.totalorder (!%p292_p3), %s2546_s30, 15  ;;  %2623 = vmatprep.subr.bf16.mxu0 (!%p292_p3), %v3066_v0  ;;  %v3069_v3 = vld [vmem:[%s4032_s1 + $0x8] sm:$0xff] (!%p292_p3)   ;;  %v3071_v5 = vld [vmem:[%s4032_s1 + $0x10] sm:$0xff] (!%p292_p3)  }
   0x8   : > { %2999 = vmatpush3.bf16.msra.mxu1 (!%p292_p3), %v3067_v1  ;;  %2624 = vmatpush3.bf16.msra.mxu0 (!%p292_p3), %v3067_v1  ;;  %v3072_v6 = vld [vmem:[%s4032_s1 + $0x58] sm:$0xff] (!%p292_p3)   ;;  %v3074_v8 = vld [vmem:[%s4032_s1 + $0x60] sm:$0xff] (!%p292_p3)   ;;  %v3076_v10 = vld [vmem:[%s4032_s1 + $0x68] sm:$0xff] (!%p292_p3)   ;;  %p362_p5 = scmp.lt.s32.totalorder (!%p292_p3), %s2549_s11, 63 }
   0x9   : > { %2992 = vmatprep.subr.bf16.mxu1 (!%p292_p3), %v3068_v2  ;;  %2625 = vmatprep.subr.bf16.mxu0 (!%p292_p3), %v3068_v2  ;;  %v3073_v7 = vld [vmem:[%s4032_s1 + $0x18] sm:$0xff] (!%p292_p3)   ;;  %v3075_v9 = vld [vmem:[%s4032_s1 + $0x20] sm:$0xff] (!%p292_p3)   ;;  %v3077_v13 = vld [vmem:[%s4032_s1 + $0x28] sm:$0xff] (!%p292_p3)  }
   0xa   : > { %v3078_v14 = vld [vmem:[%s4032_s1 + $0x70] sm:$0xff] (!%p292_p3)   ;;  %v3080_v16 = vld [vmem:[%s4032_s1 + $0x78] sm:$0xff] (!%p292_p3)   ;;  %v3082_v19 = vld [vmem:[%s4032_s1 + $0xc0] sm:$0xff] (!%p292_p3)   ;;  %3064 = vset.pattern.permute.xlu0 (!%p292_p3), %v3282_v52  ;;  %3065 = vset.pattern.permute.xlu1 (!%p292_p3), %v3282_v52 }
   0xb   : > { %v3079_v15 = vld [vmem:[%s4032_s1 + $0x30] sm:$0xff] (!%p292_p3)   ;;  %v3081_v17 = vld [vmem:[%s4032_s1 + $0x38] sm:$0xff] (!%p292_p3)   ;;  %v3083_v22 = vld [vmem:[%s4032_s1 + $0x80] sm:$0xff] (!%p292_p3)  }
   0xc   : > { %3000 = vmatpush3.bf16.msra.mxu1 (!%p292_p3), %v3069_v3  ;;  %2626 = vmatpush3.bf16.msra.mxu0 (!%p292_p3), %v3069_v3  ;;  %v3084_v23 = vld [vmem:[%s4032_s1 + $0xc8] sm:$0xff] (!%p292_p3)   ;;  %v3086_v30 = vld [vmem:[%s4032_s1 + $0xd0] sm:$0xff] (!%p292_p3)   ;;  %v3088_v35 = vld [vmem:[%s4032_s1 + $0xd8] sm:$0xff] (!%p292_p3)  }
   0xd   : > { %2993 = vmatprep.subr.bf16.mxu1 (!%p292_p3), %v3070_v4  ;;  %2627 = vmatprep.subr.bf16.mxu0 (!%p292_p3), %v3070_v4  ;;  %v3085_v25 = vld [vmem:[%s4032_s1 + $0x88] sm:$0xff] (!%p292_p3)   ;;  %v3087_v34 = vld [vmem:[%s4032_s1 + $0x90] sm:$0xff] (!%p292_p3)   ;;  %v3089_v38 = vld [vmem:[%s4032_s1 + $0x98] sm:$0xff] (!%p292_p3)  }
   0xe   : > { %s4044_s30 = smov (!%p345_p4, %s2546_s30), 15  ;;  %v3090_v40 = vld [vmem:[%s4032_s1 + $0xe0] sm:$0xff]   ;;  %v3092_v45 = vld [vmem:[%s4032_s1 + $0xe8] sm:$0xff]   ;;  %v3094_v51 = vld [vmem:[%s4032_s1 + $0xf0] sm:$0xff]   ;;  %s4046_s11 = smov (!%p362_p5, %s2549_s11), 63 }
   0xf   : > { %s2622_s20 = sshll.u32 %s4044_s30, 5  ;;  %v3091_v42 = vld [vmem:[%s4032_s1 + $0xa0] sm:$0xff]   ;;  %v3093_v47 = vld [vmem:[%s4032_s1 + $0xa8] sm:$0xff]   ;;  %s2552_s24 = sshll.u32 %s4046_s11, 3  ;;  %v3095_v55 = vld [vmem:[%s4032_s1 + $0xb0] sm:$0xff]  }
  0x10   : > { %3001 = vmatpush3.bf16.msra.mxu1 %v3071_v5  ;;  %2628 = vmatpush3.bf16.msra.mxu0 %v3071_v5  ;;  %s3374_s9 = scalar_lea.vmem %s4031_s0, %s2622_s20  ;;  %s3457_s18 = scalar_lea.vmem %s4034_s3, %s2552_s24  ;;  %v3096_v56 = vld [vmem:[%s4032_s1 + $0xf8] sm:$0xff]  }
  0x11   : > { %2994 = vmatprep.subr.bf16.mxu1 %v3072_v6  ;;  %2629 = vmatprep.subr.bf16.mxu0 %v3072_v6  ;;  %v433_v11 = vld [vmem:[%s3374_s9 + $0x88] sm:$0xff]  ;;  %v432_v18 = vld [vmem:[%s3374_s9 + $0x80] sm:$0xff]  ;;  %v1223_v61 = vld [vmem:[%s3457_s18 + $0x10] sm:$0xff]  ;;  %s2550_s23 = sshll.u32 %s4046_s11, 2  ;;  %s3956_s30 = scalar_lea.vmem %s4038_s7, %s2552_s24 }
  0x12   : > { %v481_v12 = vunpack.c.l.s8.bf16 %v433_v11  ;;  %v480_v20 = vunpack.c.l.s8.bf16 %v432_v18  ;;  %v485_v21 = vunpack.c.h.s8.bf16 %v433_v11  ;;  %v417_v24 = vld [vmem:[%s3374_s9 + $0x8] sm:$0xff]  ;;  %v416_v28 = vld [vmem:[%s3374_s9] sm:$0xff]  ;;  %v484_v32 = vunpack.c.h.s8.bf16 %v432_v18  ;;  %v3097_v63 = vld [vmem:[%s4032_s1 + $0xb8] sm:$0xff]   ;;  %1265 = vperm.xlu1 %3065, %v1223_v61   ;;  %s3619_s8 = scalar_lea.vmem %s4033_s2, %s2550_s23 }
  0x13   : > { %v449_v26 = vunpack.c.l.s8.bf16 %v417_v24  ;;  %v453_v27 = vunpack.c.h.s8.bf16 %v417_v24  ;;  %v437_v29 = vld [vmem:[%s3374_s9 + $0xa8] sm:$0xff]  ;;  %v448_v31 = vunpack.c.l.s8.bf16 %v416_v28  ;;  %v436_v37 = vld [vmem:[%s3374_s9 + $0xa0] sm:$0xff]  ;;  %v452_v39 = vunpack.c.h.s8.bf16 %v416_v28  ;;  %v1224_v1 = vld [vmem:[%s3457_s18 + $0x18] sm:$0xff] }
  0x14   : > { %3002 = vmatpush3.bf16.msra.mxu1 %v3073_v7  ;;  %2630 = vmatpush3.bf16.msra.mxu0 %v3073_v7  ;;  %v489_v33 = vunpack.c.l.s8.bf16 %v437_v29  ;;  %v421_v36 = vld [vmem:[%s3374_s9 + $0x28] sm:$0xff]  ;;  %v420_v43 = vld [vmem:[%s3374_s9 + $0x20] sm:$0xff]  ;;  %v488_v44 = vunpack.c.l.s8.bf16 %v436_v37  ;;  %v493_v46 = vunpack.c.h.s8.bf16 %v437_v29  ;;  %v492_v53 = vunpack.c.h.s8.bf16 %v436_v37  ;;  %v1228_v11 = vld [vmem:[%s3457_s18 + $0x38] sm:$0xff] }
  0x15   : > { %2995 = vmatprep.subr.bf16.mxu1 %v3074_v8  ;;  %2631 = vmatprep.subr.bf16.mxu0 %v3074_v8  ;;  %v457_v41 = vunpack.c.l.s8.bf16 %v421_v36  ;;  %v441_v48 = vld [vmem:[%s3374_s9 + $0xc8] sm:$0xff]  ;;  %v456_v49 = vunpack.c.l.s8.bf16 %v420_v43  ;;  %v461_v50 = vunpack.c.h.s8.bf16 %v421_v36  ;;  %v1221_v58 = vld [vmem:[%s3457_s18] sm:$0xff]  ;;  %v460_v59 = vunpack.c.h.s8.bf16 %v420_v43  ;;  %v419_v29 = vld [vmem:[%s3374_s9 + $0x18] sm:$0xff] }
  0x16   : > { %896 = vmatprep.mubr.bf16.mxu1 %v481_v12  ;;  %832 = vmatprep.mubr.bf16.mxu0 %v449_v26  ;;  %v497_v54 = vunpack.c.l.s8.bf16 %v441_v48  ;;  %v425_v57 = vld [vmem:[%s3374_s9 + $0x48] sm:$0xff]  ;;  %v440_v62 = vld [vmem:[%s3374_s9 + $0xc0] sm:$0xff]  ;;  %v501_v3 = vunpack.c.h.s8.bf16 %v441_v48  ;;  %v418_v37 = vld [vmem:[%s3374_s9 + $0x10] sm:$0xff] }
  0x17   : > { %1255 = vperm.xlu0 %3064, %v1221_v58   ;;  %v1222_v60 = vld [vmem:[%s3457_s18 + $0x8] sm:$0xff]  ;;  %v465_v0 = vunpack.c.l.s8.bf16 %v425_v57  ;;  %v496_v2 = vunpack.c.l.s8.bf16 %v440_v62  ;;  %v424_v4 = vld [vmem:[%s3374_s9 + $0x40] sm:$0xff]  ;;  %1270 = vperm.xlu1 %3065, %v1224_v1   ;;  %v469_v8 = vunpack.c.h.s8.bf16 %v425_v57  ;;  %v500_v12 = vunpack.c.h.s8.bf16 %v440_v62  ;;  %v1247_v52 = vld [vmem:[%s3457_s18 + $0xd0] sm:$0xff] }
  0x18   : > { %3003 = vmatpush3.bf16.msra.mxu1 %v3075_v9  ;;  %2632 = vmatpush3.bf16.msra.mxu0 %v3075_v9  ;;  %v464_v5 = vunpack.c.l.s8.bf16 %v424_v4  ;;  %v1225_v6 = vld [vmem:[%s3457_s18 + $0x20] sm:$0xff]  ;;  %v1226_v7 = vld [vmem:[%s3457_s18 + $0x28] sm:$0xff]  ;;  %v427_v57 = vld [vmem:[%s3374_s9 + $0x58] sm:$0xff] }
  0x19   : > { %2996 = vmatprep.subr.bf16.mxu1 %v3076_v10  ;;  %2633 = vmatprep.subr.bf16.mxu0 %v3076_v10  ;;  %v445_v9 = vld [vmem:[%s3374_s9 + $0xe8] sm:$0xff]  ;;  %v1227_v10 = vld [vmem:[%s3457_s18 + $0x30] sm:$0xff]  ;;  %v444_v18 = vld [vmem:[%s3374_s9 + $0xe0] sm:$0xff]  ;;  %v471_v1 = vunpack.c.h.s8.bf16 %v427_v57 }
  0x1a   : > { %v428_v24 = vld [vmem:[%s3374_s9 + $0x60] sm:$0xff]  ;;  %v1238_v36 = vld [vmem:[%s3457_s18 + $0x88] sm:$0xff]  ;;  %v1251_v61 = vld [vmem:[%s3457_s18 + $0xf0] sm:$0xff] }
  0x1b   : > { %1260 = vperm.xlu0 %3064, %v1222_v60   ;;  %1280 = vperm.xlu1 %3065, %v1226_v7   ;;  %v1233_v26 = vld [vmem:[%s3457_s18 + $0x60] sm:$0xff]  ;;  %v1242_v43 = vld [vmem:[%s3457_s18 + $0xa8] sm:$0xff]  ;;  %v467_v60 = vunpack.c.l.s8.bf16 %v427_v57  ;;  %v1252_v62 = vld [vmem:[%s3457_s18 + $0xf8] sm:$0xff] }
  0x1c   : > { %3004 = vmatpush3.bf16.msra.mxu1 %v3077_v13  ;;  %2634 = vmatpush3.bf16.msra.mxu0 %v3077_v13  ;;  %v505_v13 = vunpack.c.l.s8.bf16 %v445_v9  ;;  %v1250_v58 = vld [vmem:[%s3457_s18 + $0xe8] sm:$0xff] }
  0x1d   : > { %2997 = vmatprep.subr.bf16.mxu1 %v3078_v14  ;;  %2635 = vmatprep.subr.bf16.mxu0 %v3078_v14  ;;  %v429_v14 = vld [vmem:[%s3374_s9 + $0x68] sm:$0xff] }
  0x1e   : > { %v477_v28 = vunpack.c.h.s8.bf16 %v429_v14 }
  0x1f   : > { %1275 = vperm.xlu0 %3064, %v1225_v6   ;;  %1290 = vperm.xlu1 %3065, %v1228_v11   ;;  %v434_v11 = vld [vmem:[%s3374_s9 + $0x90] sm:$0xff] }
  0x20   : > { %3005 = vmatpush3.bf16.msra.mxu1 %v3079_v15  ;;  %2636 = vmatpush3.bf16.msra.mxu0 %v3079_v15  ;;  %v468_v15 = vunpack.c.h.s8.bf16 %v424_v4 }
  0x21   : > { %2998 = vmatprep.subr.bf16.mxu1 %v3080_v16  ;;  %2637 = vmatprep.subr.bf16.mxu0 %v3080_v16  ;;  %v1229_v16 = vld [vmem:[%s3457_s18 + $0x40] sm:$0xff] }
  0x23   : > { %1285 = vperm.xlu0 %3064, %v1227_v10  }
  0x24   : > { %3006 = vmatpush3.bf16.msra.mxu1 %v3081_v17  ;;  %2638 = vmatpush3.bf16.msra.mxu0 %v3081_v17  ;;  %v1230_v17 = vld [vmem:[%s3457_s18 + $0x48] sm:$0xff] }
  0x25   : > { %2735 = vmatprep.subr.bf16.mxu1 %v3082_v19  ;;  %v473_v19 = vunpack.c.l.s8.bf16 %v429_v14  ;;  %1300 = vperm.xlu1 %3065, %v1230_v17   ;;  %v439_v14 = vld [vmem:[%s3374_s9 + $0xb8] sm:$0xff]  ;;  %v3098_v17 = vld [vmem:[%s4036_s5] sm:$0xff]  }
  0x26   : > { %2895 = vmatprep.subr.bf16.mxu0 %v3098_v17 }
  0x27   : > { %897 = vmatmul.mubr.bf16.vlgmr.msra.gmra.mrb[0].mxu1 %v480_v20  ;;  %833 = vmatmul.mubr.bf16.vlgmr.msra.gmra.mrb[0].mxu0 %v448_v31  ;;  %v1231_v20 = vld [vmem:[%s3457_s18 + $0x50] sm:$0xff]  ;;  %v1236_v31 = vld [vmem:[%s3457_s18 + $0x78] sm:$0xff] }
  0x28   : > { %2736 = vmatpush3.bf16.msra.mxu1 %v3083_v22  ;;  %904 = vmatprep.mubr.bf16.mxu1 %v485_v21  ;;  %v1232_v21 = vld [vmem:[%s3457_s18 + $0x58] sm:$0xff]  ;;  %v504_v22 = vunpack.c.l.s8.bf16 %v444_v18 }
  0x29   : > { %2737 = vmatprep.subr.bf16.mxu1 %v3084_v23  ;;  %840 = vmatprep.mubr.bf16.mxu0 %v453_v27  ;;  %v509_v23 = vunpack.c.h.s8.bf16 %v445_v9  ;;  %v1234_v27 = vld [vmem:[%s3457_s18 + $0x68] sm:$0xff] }
  0x2a   : > { %1295 = vperm.xlu0 %3064, %v1229_v16   ;;  %1310 = vperm.xlu1 %3065, %v1232_v21   ;;  %v491_v16 = vunpack.c.l.s8.bf16 %v439_v14  ;;  %v495_v21 = vunpack.c.h.s8.bf16 %v439_v14 }
  0x2b   : > { %2896 = vmatpush3.bf16.msra.mxu0 %v3098_v17 }
  0x2c   : > { %2738 = vmatpush3.bf16.msra.mxu1 %v3085_v25  ;;  %v472_v25 = vunpack.c.l.s8.bf16 %v428_v24 }
  0x2d   : > { %2739 = vmatprep.subr.bf16.mxu1 %v3086_v30  ;;  %v1235_v30 = vld [vmem:[%s3457_s18 + $0x70] sm:$0xff] }
  0x2e   : > { %1305 = vperm.xlu0 %3064, %v1231_v20   ;;  %1320 = vperm.xlu1 %3065, %v1234_v27   ;;  %v3102_v27 = vld [vmem:[%s4036_s5 + $0x20] sm:$0xff]  }
  0x2f   : > { %905 = vmatmul.mubr.bf16.gmra.mrb[4].mxu1 %v484_v32  ;;  %841 = vmatmul.mubr.bf16.gmra.mrb[4].mxu0 %v452_v39  ;;  %v508_v32 = vunpack.c.h.s8.bf16 %v444_v18  ;;  %v1240_v39 = vld [vmem:[%s3457_s18 + $0x98] sm:$0xff]  ;;  %v438_v18 = vld [vmem:[%s3374_s9 + $0xb0] sm:$0xff] }
  0x30   : > { %912 = vmatprep.mubr.bf16.mxu1 %v489_v33  ;;  %2740 = vmatpush3.bf16.msra.mxu1 %v3087_v34  ;;  %v451_v33 = vunpack.c.l.s8.bf16 %v419_v29  ;;  %v476_v34 = vunpack.c.h.s8.bf16 %v428_v24  ;;  %v490_v20 = vunpack.c.l.s8.bf16 %v438_v18  ;;  %v443_v24 = vld [vmem:[%s3374_s9 + $0xd8] sm:$0xff] }
  0x31   : > { %2741 = vmatprep.subr.bf16.mxu1 %v3088_v35  ;;  %848 = vmatprep.mubr.bf16.mxu0 %v457_v41  ;;  %v1237_v35 = vld [vmem:[%s3457_s18 + $0x80] sm:$0xff]  ;;  %v455_v41 = vunpack.c.h.s8.bf16 %v419_v29  ;;  %v3103_v29 = vld [vmem:[%s4036_s5 + $0x28] sm:$0xff]  }
  0x32   : > { %1315 = vperm.xlu0 %3064, %v1233_v26   ;;  %1330 = vperm.xlu1 %3065, %v1236_v31   ;;  %v499_v26 = vunpack.c.l.s8.bf16 %v443_v24  ;;  %v503_v31 = vunpack.c.h.s8.bf16 %v443_v24 }
  0x34   : > { %2742 = vmatpush3.bf16.msra.mxu1 %v3089_v38  ;;  %v1239_v38 = vld [vmem:[%s3457_s18 + $0x90] sm:$0xff] }
  0x35   : > { %2743 = vmatprep.subr.bf16.mxu1 %v3090_v40  ;;  %v450_v40 = vunpack.c.l.s8.bf16 %v418_v37 }
  0x36   : > { %1325 = vperm.xlu0 %3064, %v1235_v30   ;;  %1340 = vperm.xlu1 %3065, %v1238_v36  }
  0x37   : > { %913 = vmatmul.mubr.bf16.gmra.mrb[8].mxu1 %v488_v44  ;;  %849 = vmatmul.mubr.bf16.gmra.mrb[8].mxu0 %v456_v49  ;;  %v423_v44 = vld [vmem:[%s3374_s9 + $0x38] sm:$0xff]  ;;  %v1245_v49 = vld [vmem:[%s3457_s18 + $0xc0] sm:$0xff] }
  0x38   : > { %920 = vmatprep.mubr.bf16.mxu1 %v493_v46  ;;  %2744 = vmatpush3.bf16.msra.mxu1 %v3091_v42  ;;  %v1241_v42 = vld [vmem:[%s3457_s18 + $0xa0] sm:$0xff]  ;;  %v1244_v46 = vld [vmem:[%s3457_s18 + $0xb8] sm:$0xff]  ;;  %v459_v48 = vunpack.c.l.s8.bf16 %v423_v44 }
  0x39   : > { %2745 = vmatprep.subr.bf16.mxu1 %v3092_v45  ;;  %856 = vmatprep.mubr.bf16.mxu0 %v461_v50  ;;  %v1243_v45 = vld [vmem:[%s3457_s18 + $0xb0] sm:$0xff]  ;;  %v1246_v50 = vld [vmem:[%s3457_s18 + $0xc8] sm:$0xff] }
  0x3a   : > { %1335 = vperm.xlu0 %3064, %v1237_v35   ;;  %1350 = vperm.xlu1 %3065, %v1240_v39  }
  0x3c   : > { %2746 = vmatpush3.bf16.msra.mxu1 %v3093_v47  ;;  %v454_v47 = vunpack.c.h.s8.bf16 %v418_v37  ;;  %v446_v37 = vld [vmem:[%s3374_s9 + $0xf0] sm:$0xff] }
  0x3d   : > { %2747 = vmatprep.subr.bf16.mxu1 %v3094_v51  ;;  %v422_v51 = vld [vmem:[%s3374_s9 + $0x30] sm:$0xff] }
  0x3e   : > { %1345 = vperm.xlu0 %3064, %v1239_v38   ;;  %1360 = vperm.xlu1 %3065, %v1242_v43   ;;  %v506_v38 = vunpack.c.l.s8.bf16 %v446_v37 }
  0x3f   : > { %921 = vmatmul.mubr.bf16.gmra.mrb[12].mxu1 %v492_v53  ;;  %857 = vmatmul.mubr.bf16.gmra.mrb[12].mxu0 %v460_v59  ;;  %v1248_v53 = vld [vmem:[%s3457_s18 + $0xd8] sm:$0xff]  ;;  %v462_v59 = vunpack.c.h.s8.bf16 %v422_v51 }
  0x40   : > { %928 = vmatprep.mubr.bf16.mxu1 %v497_v54  ;;  %2748 = vmatpush3.bf16.msra.mxu1 %v3095_v55  ;;  %v458_v54 = vunpack.c.l.s8.bf16 %v422_v51  ;;  %v463_v55 = vunpack.c.h.s8.bf16 %v423_v44 }
  0x41   : > { %2749 = vmatprep.subr.bf16.mxu1 %v3096_v56  ;;  %864 = vmatprep.mubr.bf16.mxu0 %v465_v0  ;;  %v1249_v56 = vld [vmem:[%s3457_s18 + $0xe0] sm:$0xff] }
  0x42   : > { %1355 = vperm.xlu0 %3064, %v1241_v42   ;;  %1370 = vperm.xlu1 %3065, %v1244_v46  }
  0x44   : > { %2750 = vmatpush3.bf16.msra.mxu1 %v3097_v63  ;;  %v426_v63 = vld [vmem:[%s3374_s9 + $0x50] sm:$0xff] }
  0x45   : > { %v466_v0 = vunpack.c.l.s8.bf16 %v426_v63 }
  0x46   : > { %1365 = vperm.xlu0 %3064, %v1243_v45   ;;  %1380 = vperm.xlu1 %3065, %v1246_v50  }
  0x47   : > { %929 = vmatmul.mubr.bf16.gmra.mrb[16].mxu1 %v496_v2  ;;  %865 = vmatmul.mubr.bf16.gmra.mrb[16].mxu0 %v464_v5  ;;  %v431_v2 = vld [vmem:[%s3374_s9 + $0x78] sm:$0xff]  ;;  %v430_v5 = vld [vmem:[%s3374_s9 + $0x70] sm:$0xff] }
  0x48   : > { %936 = vmatprep.mubr.bf16.mxu1 %v501_v3  ;;  %872 = vmatprep.mubr.bf16.mxu0 %v469_v8  ;;  %v470_v3 = vunpack.c.h.s8.bf16 %v426_v63  ;;  %v475_v4 = vunpack.c.l.s8.bf16 %v431_v2  ;;  %v474_v6 = vunpack.c.l.s8.bf16 %v430_v5  ;;  %v479_v7 = vunpack.c.h.s8.bf16 %v431_v2  ;;  %v435_v8 = vld [vmem:[%s3374_s9 + $0x98] sm:$0xff]  ;;  %v3563_v2 = vld [vmem:[%s4035_s4] sm:$0xff]  }
  0x49   : > { %v478_v9 = vunpack.c.h.s8.bf16 %v430_v5  ;;  %v483_v10 = vunpack.c.l.s8.bf16 %v435_v8 }
  0x4a   : > { %1375 = vperm.xlu0 %3064, %v1245_v49   ;;  %1390 = vperm.xlu1 %3065, %v1248_v53  }
  0x4e   : > { %1385 = vperm.xlu0 %3064, %v1247_v52   ;;  %1400 = vperm.xlu1 %3065, %v1250_v58  }
  0x4f   : > { %937 = vmatmul.mubr.bf16.gmra.mrb[20].mxu1 %v500_v12  ;;  %873 = vmatmul.mubr.bf16.gmra.mrb[20].mxu0 %v468_v15  ;;  %v482_v12 = vunpack.c.l.s8.bf16 %v434_v11  ;;  %v486_v15 = vunpack.c.h.s8.bf16 %v434_v11 }
  0x50   : > { %944 = vmatprep.mubr.bf16.mxu1 %v505_v13  ;;  %880 = vmatprep.mubr.bf16.mxu0 %v473_v19  ;;  %v487_v13 = vunpack.c.h.s8.bf16 %v435_v8  ;;  %v3099_v19 = vld [vmem:[%s4036_s5 + $0x8] sm:$0xff]  }
  0x51   : > { %2897 = vmatprep.subr.bf16.mxu0 %v3099_v19 }
  0x52   : > { %1395 = vperm.xlu0 %3064, %v1249_v56   ;;  %1410 = vperm.xlu1 %3065, %v1252_v62  }
  0x53   : > { %2898 = vmatpush3.bf16.msra.mxu0 %v3099_v19 }
  0x56   : > { %1405 = vperm.xlu0 %3064, %v1251_v61  }
  0x57   : > { %945 = vmatmul.mubr.bf16.gmra.mrb[24].mxu1 %v504_v22  ;;  %881 = vmatmul.mubr.bf16.gmra.mrb[24].mxu0 %v472_v25  ;;  %v3100_v22 = vld [vmem:[%s4036_s5 + $0x10] sm:$0xff]   ;;  %v494_v25 = vunpack.c.h.s8.bf16 %v438_v18 }
  0x58   : > { %952 = vmatprep.mubr.bf16.mxu1 %v509_v23  ;;  %888 = vmatprep.mubr.bf16.mxu0 %v477_v28  ;;  %v3101_v23 = vld [vmem:[%s4036_s5 + $0x18] sm:$0xff]   ;;  %v442_v28 = vld [vmem:[%s3374_s9 + $0xd0] sm:$0xff] }
  0x59   : > { %2899 = vmatprep.subr.bf16.mxu0 %v3100_v22  ;;  %v498_v30 = vunpack.c.l.s8.bf16 %v442_v28  ;;  %v502_v35 = vunpack.c.h.s8.bf16 %v442_v28 }
  0x5a   : > { %2900 = vmatpush3.bf16.msra.mxu0 %v3100_v22 }
  0x5b   : > { %2901 = vmatprep.subr.bf16.mxu0 %v3101_v23 }
  0x5e   : > { %2902 = vmatpush3.bf16.msra.mxu0 %v3101_v23 }
  0x5f   : > { %953 = vmatmul.mubr.bf16.gmra.mrb[28].mxu1 %v508_v32  ;;  %889 = vmatmul.mubr.bf16.gmra.mrb[28].mxu0 %v476_v34  ;;  %v3104_v32 = vld [vmem:[%s4036_s5 + $0x30] sm:$0xff]   ;;  %v447_v34 = vld [vmem:[%s3374_s9 + $0xf8] sm:$0xff] }
  0x60   : > { %993 = vmatprep.mubr.bf16.mxu1 %v451_v33  ;;  %2903 = vmatprep.subr.bf16.mxu0 %v3102_v27  ;;  %v3105_v33 = vld [vmem:[%s4036_s5 + $0x38] sm:$0xff]   ;;  %v507_v36 = vunpack.c.l.s8.bf16 %v447_v34  ;;  %v511_v39 = vunpack.c.h.s8.bf16 %v447_v34 }
  0x62   : > { %2904 = vmatpush3.bf16.msra.mxu0 %v3102_v27 }
  0x63   : > { %2905 = vmatprep.subr.bf16.mxu0 %v3103_v29 }
  0x66   : > { %2906 = vmatpush3.bf16.msra.mxu0 %v3103_v29 }
  0x67   : > { %994 = vmatmul.mubr.bf16.vlgmr.msra.gmra.mrb[32].mxu1 %v450_v40  ;;  %2907 = vmatprep.subr.bf16.mxu0 %v3104_v32  ;;  %v510_v40 = vunpack.c.h.s8.bf16 %v446_v37 }
  0x68   : > { %1001 = vmatprep.mubr.bf16.mxu1 %v455_v41 }
  0x6a   : > { %2908 = vmatpush3.bf16.msra.mxu0 %v3104_v32 }
  0x6b   : > { %2909 = vmatprep.subr.bf16.mxu0 %v3105_v33 }
  0x6e   : > { %2910 = vmatpush3.bf16.msra.mxu0 %v3105_v33 }
  0x6f   : > { %1002 = vmatmul.mubr.bf16.gmra.mrb[36].mxu1 %v454_v47  ;;  %2943 = vmatprep.subr.bf16.mxu0 %v3563_v2 }
  0x70   : > { %1009 = vmatprep.mubr.bf16.mxu1 %v459_v48 }
  0x77   : > { %1010 = vmatmul.mubr.bf16.gmra.mrb[40].mxu1 %v458_v54 }
  0x78   : > { %1017 = vmatprep.mubr.bf16.mxu1 %v463_v55 }
  0x7f   : > { %1018 = vmatmul.mubr.bf16.gmra.mrb[44].mxu1 %v462_v59 }
  0x80   : > { %1025 = vmatprep.mubr.bf16.mxu1 %v467_v60 }
  0x87   : > { %1026 = vmatmul.mubr.bf16.gmra.mrb[48].mxu1 %v466_v0 }
  0x88   : > { %1033 = vmatprep.mubr.bf16.mxu1 %v471_v1 }
  0x8f   : > { %1034 = vmatmul.mubr.bf16.gmra.mrb[52].mxu1 %v470_v3 }
  0x90   : > { %1041 = vmatprep.mubr.bf16.mxu1 %v475_v4 }
  0x97   : > { %1042 = vmatmul.mubr.bf16.gmra.mrb[56].mxu1 %v474_v6 }
  0x98   : > { %1049 = vmatprep.mubr.bf16.mxu1 %v479_v7 }
  0x9f   : > { %1050 = vmatmul.mubr.bf16.gmra.mrb[60].mxu1 %v478_v9 }
  0xa0   : > { %1057 = vmatprep.mubr.bf16.mxu1 %v483_v10 }
  0xa7   : > { %1058 = vmatmul.mubr.bf16.gmra.mrb[64].mxu1 %v482_v12 }
  0xa8   : > { %1065 = vmatprep.mubr.bf16.mxu1 %v487_v13 }
  0xaf   : > { %1066 = vmatmul.mubr.bf16.gmra.mrb[68].mxu1 %v486_v15 }
  0xb0   : > { %1073 = vmatprep.mubr.bf16.mxu1 %v491_v16 }
  0xb7   : > { %1074 = vmatmul.mubr.bf16.gmra.mrb[72].mxu1 %v490_v20 }
  0xb8   : > { %1081 = vmatprep.mubr.bf16.mxu1 %v495_v21 }
  0xbf   : > { %1082 = vmatmul.mubr.bf16.gmra.mrb[76].mxu1 %v494_v25 }
  0xc0   : > { %1089 = vmatprep.mubr.bf16.mxu1 %v499_v26 }
  0xc7   : > { %1090 = vmatmul.mubr.bf16.gmra.mrb[80].mxu1 %v498_v30 }
  0xc8   : > { %1097 = vmatprep.mubr.bf16.mxu1 %v503_v31 }
  0xcf   : > { %1098 = vmatmul.mubr.bf16.gmra.mrb[84].mxu1 %v502_v35 }
  0xd0   : > { %1105 = vmatprep.mubr.bf16.mxu1 %v507_v36 }
  0xd7   : > { %1106 = vmatmul.mubr.bf16.gmra.mrb[88].mxu1 %v506_v38 }
  0xd8   : > { %1113 = vmatprep.mubr.bf16.mxu1 %v511_v39 }
  0xdf   : > { %1114 = vmatmul.mubr.bf16.gmra.mrb[92].mxu1 %v510_v40 }
  0xfa   : > { %v2687_v41 = vpop.f32.mrb[0].mxu1  ;;  %v2639_v47 = vpop.f32.mrb[0].mxu0 }
  0xfb   : > { %v2688_v42 = vpop.f32.mrb[1].mxu1  ;;  %v2640_v48 = vpop.f32.mrb[1].mxu0 }
  0xfc   : > { %v3544_v43 = vadd.f32 %v2688_v42, %v2687_v41  ;;  %v2690_v44 = vpop.f32.mrb[2].mxu1  ;;  %v3548_v49 = vadd.f32 %v2640_v48, %v2639_v47  ;;  %v2642_v50 = vpop.f32.mrb[2].mxu0 }
  0xfd   : > { %v2691_v45 = vpop.f32.mrb[3].mxu1  ;;  %v2643_v51 = vpop.f32.mrb[3].mxu0 }
  0xfe   : > { %v3546_v46 = vadd.f32 %v2691_v45, %v2690_v44  ;;  %v3550_v53 = vadd.f32 %v2643_v51, %v2642_v50 }
 0x102   : > { %v2693_v52 = vpop.f32.mrb[4].mxu1  ;;  %v2645_v59 = vpop.f32.mrb[4].mxu0 }
 0x103   : > { %v2694_v54 = vpop.f32.mrb[5].mxu1  ;;  %v2646_v60 = vpop.f32.mrb[5].mxu0 }
 0x104   : > { %v3552_v55 = vadd.f32 %v2694_v54, %v2693_v52  ;;  %v2696_v56 = vpop.f32.mrb[6].mxu1  ;;  %v3556_v61 = vadd.f32 %v2646_v60, %v2645_v59  ;;  %v2648_v62 = vpop.f32.mrb[6].mxu0 }
 0x105   : > { %v2697_v57 = vpop.f32.mrb[7].mxu1  ;;  %v2649_v63 = vpop.f32.mrb[7].mxu0 }
 0x106   : > { %v3554_v58 = vadd.f32 %v2697_v57, %v2696_v56  ;;  %v3558_v1 = vadd.f32 %v2649_v63, %v2648_v62 }
 0x10a   : > { %v2699_v0 = vpop.f32.mrb[8].mxu1  ;;  %v2651_v8 = vpop.f32.mrb[8].mxu0 }
 0x10b   : > { %v2700_v3 = vpop.f32.mrb[9].mxu1  ;;  %v2652_v9 = vpop.f32.mrb[9].mxu0 }
 0x10c   : > { %v3565_v4 = vadd.f32 %v2700_v3, %v2699_v0  ;;  %v2702_v5 = vpop.f32.mrb[10].mxu1  ;;  %v3570_v10 = vadd.f32 %v2652_v9, %v2651_v8  ;;  %v2654_v11 = vpop.f32.mrb[10].mxu0 }
 0x10d   : > { %v2703_v6 = vpop.f32.mrb[11].mxu1  ;;  %v2655_v12 = vpop.f32.mrb[11].mxu0 }
 0x10e   : > { %v3568_v7 = vadd.f32 %v2703_v6, %v2702_v5  ;;  %v3572_v14 = vadd.f32 %v2655_v12, %v2654_v11 }
 0x112   : > { %v2705_v13 = vpop.f32.mrb[12].mxu1  ;;  %v2657_v20 = vpop.f32.mrb[12].mxu0 }
 0x113   : > { %v2706_v15 = vpop.f32.mrb[13].mxu1  ;;  %v2658_v21 = vpop.f32.mrb[13].mxu0 }
 0x114   : > { %v3574_v16 = vadd.f32 %v2706_v15, %v2705_v13  ;;  %v2708_v17 = vpop.f32.mrb[14].mxu1  ;;  %v3578_v22 = vadd.f32 %v2658_v21, %v2657_v20  ;;  %v2660_v23 = vpop.f32.mrb[14].mxu0 }
 0x115   : > { %v2709_v18 = vpop.f32.mrb[15].mxu1  ;;  %v2661_v24 = vpop.f32.mrb[15].mxu0 }
 0x116   : > { %v3576_v19 = vadd.f32 %v2709_v18, %v2708_v17  ;;  %v3580_v26 = vadd.f32 %v2661_v24, %v2660_v23  ;;  %v1256_v24 = vpop.permute.xlu0 %1255 }
 0x11a   : > { %v2711_v25 = vpop.f32.mrb[16].mxu1  ;;  %v2663_v32 = vpop.f32.mrb[16].mxu0 }
 0x11b   : > { %v2712_v27 = vpop.f32.mrb[17].mxu1  ;;  %v2664_v33 = vpop.f32.mrb[17].mxu0 }
 0x11c   : > { %v3582_v28 = vadd.f32 %v2712_v27, %v2711_v25  ;;  %v2714_v29 = vpop.f32.mrb[18].mxu1  ;;  %v3586_v34 = vadd.f32 %v2664_v33, %v2663_v32  ;;  %v2666_v35 = vpop.f32.mrb[18].mxu0 }
 0x11d   : > { %v2715_v30 = vpop.f32.mrb[19].mxu1  ;;  %v2667_v36 = vpop.f32.mrb[19].mxu0 }
 0x11e   : > { %v3584_v31 = vadd.f32 %v2715_v30, %v2714_v29  ;;  %v3588_v38 = vadd.f32 %v2667_v36, %v2666_v35 }
 0x122   : > { %v2717_v37 = vpop.f32.mrb[20].mxu1  ;;  %v2669_v45 = vpop.f32.mrb[20].mxu0 }
 0x123   : > { %v2718_v39 = vpop.f32.mrb[21].mxu1  ;;  %v2670_v47 = vpop.f32.mrb[21].mxu0 }
 0x124   : > { %v3590_v40 = vadd.f32 %v2718_v39, %v2717_v37  ;;  %v2720_v41 = vpop.f32.mrb[22].mxu1  ;;  %v3594_v48 = vadd.f32 %v2670_v47, %v2669_v45  ;;  %v2672_v50 = vpop.f32.mrb[22].mxu0 }
 0x125   : > { %v2721_v42 = vpop.f32.mrb[23].mxu1  ;;  %v2673_v51 = vpop.f32.mrb[23].mxu0 }
 0x126   : > { %v3592_v44 = vadd.f32 %v2721_v42, %v2720_v41  ;;  %v3596_v54 = vadd.f32 %v2673_v51, %v2672_v50  ;;  %v1261_v39 = vpop.permute.xlu0 %1260  ;;  %v1266_v50 = vpop.permute.xlu1 %1265 }
 0x12a   : > { %v2723_v52 = vpop.f32.mrb[24].mxu1  ;;  %v2675_v63 = vpop.f32.mrb[24].mxu0 }
 0x12b   : > { %v2724_v56 = vpop.f32.mrb[25].mxu1  ;;  %v2676_v0 = vpop.f32.mrb[25].mxu0 }
 0x12c   : > { %v3598_v57 = vadd.f32 %v2724_v56, %v2723_v52  ;;  %v2726_v59 = vpop.f32.mrb[26].mxu1  ;;  %v3602_v3 = vadd.f32 %v2676_v0, %v2675_v63  ;;  %v2678_v5 = vpop.f32.mrb[26].mxu0 }
 0x12d   : > { %v2727_v60 = vpop.f32.mrb[27].mxu1  ;;  %v2679_v6 = vpop.f32.mrb[27].mxu0 }
 0x12e   : > { %v3600_v62 = vadd.f32 %v2727_v60, %v2726_v59  ;;  %v3604_v9 = vadd.f32 %v2679_v6, %v2678_v5  ;;  %v1271_v5 = vpop.permute.xlu1 %1270 }
 0x132   : > { %v2729_v8 = vpop.f32.mrb[28].mxu1  ;;  %v2681_v18 = vpop.f32.mrb[28].mxu0 }
 0x133   : > { %v2730_v11 = vpop.f32.mrb[29].mxu1  ;;  %v2682_v20 = vpop.f32.mrb[29].mxu0 }
 0x134   : > { %v3606_v12 = vadd.f32 %v2730_v11, %v2729_v8  ;;  %v2732_v13 = vpop.f32.mrb[30].mxu1  ;;  %v3610_v21 = vadd.f32 %v2682_v20, %v2681_v18  ;;  %v2684_v23 = vpop.f32.mrb[30].mxu0  ;;  %v3107_v20 = vld [vmem:[%s4035_s4 + $0x8] sm:$0xff]  }
 0x135   : > { %v2733_v15 = vpop.f32.mrb[31].mxu1  ;;  %v2685_v25 = vpop.f32.mrb[31].mxu0 }
 0x136   : > { %v3608_v17 = vadd.f32 %v2733_v15, %v2732_v13  ;;  %v3612_v29 = vadd.f32 %v2685_v25, %v2684_v23  ;;  %v3108_v25 = vld [vmem:[%s4035_s4 + $0x10] sm:$0xff]  }
 0x13a   : > { %v2751_v27 = vpop.f32.mrb[32].mxu1 }
 0x13b   : > { %v2752_v30 = vpop.f32.mrb[33].mxu1 }
 0x13c   : > { %v2753_v32 = vadd.f32 %v2752_v30, %v2751_v27  ;;  %v2754_v33 = vpop.f32.mrb[34].mxu1  ;;  %v1276_v27 = vpop.permute.xlu0 %1275 }
 0x13d   : > { %v2755_v35 = vpop.f32.mrb[35].mxu1  ;;  %v1281_v30 = vpop.permute.xlu1 %1280 }
 0x13e   : > { %v996_v36 = vadd.f32 %v2753_v32, %v3548_v49  ;;  %v2756_v37 = vadd.f32 %v2755_v35, %v2754_v33 }
 0x140   : > { %v999_v41 = vadd.f32 %v2756_v37, %v3550_v53  ;;  %v1413_v42 = vmul.f32 %v1256_v24, %v996_v36 }
 0x142   : > { %v1414_v45 = vmul.f32 %v1261_v39, %v999_v41  ;;  %v2757_v47 = vpop.f32.mrb[36].mxu1 }
 0x143   : > { %v2758_v51 = vpop.f32.mrb[37].mxu1 }
 0x144   : > { %v1445_v52 = vpack.c.bf16 %v1414_v45, %v1413_v42  ;;  %v2759_v56 = vadd.f32 %v2758_v51, %v2757_v47  ;;  %v2760_v59 = vpop.f32.mrb[38].mxu1  ;;  %v3110_v47 = vld [vmem:[%s4035_s4 + $0x20] sm:$0xff]   ;;  %v1291_v51 = vpop.permute.xlu1 %1290 }
 0x145   : > { %v2761_v60 = vpop.f32.mrb[39].mxu1 }
 0x146   : > { %v1004_v49 = vadd.f32 %v2759_v56, %v3556_v61  ;;  %v2762_v63 = vadd.f32 %v2761_v60, %v2760_v59  ;;  %2911 = vmatprep.mubr.bf16.mxu0 %v1445_v52 }
 0x148   : > { %v1007_v0 = vadd.f32 %v2762_v63, %v3558_v1  ;;  %v1415_v6 = vmul.f32 %v1266_v50, %v1004_v49  ;;  %v1286_v50 = vpop.permute.xlu0 %1285 }
 0x14a   : > { %v1416_v8 = vmul.f32 %v1271_v5, %v1007_v0  ;;  %v2763_v11 = vpop.f32.mrb[40].mxu1 }
 0x14b   : > { %v2764_v53 = vpop.f32.mrb[41].mxu1 }
 0x14c   : > { %v1446_v13 = vpack.c.bf16 %v1416_v8, %v1415_v6  ;;  %v2765_v15 = vadd.f32 %v2764_v53, %v2763_v11  ;;  %v2766_v18 = vpop.f32.mrb[42].mxu1  ;;  %v3112_v11 = vld [vmem:[%s4035_s4 + $0x30] sm:$0xff]   ;;  %v1296_v53 = vpop.permute.xlu0 %1295 }
 0x14d   : > { %v2767_v23 = vpop.f32.mrb[43].mxu1 }
 0x14e   : > { %v1012_v24 = vadd.f32 %v2765_v15, %v3570_v10  ;;  %v2768_v61 = vadd.f32 %v2767_v23, %v2766_v18  ;;  %2912 = vmatmul.mubr.bf16.vlgmr.msra.gmra.mrb[32].mxu0 %v1446_v13  ;;  %v1301_v13 = vpop.permute.xlu1 %1300 }
 0x14f   : > { %2944 = vmatpush3.bf16.msra.mxu0 %v3563_v2  ;;  %v3109_v2 = vld [vmem:[%s4035_s4 + $0x18] sm:$0xff]  }
 0x150   : > { %v1015_v1 = vadd.f32 %v2768_v61, %v3572_v14  ;;  %2945 = vmatprep.subr.bf16.mxu0 %v3107_v20  ;;  %v1417_v32 = vmul.f32 %v1276_v27, %v1012_v24 }
 0x152   : > { %v1418_v33 = vmul.f32 %v1281_v30, %v1015_v1  ;;  %v2769_v35 = vpop.f32.mrb[44].mxu1 }
 0x153   : > { %v2770_v36 = vpop.f32.mrb[45].mxu1  ;;  %2946 = vmatpush3.bf16.msra.mxu0 %v3107_v20 }
 0x154   : > { %v2771_v37 = vadd.f32 %v2770_v36, %v2769_v35  ;;  %v2772_v10 = vpop.f32.mrb[46].mxu1  ;;  %v1447_v39 = vpack.c.bf16 %v1418_v33, %v1417_v32  ;;  %2947 = vmatprep.subr.bf16.mxu0 %v3108_v25  ;;  %v1306_v32 = vpop.permute.xlu0 %1305 }
 0x155   : > { %v2773_v14 = vpop.f32.mrb[47].mxu1  ;;  %v1311_v33 = vpop.permute.xlu1 %1310 }
 0x156   : > { %v1020_v41 = vadd.f32 %v2771_v37, %v3578_v22  ;;  %v2774_v42 = vadd.f32 %v2773_v14, %v2772_v10  ;;  %2915 = vmatprep.mubr.bf16.mxu0 %v1447_v39 }
 0x157   : > { %2948 = vmatpush3.bf16.msra.mxu0 %v3108_v25 }
 0x158   : > { %v1023_v45 = vadd.f32 %v2774_v42, %v3580_v26  ;;  %2949 = vmatprep.subr.bf16.mxu0 %v3109_v2  ;;  %v1419_v52 = vmul.f32 %v1286_v50, %v1020_v41  ;;  %v3111_v26 = vld [vmem:[%s4035_s4 + $0x28] sm:$0xff]  }
 0x15a   : > { %v1420_v56 = vmul.f32 %v1291_v51, %v1023_v45  ;;  %v2775_v59 = vpop.f32.mrb[48].mxu1 }
 0x15b   : > { %v2776_v60 = vpop.f32.mrb[49].mxu1  ;;  %2950 = vmatpush3.bf16.msra.mxu0 %v3109_v2 }
 0x15c   : > { %v2777_v49 = vadd.f32 %v2776_v60, %v2775_v59  ;;  %v2778_v63 = vpop.f32.mrb[50].mxu1  ;;  %v1448_v22 = vpack.c.bf16 %v1420_v56, %v1419_v52  ;;  %2951 = vmatprep.subr.bf16.mxu0 %v3110_v47 }
 0x15d   : > { %v2779_v0 = vpop.f32.mrb[51].mxu1 }
 0x15e   : > { %v1028_v5 = vadd.f32 %v2777_v49, %v3586_v34  ;;  %v2780_v6 = vadd.f32 %v2779_v0, %v2778_v63  ;;  %2916 = vmatmul.mubr.bf16.gmra.mrb[36].mxu0 %v1448_v22 }
 0x15f   : > { %2952 = vmatpush3.bf16.msra.mxu0 %v3110_v47  ;;  %v1316_v47 = vpop.permute.xlu0 %1315 }
 0x160   : > { %v1031_v8 = vadd.f32 %v2780_v6, %v3588_v38  ;;  %2953 = vmatprep.subr.bf16.mxu0 %v3111_v26  ;;  %v1421_v15 = vmul.f32 %v1296_v53, %v1028_v5  ;;  %v3113_v38 = vld [vmem:[%s4035_s4 + $0x38] sm:$0xff]  }
 0x162   : > { %v1422_v18 = vmul.f32 %v1301_v13, %v1031_v8  ;;  %v2781_v20 = vpop.f32.mrb[52].mxu1 }
 0x163   : > { %v2782_v23 = vpop.f32.mrb[53].mxu1  ;;  %2954 = vmatpush3.bf16.msra.mxu0 %v3111_v26  ;;  %v1326_v0 = vpop.permute.xlu0 %1325 }
 0x164   : > { %v2783_v24 = vadd.f32 %v2782_v23, %v2781_v20  ;;  %v2784_v61 = vpop.f32.mrb[54].mxu1  ;;  %v1449_v34 = vpack.c.bf16 %v1422_v18, %v1421_v15  ;;  %2955 = vmatprep.subr.bf16.mxu0 %v3112_v11 }
 0x165   : > { %v2785_v1 = vpop.f32.mrb[55].mxu1 }
 0x166   : > { %v1036_v25 = vadd.f32 %v2783_v24, %v3594_v48  ;;  %v2786_v27 = vadd.f32 %v2785_v1, %v2784_v61  ;;  %2919 = vmatprep.mubr.bf16.mxu0 %v1449_v34 }
 0x167   : > { %2956 = vmatpush3.bf16.msra.mxu0 %v3112_v11  ;;  %v1336_v24 = vpop.permute.xlu0 %1335 }
 0x168   : > { %v1039_v30 = vadd.f32 %v2786_v27, %v3596_v54  ;;  %2957 = vmatprep.subr.bf16.mxu0 %v3113_v38  ;;  %v1423_v35 = vmul.f32 %v1306_v32, %v1036_v25  ;;  %v1321_v54 = vpop.permute.xlu1 %1320 }
 0x16a   : > { %v1424_v36 = vmul.f32 %v1311_v33, %v1039_v30  ;;  %v2787_v37 = vpop.f32.mrb[56].mxu1 }
 0x16b   : > { %v2788_v10 = vpop.f32.mrb[57].mxu1  ;;  %2958 = vmatpush3.bf16.msra.mxu0 %v3113_v38 }
 0x16c   : > { %v2789_v39 = vadd.f32 %v2788_v10, %v2787_v37  ;;  %v2790_v2 = vpop.f32.mrb[58].mxu1  ;;  %v1450_v14 = vpack.c.bf16 %v1424_v36, %v1423_v35  ;;  %v1331_v5 = vpop.permute.xlu1 %1330 }
 0x16d   : > { %v2791_v41 = vpop.f32.mrb[59].mxu1  ;;  %v1346_v36 = vpop.permute.xlu0 %1345 }
 0x16e   : > { %v1044_v42 = vadd.f32 %v2789_v39, %v3602_v3  ;;  %v2792_v48 = vadd.f32 %v2791_v41, %v2790_v2  ;;  %2920 = vmatmul.mubr.bf16.gmra.mrb[40].mxu0 %v1450_v14 }
 0x170   : > { %v1047_v45 = vadd.f32 %v2792_v48, %v3604_v9  ;;  %v1425_v50 = vmul.f32 %v1316_v47, %v1044_v42  ;;  %v1341_v61 = vpop.permute.xlu1 %1340 }
 0x172   : > { %v1426_v51 = vmul.f32 %v1321_v54, %v1047_v45  ;;  %v2793_v52 = vpop.f32.mrb[60].mxu1  ;;  %v1356_v54 = vpop.permute.xlu0 %1355 }
 0x173   : > { %v2794_v56 = vpop.f32.mrb[61].mxu1 }
 0x174   : > { %v2795_v59 = vadd.f32 %v2794_v56, %v2793_v52  ;;  %v2796_v60 = vpop.f32.mrb[62].mxu1  ;;  %v1451_v49 = vpack.c.bf16 %v1426_v51, %v1425_v50  ;;  %v1351_v37 = vpop.permute.xlu1 %1350 }
 0x175   : > { %v2797_v63 = vpop.f32.mrb[63].mxu1 }
 0x176   : > { %v1052_v22 = vadd.f32 %v2795_v59, %v3610_v21  ;;  %v2798_v26 = vadd.f32 %v2797_v63, %v2796_v60  ;;  %2923 = vmatprep.mubr.bf16.mxu0 %v1451_v49 }
 0x178   : > { %v1055_v3 = vadd.f32 %v2798_v26, %v3612_v29  ;;  %v1427_v6 = vmul.f32 %v1326_v0, %v1052_v22  ;;  %v1361_v50 = vpop.permute.xlu1 %1360 }
 0x17a   : > { %v1428_v9 = vmul.f32 %v1331_v5, %v1055_v3  ;;  %v2799_v8 = vpop.f32.mrb[64].mxu1  ;;  %v1366_v3 = vpop.permute.xlu0 %1365 }
 0x17b   : > { %v2800_v11 = vpop.f32.mrb[65].mxu1 }
 0x17c   : > { %v2801_v53 = vadd.f32 %v2800_v11, %v2799_v8  ;;  %v2802_v13 = vpop.f32.mrb[66].mxu1  ;;  %v1452_v15 = vpack.c.bf16 %v1428_v9, %v1427_v6  ;;  %v1371_v0 = vpop.permute.xlu1 %1370 }
 0x17d   : > { %v2803_v18 = vpop.f32.mrb[67].mxu1 }
 0x17e   : > { %v1060_v20 = vadd.f32 %v2801_v53, %v3544_v43  ;;  %v2804_v23 = vadd.f32 %v2803_v18, %v2802_v13  ;;  %2924 = vmatmul.mubr.bf16.gmra.mrb[44].mxu0 %v1452_v15 }
 0x180   : > { %v1063_v21 = vadd.f32 %v2804_v23, %v3546_v46  ;;  %v1429_v34 = vmul.f32 %v1336_v24, %v1060_v20  ;;  %v1376_v20 = vpop.permute.xlu0 %1375  ;;  %v1381_v23 = vpop.permute.xlu1 %1380 }
 0x182   : > { %v1430_v29 = vmul.f32 %v1341_v61, %v1063_v21  ;;  %v2805_v38 = vpop.f32.mrb[68].mxu1 }
 0x183   : > { %v2806_v1 = vpop.f32.mrb[69].mxu1 }
 0x184   : > { %v2807_v25 = vadd.f32 %v2806_v1, %v2805_v38  ;;  %v2808_v27 = vpop.f32.mrb[70].mxu1  ;;  %v1453_v30 = vpack.c.bf16 %v1430_v29, %v1429_v34 }
 0x185   : > { %v2809_v32 = vpop.f32.mrb[71].mxu1 }
 0x186   : > { %v1068_v33 = vadd.f32 %v2807_v25, %v3552_v55  ;;  %v2810_v35 = vadd.f32 %v2809_v32, %v2808_v27  ;;  %2927 = vmatprep.mubr.bf16.mxu0 %v1453_v30  ;;  %v1386_v30 = vpop.permute.xlu0 %1385  ;;  %v1391_v32 = vpop.permute.xlu1 %1390 }
 0x188   : > { %v1071_v43 = vadd.f32 %v2810_v35, %v3554_v58  ;;  %v1431_v10 = vmul.f32 %v1346_v36, %v1068_v33 }
 0x18a   : > { %v1432_v46 = vmul.f32 %v1351_v37, %v1071_v43  ;;  %v2811_v39 = vpop.f32.mrb[72].mxu1 }
 0x18b   : > { %v2812_v2 = vpop.f32.mrb[73].mxu1 }
 0x18c   : > { %v2813_v14 = vadd.f32 %v2812_v2, %v2811_v39  ;;  %v2814_v41 = vpop.f32.mrb[74].mxu1  ;;  %v1454_v42 = vpack.c.bf16 %v1432_v46, %v1431_v10 }
 0x18d   : > { %v2815_v48 = vpop.f32.mrb[75].mxu1 }
 0x18e   : > { %v1076_v45 = vadd.f32 %v2813_v14, %v3565_v4  ;;  %v2816_v47 = vadd.f32 %v2815_v48, %v2814_v41  ;;  %2928 = vmatmul.mubr.bf16.gmra.mrb[48].mxu0 %v1454_v42  ;;  %v1396_v14 = vpop.permute.xlu0 %1395  ;;  %v1401_v41 = vpop.permute.xlu1 %1400 }
 0x190   : > { %v1079_v55 = vadd.f32 %v2816_v47, %v3568_v7  ;;  %v1433_v51 = vmul.f32 %v1356_v54, %v1076_v45 }
 0x192   : > { %v1434_v58 = vmul.f32 %v1361_v50, %v1079_v55  ;;  %v2817_v52 = vpop.f32.mrb[76].mxu1 }
 0x193   : > { %v2818_v56 = vpop.f32.mrb[77].mxu1 }
 0x194   : > { %v2819_v59 = vadd.f32 %v2818_v56, %v2817_v52  ;;  %v2820_v60 = vpop.f32.mrb[78].mxu1  ;;  %v1455_v49 = vpack.c.bf16 %v1434_v58, %v1433_v51  ;;  %v1406_v58 = vpop.permute.xlu0 %1405 }
 0x195   : > { %v2821_v63 = vpop.f32.mrb[79].mxu1  ;;  %v1411_v52 = vpop.permute.xlu1 %1410 }
 0x196   : > { %v1084_v22 = vadd.f32 %v2819_v59, %v3574_v16  ;;  %v2822_v26 = vadd.f32 %v2821_v63, %v2820_v60  ;;  %2931 = vmatprep.mubr.bf16.mxu0 %v1455_v49  ;;  %v3114_v60 = vld [vmem:[%s3619_s8] sm:$0xff]   ;;  %v3115_v63 = vld [vmem:[%s3619_s8 + $0x8] sm:$0xff]  }
 0x198   : > { %v1087_v4 = vadd.f32 %v2822_v26, %v3576_v19  ;;  %v1435_v5 = vmul.f32 %v1366_v3, %v1084_v22  ;;  %v3117_v22 = vld [vmem:[%s3619_s8 + $0x18] sm:$0xff]   ;;  %v3119_v26 = vld [vmem:[%s3619_s8 + $0x28] sm:$0xff]  }
 0x199   : > { %v3121_v3 = vld [vmem:[%s3619_s8 + $0x38] sm:$0xff]  }
 0x19a   : > { %v1436_v7 = vmul.f32 %v1371_v0, %v1087_v4  ;;  %v2823_v6 = vpop.f32.mrb[80].mxu1  ;;  %v3120_v4 = vld [vmem:[%s3619_s8 + $0x30] sm:$0xff]   ;;  %v3122_v0 = vld [vmem:[%s3619_s8 + $0x40] sm:$0xff]  }
 0x19b   : > { %v2824_v9 = vpop.f32.mrb[81].mxu1 }
 0x19c   : > { %v2825_v8 = vadd.f32 %v2824_v9, %v2823_v6  ;;  %v2826_v11 = vpop.f32.mrb[82].mxu1  ;;  %v1456_v53 = vpack.c.bf16 %v1436_v7, %v1435_v5  ;;  %v3123_v5 = vld [vmem:[%s3619_s8 + $0x48] sm:$0xff]   ;;  %v3124_v7 = vld [vmem:[%s3619_s8 + $0x50] sm:$0xff]   ;;  %v3125_v6 = vld [vmem:[%s3619_s8 + $0x58] sm:$0xff]  }
 0x19d   : > { %v2827_v13 = vpop.f32.mrb[83].mxu1  ;;  %v3126_v9 = vld [vmem:[%s3619_s8 + $0x60] sm:$0xff]  }
 0x19e   : > { %v1092_v15 = vadd.f32 %v2825_v8, %v3582_v28  ;;  %v2828_v18 = vadd.f32 %v2827_v13, %v2826_v11  ;;  %2932 = vmatmul.mubr.bf16.gmra.mrb[52].mxu0 %v1456_v53  ;;  %v3127_v8 = vld [vmem:[%s3619_s8 + $0x68] sm:$0xff]   ;;  %v3128_v11 = vld [vmem:[%s3619_s8 + $0x70] sm:$0xff]   ;;  %v3129_v53 = vld [vmem:[%s3619_s8 + $0x78] sm:$0xff]  }
 0x19f   : > { %v3693_v13 = vld [vmem:[%s4037_s6] ss:$0 sm:$0xff] }
 0x1a0   : > { %v1095_v16 = vadd.f32 %v2828_v18, %v3584_v31  ;;  %v1437_v21 = vmul.f32 %v1376_v20, %v1092_v15 }
 0x1a2   : > { %v1438_v19 = vmul.f32 %v1381_v23, %v1095_v16  ;;  %v2829_v24 = vpop.f32.mrb[84].mxu1 }
 0x1a3   : > { %v2830_v61 = vpop.f32.mrb[85].mxu1 }
 0x1a4   : > { %v2831_v34 = vadd.f32 %v2830_v61, %v2829_v24  ;;  %v2832_v29 = vpop.f32.mrb[86].mxu1  ;;  %v1457_v38 = vpack.c.bf16 %v1438_v19, %v1437_v21 }
 0x1a5   : > { %v2833_v1 = vpop.f32.mrb[87].mxu1 }
 0x1a6   : > { %v1100_v25 = vadd.f32 %v2831_v34, %v3590_v40  ;;  %v2834_v27 = vadd.f32 %v2833_v1, %v2832_v29  ;;  %2935 = vmatprep.mubr.bf16.mxu0 %v1457_v38 }
 0x1a8   : > { %v1103_v28 = vadd.f32 %v2834_v27, %v3592_v44  ;;  %v1439_v33 = vmul.f32 %v1386_v30, %v1100_v25 }
 0x1aa   : > { %v1440_v31 = vmul.f32 %v1391_v32, %v1103_v28  ;;  %v2835_v35 = vpop.f32.mrb[88].mxu1 }
 0x1ab   : > { %v2836_v43 = vpop.f32.mrb[89].mxu1 }
 0x1ac   : > { %v2837_v36 = vadd.f32 %v2836_v43, %v2835_v35  ;;  %v2838_v37 = vpop.f32.mrb[90].mxu1  ;;  %v1458_v10 = vpack.c.bf16 %v1440_v31, %v1439_v33 }
 0x1ad   : > { %v2839_v46 = vpop.f32.mrb[91].mxu1 }
 0x1ae   : > { %v1108_v39 = vadd.f32 %v2837_v36, %v3598_v57  ;;  %v2840_v2 = vadd.f32 %v2839_v46, %v2838_v37  ;;  %2936 = vmatmul.mubr.bf16.gmra.mrb[56].mxu0 %v1458_v10 }
 0x1b0   : > { %v1111_v40 = vadd.f32 %v2840_v2, %v3600_v62  ;;  %v1441_v42 = vmul.f32 %v1396_v14, %v1108_v39 }
 0x1b2   : > { %v1442_v44 = vmul.f32 %v1401_v41, %v1111_v40  ;;  %v2841_v48 = vpop.f32.mrb[92].mxu1 }
 0x1b3   : > { %v2842_v45 = vpop.f32.mrb[93].mxu1 }
 0x1b4   : > { %v2843_v47 = vadd.f32 %v2842_v45, %v2841_v48  ;;  %v2844_v55 = vpop.f32.mrb[94].mxu1  ;;  %v1459_v54 = vpack.c.bf16 %v1442_v44, %v1441_v42 }
 0x1b5   : > { %v2845_v50 = vpop.f32.mrb[95].mxu1 }
 0x1b6   : > { %v1116_v51 = vadd.f32 %v2843_v47, %v3606_v12  ;;  %v2846_v57 = vadd.f32 %v2845_v50, %v2844_v55  ;;  %2939 = vmatprep.mubr.bf16.mxu0 %v1459_v54  ;;  %v3116_v12 = vld [vmem:[%s3619_s8 + $0x10] sm:$0xff]  }
 0x1b8   : > { %v1119_v62 = vadd.f32 %v2846_v57, %v3608_v17  ;;  %v1443_v56 = vmul.f32 %v1406_v58, %v1116_v51  ;;  %v3118_v17 = vld [vmem:[%s3619_s8 + $0x20] sm:$0xff]  }
 0x1ba   : > { %v1444_v59 = vmul.f32 %v1411_v52, %v1119_v62 }
 0x1bc   : > { %v1460_v49 = vpack.c.bf16 %v1444_v59, %v1443_v56 }
 0x1be   : > { %2940 = vmatmul.mubr.bf16.gmra.mrb[60].mxu0 %v1460_v49 }
 0x1bf   : > { %2959 = vmatprep.mubr.bf16.mxu0 %v3114_v60 }
 0x1c6   : > { %2960 = vmatmul.mubr.bf16.vlgmr.msra.gmra.mrb[32].mxu0 %v3115_v63 }
 0x1c7   : > { %2963 = vmatprep.mubr.bf16.mxu0 %v3116_v12 }
 0x1ce   : > { %2964 = vmatmul.mubr.bf16.gmra.mrb[36].mxu0 %v3117_v22 }
 0x1cf   : > { %2967 = vmatprep.mubr.bf16.mxu0 %v3118_v17 }
 0x1d6   : > { %2968 = vmatmul.mubr.bf16.gmra.mrb[40].mxu0 %v3119_v26 }
 0x1d7   : > { %2971 = vmatprep.mubr.bf16.mxu0 %v3120_v4 }
 0x1de   : > { %2972 = vmatmul.mubr.bf16.gmra.mrb[44].mxu0 %v3121_v3 }
 0x1df   : > { %2975 = vmatprep.mubr.bf16.mxu0 %v3122_v0 }
 0x1e6   : > { %2976 = vmatmul.mubr.bf16.gmra.mrb[48].mxu0 %v3123_v5 }
 0x1e7   : > { %2979 = vmatprep.mubr.bf16.mxu0 %v3124_v7 }
 0x1ee   : > { %2980 = vmatmul.mubr.bf16.gmra.mrb[52].mxu0 %v3125_v6 }
 0x1ef   : > { %2983 = vmatprep.mubr.bf16.mxu0 %v3126_v9 }
 0x1f6   : > { %2984 = vmatmul.mubr.bf16.gmra.mrb[56].mxu0 %v3127_v8 }
 0x1f7   : > { %2987 = vmatprep.mubr.bf16.mxu0 %v3128_v11 }
 0x1fe   : > { %2988 = vmatmul.mubr.bf16.gmra.mrb[60].mxu0 %v3129_v53 }
 0x299   : > { %v2961_v15 = vpop.f32.mrb[32].mxu0 }
 0x29a   : > { %v3696_v18 = vadd.f32 %v2961_v15, %v3693_v13  ;;  %v1912_v16 = vpop.f32.mrb[33].mxu0 }
 0x29b   : > { %v2962_v20 = vpop.f32.mrb[34].mxu0  ;;  %v3703_v19 = vadd.f32 %v3693_v13, %v1912_v16 }
 0x29c   : > { %2082 = vmax.xlane.f32.xlu0 %v3696_v18  ;;  %v1915_v23 = vpop.f32.mrb[35].mxu0  ;;  %v3708_v61 = vadd.f32 %v2962_v20, %v3693_v13 }
 0x29d   : > { %v3700_v21 = vadd.f32 %v3693_v13, %v1915_v23 }
 0x29f   : > { %2080 = vmax.xlane.f32.xlu1 %v3700_v21 }
 0x2a0   : > { %2078 = vmax.xlane.f32.xlu0 %v3703_v19 }
 0x2a1   : > { %v2965_v24 = vpop.f32.mrb[36].mxu0 }
 0x2a2   : > { %v3711_v34 = vadd.f32 %v2965_v24, %v3693_v13  ;;  %v1928_v29 = vpop.f32.mrb[37].mxu0 }
 0x2a3   : > { %v2966_v38 = vpop.f32.mrb[38].mxu0  ;;  %v3716_v25 = vadd.f32 %v3693_v13, %v1928_v29 }
 0x2a4   : > { %2084 = vmax.xlane.f32.xlu0 %v3708_v61  ;;  %2090 = vmax.xlane.f32.xlu1 %v3711_v34  ;;  %v1931_v1 = vpop.f32.mrb[39].mxu0  ;;  %v3719_v27 = vadd.f32 %v2966_v38, %v3693_v13 }
 0x2a5   : > { %v3724_v30 = vadd.f32 %v3693_v13, %v1931_v1 }
 0x2a8   : > { %2086 = vmax.xlane.f32.xlu1 %v3716_v25  ;;  %2092 = vmax.xlane.f32.xlu0 %v3719_v27 }
 0x2a9   : > { %v2969_v28 = vpop.f32.mrb[40].mxu0 }
 0x2aa   : > { %v3727_v32 = vadd.f32 %v2969_v28, %v3693_v13  ;;  %v1944_v33 = vpop.f32.mrb[41].mxu0 }
 0x2ab   : > { %v2970_v31 = vpop.f32.mrb[42].mxu0  ;;  %v3732_v43 = vadd.f32 %v3693_v13, %v1944_v33 }
 0x2ac   : > { %2088 = vmax.xlane.f32.xlu0 %v3724_v30  ;;  %2098 = vmax.xlane.f32.xlu1 %v3727_v32  ;;  %v1947_v35 = vpop.f32.mrb[43].mxu0  ;;  %v3735_v36 = vadd.f32 %v2970_v31, %v3693_v13 }
 0x2ad   : > { %v3740_v10 = vadd.f32 %v3693_v13, %v1947_v35 }
 0x2b0   : > { %2094 = vmax.xlane.f32.xlu1 %v3732_v43  ;;  %2100 = vmax.xlane.f32.xlu0 %v3735_v36 }
 0x2b1   : > { %v2973_v37 = vpop.f32.mrb[44].mxu0 }
 0x2b2   : > { %v3743_v46 = vadd.f32 %v2973_v37, %v3693_v13  ;;  %v1960_v39 = vpop.f32.mrb[45].mxu0 }
 0x2b3   : > { %v2974_v2 = vpop.f32.mrb[46].mxu0  ;;  %v3748_v14 = vadd.f32 %v3693_v13, %v1960_v39 }
 0x2b4   : > { %2096 = vmax.xlane.f32.xlu0 %v3740_v10  ;;  %2106 = vmax.xlane.f32.xlu1 %v3743_v46  ;;  %v1963_v40 = vpop.f32.mrb[47].mxu0  ;;  %v3751_v41 = vadd.f32 %v2974_v2, %v3693_v13 }
 0x2b5   : > { %v3756_v44 = vadd.f32 %v3693_v13, %v1963_v40 }
 0x2b8   : > { %2102 = vmax.xlane.f32.xlu1 %v3748_v14  ;;  %2108 = vmax.xlane.f32.xlu0 %v3751_v41 }
 0x2b9   : > { %v2977_v42 = vpop.f32.mrb[48].mxu0 }
 0x2ba   : > { %v3759_v48 = vadd.f32 %v2977_v42, %v3693_v13  ;;  %v1976_v45 = vpop.f32.mrb[49].mxu0 }
 0x2bb   : > { %v2978_v47 = vpop.f32.mrb[50].mxu0  ;;  %v3764_v54 = vadd.f32 %v3693_v13, %v1976_v45 }
 0x2bc   : > { %2104 = vmax.xlane.f32.xlu0 %v3756_v44  ;;  %2114 = vmax.xlane.f32.xlu1 %v3759_v48  ;;  %v1979_v55 = vpop.f32.mrb[51].mxu0  ;;  %v3767_v50 = vadd.f32 %v2978_v47, %v3693_v13 }
 0x2bd   : > { %v3772_v57 = vadd.f32 %v3693_v13, %v1979_v55 }
 0x2c0   : > { %2110 = vmax.xlane.f32.xlu1 %v3764_v54  ;;  %2116 = vmax.xlane.f32.xlu0 %v3767_v50 }
 0x2c1   : > { %v2981_v51 = vpop.f32.mrb[52].mxu0 }
 0x2c2   : > { %v3775_v62 = vadd.f32 %v2981_v51, %v3693_v13  ;;  %v1992_v58 = vpop.f32.mrb[53].mxu0 }
 0x2c3   : > { %v2982_v52 = vpop.f32.mrb[54].mxu0  ;;  %v3780_v59 = vadd.f32 %v3693_v13, %v1992_v58 }
 0x2c4   : > { %2112 = vmax.xlane.f32.xlu0 %v3772_v57  ;;  %2122 = vmax.xlane.f32.xlu1 %v3775_v62  ;;  %v1995_v56 = vpop.f32.mrb[55].mxu0  ;;  %v3783_v60 = vadd.f32 %v2982_v52, %v3693_v13 }
 0x2c5   : > { %v3788_v63 = vadd.f32 %v3693_v13, %v1995_v56 }
 0x2c8   : > { %2118 = vmax.xlane.f32.xlu1 %v3780_v59  ;;  %2124 = vmax.xlane.f32.xlu0 %v3783_v60 }
 0x2c9   : > { %v2985_v49 = vpop.f32.mrb[56].mxu0 }
 0x2ca   : > { %v3791_v12 = vadd.f32 %v2985_v49, %v3693_v13  ;;  %v2008_v22 = vpop.f32.mrb[57].mxu0 }
 0x2cb   : > { %v2986_v17 = vpop.f32.mrb[58].mxu0  ;;  %v3796_v4 = vadd.f32 %v3693_v13, %v2008_v22 }
 0x2cc   : > { %2120 = vmax.xlane.f32.xlu0 %v3788_v63  ;;  %2130 = vmax.xlane.f32.xlu1 %v3791_v12  ;;  %v2011_v26 = vpop.f32.mrb[59].mxu0  ;;  %v3799_v3 = vadd.f32 %v2986_v17, %v3693_v13 }
 0x2cd   : > { %v3804_v5 = vadd.f32 %v3693_v13, %v2011_v26 }
 0x2d0   : > { %2126 = vmax.xlane.f32.xlu1 %v3796_v4  ;;  %2132 = vmax.xlane.f32.xlu0 %v3799_v3 }
 0x2d1   : > { %v2989_v0 = vpop.f32.mrb[60].mxu0 }
 0x2d2   : > { %v2024_v7 = vpop.f32.mrb[61].mxu0  ;;  %v3818_v15 = vadd.f32 %v2989_v0, %v3693_v13 }
 0x2d3   : > { %v3807_v6 = vadd.f32 %v3693_v13, %v2024_v7  ;;  %v2990_v9 = vpop.f32.mrb[62].mxu0 }
 0x2d4   : > { %v3810_v8 = vadd.f32 %v2990_v9, %v3693_v13  ;;  %2128 = vmax.xlane.f32.xlu0 %v3804_v5  ;;  %v2027_v11 = vpop.f32.mrb[63].mxu0 }
 0x2d5   : > { %v3814_v53 = vadd.f32 %v3693_v13, %v2027_v11  ;;  %2134 = vmax.xlane.f32.xlu1 %v3807_v6 }
 0x2d8   : > { %2136 = vmax.xlane.f32.xlu0 %v3814_v53 }
 0x2d9   : > { %2138 = vmax.xlane.f32.xlu1 %v3818_v15 }
 0x2dc   : > { %2140 = vmax.xlane.f32.xlu0 %v3810_v8 }
 0x329   : > { %v2083_v16 = vpop.xlane.xlu0 %2082 }
 0x32a   : > { %v3824_v20 = vsub.f32 %v3696_v18, %v2083_v16 }
 0x32c   : > { %v2178_v23 = vmul.f32 1.442695, %v3824_v20  ;;  %v2081_v24 = vpop.xlane.xlu1 %2080 }
 0x32d   : > { %v2079_v29 = vpop.xlane.xlu0 %2078  ;;  %v3832_v1 = vsub.f32 %v3700_v21, %v2081_v24 }
 0x32e   : > { %3130 = vpow2.f32 %v2178_v23  ;;  %v3828_v38 = vsub.f32 %v3703_v19, %v2079_v29 }
 0x32f   : > { %v2176_v19 = vmul.f32 1.442695, %v3832_v1 }
 0x330   : > { %v2174_v13 = vmul.f32 1.442695, %v3828_v38 }
 0x331   : > { %v2085_v28 = vpop.xlane.xlu0 %2084  ;;  %v2091_v33 = vpop.xlane.xlu1 %2090 }
 0x332   : > { %3132 = vpow2.f32 %v2174_v13  ;;  %v3835_v31 = vsub.f32 %v3708_v61, %v2085_v28  ;;  %v3838_v18 = vsub.f32 %v3711_v34, %v2091_v33 }
 0x334   : > { %v2180_v35 = vmul.f32 1.442695, %v3835_v31  ;;  %v2186_v37 = vmul.f32 1.442695, %v3838_v18 }
 0x335   : > { %v2087_v39 = vpop.xlane.xlu1 %2086  ;;  %v2093_v2 = vpop.xlane.xlu0 %2092 }
 0x336   : > { %3134 = vpow2.f32 %v2180_v35  ;;  %v3844_v21 = vsub.f32 %v3716_v25, %v2087_v39  ;;  %v3847_v40 = vsub.f32 %v3719_v27, %v2093_v2 }
 0x337   : > { %3136 = vpow2.f32 %v2186_v37 }
 0x338   : > { %v3131_v61 = vpop.eup %3130  ;;  %v2182_v34 = vmul.f32 1.442695, %v3844_v21  ;;  %3138 = vpow2.f32 %v2176_v19  ;;  %v2188_v47 = vmul.f32 1.442695, %v3847_v40 }
 0x339   : > { %v2089_v42 = vpop.xlane.xlu0 %2088  ;;  %v2099_v45 = vpop.xlane.xlu1 %2098  ;;  %2242 = vadd.xlane.f32.xlu1 %v3131_v61 }
 0x33a   : > { %3140 = vpow2.f32 %v2182_v34  ;;  %v3852_v55 = vsub.f32 %v3724_v30, %v2089_v42  ;;  %v3855_v25 = vsub.f32 %v3727_v32, %v2099_v45 }
 0x33b   : > { %3142 = vpow2.f32 %v2188_v47 }
 0x33c   : > { %v3133_v51 = vpop.eup %3132  ;;  %v2194_v27 = vmul.f32 1.442695, %v3855_v25  ;;  %v2184_v58 = vmul.f32 1.442695, %v3852_v55 }
 0x33d   : > { %v2095_v52 = vpop.xlane.xlu1 %2094  ;;  %v2101_v56 = vpop.xlane.xlu0 %2100  ;;  %2238 = vadd.xlane.f32.xlu1 %v3133_v51 }
 0x33e   : > { %v3860_v49 = vsub.f32 %v3732_v43, %v2095_v52  ;;  %v3863_v22 = vsub.f32 %v3735_v36, %v2101_v56  ;;  %3144 = vpow2.f32 %v2194_v27 }
 0x33f   : > { %3146 = vpow2.f32 %v2184_v58 }
 0x340   : > { %v3135_v30 = vpop.eup %3134  ;;  %v2190_v32 = vmul.f32 1.442695, %v3860_v49  ;;  %v2196_v7 = vmul.f32 1.442695, %v3863_v22 }
 0x341   : > { %v3137_v17 = vpop.eup %3136  ;;  %v2097_v26 = vpop.xlane.xlu0 %2096  ;;  %2244 = vadd.xlane.f32.xlu0 %v3135_v30 }
 0x342   : > { %v2107_v0 = vpop.xlane.xlu1 %2106  ;;  %3148 = vpow2.f32 %v2190_v32  ;;  %v3868_v9 = vsub.f32 %v3740_v10, %v2097_v26  ;;  %2250 = vadd.xlane.f32.xlu1 %v3137_v17  ;;  %v3139_v36 = vpop.eup %3138 }
 0x343   : > { %v3871_v43 = vsub.f32 %v3743_v46, %v2107_v0  ;;  %3150 = vpow2.f32 %v2196_v7 }
 0x344   : > { %v3141_v11 = vpop.eup %3140  ;;  %v2192_v23 = vmul.f32 1.442695, %v3868_v9 }
 0x345   : > { %v2202_v16 = vmul.f32 1.442695, %v3871_v43  ;;  %v2109_v29 = vpop.xlane.xlu0 %2108  ;;  %2240 = vadd.xlane.f32.xlu0 %v3139_v36  ;;  %v3143_v46 = vpop.eup %3142 }
 0x346   : > { %v2103_v24 = vpop.xlane.xlu1 %2102  ;;  %v3879_v10 = vsub.f32 %v3751_v41, %v2109_v29  ;;  %2246 = vadd.xlane.f32.xlu1 %v3141_v11 }
 0x347   : > { %v3876_v13 = vsub.f32 %v3748_v14, %v2103_v24  ;;  %3152 = vpow2.f32 %v2202_v16 }
 0x348   : > { %v3145_v33 = vpop.eup %3144  ;;  %3154 = vpow2.f32 %v2192_v23  ;;  %v2204_v19 = vmul.f32 1.442695, %v3879_v10 }
 0x349   : > { %v2198_v28 = vmul.f32 1.442695, %v3876_v13  ;;  %v2105_v35 = vpop.xlane.xlu0 %2104  ;;  %2252 = vadd.xlane.f32.xlu0 %v3143_v46  ;;  %v3147_v41 = vpop.eup %3146 }
 0x34a   : > { %v2115_v37 = vpop.xlane.xlu1 %2114  ;;  %v3884_v39 = vsub.f32 %v3756_v44, %v2105_v35  ;;  %2258 = vadd.xlane.f32.xlu1 %v3145_v33 }
 0x34b   : > { %3156 = vpow2.f32 %v2198_v28  ;;  %v3887_v14 = vsub.f32 %v3759_v48, %v2115_v37 }
 0x34c   : > { %v3149_v2 = vpop.eup %3148  ;;  %v2200_v34 = vmul.f32 1.442695, %v3884_v39  ;;  %3158 = vpow2.f32 %v2204_v19 }
 0x34d   : > { %v2210_v61 = vmul.f32 1.442695, %v3887_v14  ;;  %v2117_v45 = vpop.xlane.xlu0 %2116  ;;  %2248 = vadd.xlane.f32.xlu0 %v3147_v41  ;;  %v3151_v48 = vpop.eup %3150 }
 0x34e   : > { %v2111_v42 = vpop.xlane.xlu1 %2110  ;;  %v3895_v44 = vsub.f32 %v3767_v50, %v2117_v45  ;;  %2254 = vadd.xlane.f32.xlu1 %v3149_v2 }
 0x34f   : > { %v3892_v47 = vsub.f32 %v3764_v54, %v2111_v42  ;;  %3160 = vpow2.f32 %v2210_v61 }
 0x350   : > { %3162 = vpow2.f32 %v2200_v34  ;;  %v2212_v56 = vmul.f32 1.442695, %v3895_v44 }
 0x351   : > { %v2206_v51 = vmul.f32 1.442695, %v3892_v47  ;;  %v3153_v27 = vpop.eup %3152  ;;  %v2113_v58 = vpop.xlane.xlu0 %2112  ;;  %2260 = vadd.xlane.f32.xlu0 %v3151_v48 }
 0x352   : > { %v2123_v52 = vpop.xlane.xlu1 %2122  ;;  %v3900_v30 = vsub.f32 %v3772_v57, %v2113_v58  ;;  %2266 = vadd.xlane.f32.xlu1 %v3153_v27  ;;  %v3155_v50 = vpop.eup %3154 }
 0x353   : > { %3164 = vpow2.f32 %v2206_v51  ;;  %v3903_v54 = vsub.f32 %v3775_v62, %v2123_v52 }
 0x354   : > { %v2208_v26 = vmul.f32 1.442695, %v3900_v30  ;;  %3166 = vpow2.f32 %v2212_v56 }
 0x355   : > { %v3157_v32 = vpop.eup %3156  ;;  %v2218_v17 = vmul.f32 1.442695, %v3903_v54  ;;  %v2125_v7 = vpop.xlane.xlu0 %2124  ;;  %2256 = vadd.xlane.f32.xlu0 %v3155_v50 }
 0x356   : > { %v2119_v0 = vpop.xlane.xlu1 %2118  ;;  %v3911_v57 = vsub.f32 %v3783_v60, %v2125_v7  ;;  %2262 = vadd.xlane.f32.xlu1 %v3157_v32  ;;  %v3159_v62 = vpop.eup %3158 }
 0x357   : > { %v3908_v36 = vsub.f32 %v3780_v59, %v2119_v0  ;;  %3168 = vpow2.f32 %v2218_v17 }
 0x358   : > { %3170 = vpow2.f32 %v2208_v26  ;;  %v2220_v29 = vmul.f32 1.442695, %v3911_v57 }
 0x359   : > { %v2214_v11 = vmul.f32 1.442695, %v3908_v36  ;;  %v3161_v16 = vpop.eup %3160  ;;  %v2121_v23 = vpop.xlane.xlu0 %2120  ;;  %2268 = vadd.xlane.f32.xlu0 %v3159_v62 }
 0x35a   : > { %v2131_v24 = vpop.xlane.xlu1 %2130  ;;  %v3916_v46 = vsub.f32 %v3788_v63, %v2121_v23  ;;  %2274 = vadd.xlane.f32.xlu1 %v3161_v16  ;;  %v3163_v60 = vpop.eup %3162 }
 0x35b   : > { %3172 = vpow2.f32 %v2214_v11  ;;  %v3919_v59 = vsub.f32 %v3791_v12, %v2131_v24 }
 0x35c   : > { %v2216_v35 = vmul.f32 1.442695, %v3916_v46  ;;  %3174 = vpow2.f32 %v2220_v29 }
 0x35d   : > { %v3165_v28 = vpop.eup %3164  ;;  %v2226_v33 = vmul.f32 1.442695, %v3919_v59  ;;  %v2133_v19 = vpop.xlane.xlu0 %2132  ;;  %2264 = vadd.xlane.f32.xlu0 %v3163_v60 }
 0x35e   : > { %v2127_v37 = vpop.xlane.xlu1 %2126  ;;  %v3927_v63 = vsub.f32 %v3799_v3, %v2133_v19  ;;  %2270 = vadd.xlane.f32.xlu1 %v3165_v28  ;;  %v3167_v12 = vpop.eup %3166 }
 0x35f   : > { %v3924_v41 = vsub.f32 %v3796_v4, %v2127_v37  ;;  %3176 = vpow2.f32 %v2226_v33 }
 0x360   : > { %3178 = vpow2.f32 %v2216_v35  ;;  %v2228_v42 = vmul.f32 1.442695, %v3927_v63 }
 0x361   : > { %v2222_v2 = vmul.f32 1.442695, %v3924_v41  ;;  %v3169_v61 = vpop.eup %3168  ;;  %v2129_v34 = vpop.xlane.xlu0 %2128  ;;  %2276 = vadd.xlane.f32.xlu0 %v3167_v12 }
 0x362   : > { %v3932_v45 = vsub.f32 %v3804_v5, %v2129_v34  ;;  %2282 = vadd.xlane.f32.xlu1 %v3169_v61  ;;  %v2135_v4 = vpop.xlane.xlu1 %2134  ;;  %v3171_v48 = vpop.eup %3170 }
 0x363   : > { %3180 = vpow2.f32 %v2222_v2  ;;  %v3935_v3 = vsub.f32 %v3807_v6, %v2135_v4 }
 0x364   : > { %3182 = vpow2.f32 %v2228_v42  ;;  %v2224_v52 = vmul.f32 1.442695, %v3932_v45 }
 0x365   : > { %v3173_v51 = vpop.eup %3172  ;;  %v2230_v27 = vmul.f32 1.442695, %v3935_v3  ;;  %2272 = vadd.xlane.f32.xlu0 %v3171_v48  ;;  %v2137_v58 = vpop.xlane.xlu0 %2136 }
 0x366   : > { %2278 = vadd.xlane.f32.xlu1 %v3173_v51  ;;  %v3940_v56 = vsub.f32 %v3814_v53, %v2137_v58  ;;  %v2139_v5 = vpop.xlane.xlu1 %2138  ;;  %v3175_v32 = vpop.eup %3174 }
 0x367   : > { %3184 = vpow2.f32 %v2230_v27  ;;  %v3943_v50 = vsub.f32 %v3818_v15, %v2139_v5 }
 0x368   : > { %3186 = vpow2.f32 %v2224_v52  ;;  %v2232_v0 = vmul.f32 1.442695, %v3940_v56 }
 0x369   : > { %v3177_v6 = vpop.eup %3176  ;;  %v2234_v17 = vmul.f32 1.442695, %v3943_v50  ;;  %2284 = vadd.xlane.f32.xlu0 %v3175_v32  ;;  %v2141_v26 = vpop.xlane.xlu0 %2140 }
 0x36a   : > { %2290 = vadd.xlane.f32.xlu1 %v3177_v6  ;;  %v3948_v7 = vsub.f32 %v3810_v8, %v2141_v26  ;;  %v3179_v53 = vpop.eup %3178 }
 0x36b   : > { %3188 = vpow2.f32 %v2234_v17 }
 0x36c   : > { %3190 = vpow2.f32 %v2232_v0  ;;  %v2236_v15 = vmul.f32 1.442695, %v3948_v7 }
 0x36d   : > { %v3181_v62 = vpop.eup %3180  ;;  %2280 = vadd.xlane.f32.xlu0 %v3179_v53 }
 0x36e   : > { %2286 = vadd.xlane.f32.xlu1 %v3181_v62  ;;  %v3183_v11 = vpop.eup %3182  ;;  %3192 = vpow2.f32 %v2236_v15 }
 0x371   : > { %v3185_v16 = vpop.eup %3184  ;;  %2292 = vadd.xlane.f32.xlu0 %v3183_v11 }
 0x372   : > { %2294 = vadd.xlane.f32.xlu1 %v3185_v16  ;;  %v3187_v23 = vpop.eup %3186 }
 0x375   : > { %v3189_v24 = vpop.eup %3188  ;;  %2288 = vadd.xlane.f32.xlu0 %v3187_v23 }
 0x376   : > { %2298 = vadd.xlane.f32.xlu1 %v3189_v24  ;;  %v3191_v8 = vpop.eup %3190 }
 0x378   : > { %v3193_v29 = vpop.eup %3192 }
 0x379   : > { %2296 = vadd.xlane.f32.xlu0 %v3191_v8 }
 0x37d   : > { %2300 = vadd.xlane.f32.xlu0 %v3193_v29 }
 0x3c6   : > { %v2243_v60 = vpop.xlane.xlu1 %2242 }
 0x3c7   : > { %3194 = vlog2.f32 %v2243_v60 }
 0x3ca   : > { %v2239_v28 = vpop.xlane.xlu1 %2238 }
 0x3cb   : > { %3196 = vlog2.f32 %v2239_v28 }
 0x3ce   : > { %v2245_v33 = vpop.xlane.xlu0 %2244 }
 0x3cf   : > { %v2251_v35 = vpop.xlane.xlu1 %2250  ;;  %3198 = vlog2.f32 %v2245_v33 }
 0x3d0   : > { %3200 = vlog2.f32 %v2251_v35 }
 0x3d1   : > { %v3195_v37 = vpop.eup %3194 }
 0x3d2   : > { %v2307_v19 = vmul.f32 0.6931472, %v3195_v37  ;;  %v2241_v12 = vpop.xlane.xlu0 %2240 }
 0x3d3   : > { %v2247_v2 = vpop.xlane.xlu1 %2246  ;;  %3202 = vlog2.f32 %v2241_v12 }
 0x3d4   : > { %v2368_v61 = vsub.f32 %v3824_v20, %v2307_v19  ;;  %3204 = vlog2.f32 %v2247_v2 }
 0x3d5   : > { %v3197_v34 = vpop.eup %3196 }
 0x3d6   : > { %2400 = vst [vmem:[%s3956_s30 + $0x10] sm:$0xff] %v2368_v61  ;;  %v2303_v42 = vmul.f32 0.6931472, %v3197_v34  ;;  %v2253_v4 = vpop.xlane.xlu0 %2252 }
 0x3d7   : > { %v2259_v48 = vpop.xlane.xlu1 %2258  ;;  %3206 = vlog2.f32 %v2253_v4 }
 0x3d8   : > { %v2366_v51 = vsub.f32 %v3828_v38, %v2303_v42  ;;  %3208 = vlog2.f32 %v2259_v48 }
 0x3d9   : > { %v3199_v27 = vpop.eup %3198 }
 0x3da   : > { %v3201_v58 = vpop.eup %3200  ;;  %2398 = vst [vmem:[%s3956_s30] sm:$0xff] %v2366_v51  ;;  %v2309_v52 = vmul.f32 0.6931472, %v3199_v27  ;;  %v2249_v5 = vpop.xlane.xlu0 %2248 }
 0x3db   : > { %v2315_v32 = vmul.f32 0.6931472, %v3201_v58  ;;  %v2255_v6 = vpop.xlane.xlu1 %2254  ;;  %3210 = vlog2.f32 %v2249_v5 }
 0x3dc   : > { %v2369_v20 = vsub.f32 %v3835_v31, %v2309_v52  ;;  %3212 = vlog2.f32 %v2255_v6 }
 0x3dd   : > { %v3203_v17 = vpop.eup %3202  ;;  %v2372_v26 = vsub.f32 %v3838_v18, %v2315_v32 }
 0x3de   : > { %v3205_v0 = vpop.eup %3204  ;;  %2401 = vst [vmem:[%s3956_s30 + $0x18] sm:$0xff] %v2369_v20  ;;  %v2305_v38 = vmul.f32 0.6931472, %v3203_v17  ;;  %v2261_v53 = vpop.xlane.xlu0 %2260 }
 0x3df   : > { %2404 = vst [vmem:[%s3956_s30 + $0x30] sm:$0xff] %v2372_v26  ;;  %v2311_v62 = vmul.f32 0.6931472, %v3205_v0  ;;  %v2267_v15 = vpop.xlane.xlu1 %2266  ;;  %3214 = vlog2.f32 %v2261_v53 }
 0x3e0   : > { %v2367_v11 = vsub.f32 %v3832_v1, %v2305_v38  ;;  %3216 = vlog2.f32 %v2267_v15 }
 0x3e1   : > { %v3207_v16 = vpop.eup %3206  ;;  %v2370_v31 = vsub.f32 %v3844_v21, %v2311_v62 }
 0x3e2   : > { %v3209_v23 = vpop.eup %3208  ;;  %2399 = vst [vmem:[%s3956_s30 + $0x8] sm:$0xff] %v2367_v11  ;;  %v2317_v18 = vmul.f32 0.6931472, %v3207_v16  ;;  %v2257_v24 = vpop.xlane.xlu0 %2256 }
 0x3e3   : > { %2402 = vst [vmem:[%s3956_s30 + $0x20] sm:$0xff] %v2370_v31  ;;  %v2323_v8 = vmul.f32 0.6931472, %v3209_v23  ;;  %v2263_v29 = vpop.xlane.xlu1 %2262  ;;  %3218 = vlog2.f32 %v2257_v24 }
 0x3e4   : > { %v2373_v60 = vsub.f32 %v3847_v40, %v2317_v18  ;;  %3220 = vlog2.f32 %v2263_v29 }
 0x3e5   : > { %v3211_v28 = vpop.eup %3210  ;;  %v2376_v1 = vsub.f32 %v3855_v25, %v2323_v8 }
 0x3e6   : > { %v3213_v33 = vpop.eup %3212  ;;  %2405 = vst [vmem:[%s3956_s30 + $0x38] sm:$0xff] %v2373_v60  ;;  %v2313_v21 = vmul.f32 0.6931472, %v3211_v28  ;;  %v2269_v35 = vpop.xlane.xlu0 %2268 }
 0x3e7   : > { %2408 = vst [vmem:[%s3956_s30 + $0x50] sm:$0xff] %v2376_v1  ;;  %v2319_v37 = vmul.f32 0.6931472, %v3213_v33  ;;  %v2275_v19 = vpop.xlane.xlu1 %2274  ;;  %3222 = vlog2.f32 %v2269_v35 }
 0x3e8   : > { %v2371_v12 = vsub.f32 %v3852_v55, %v2313_v21  ;;  %3224 = vlog2.f32 %v2275_v19 }
 0x3e9   : > { %v3215_v2 = vpop.eup %3214  ;;  %v2374_v40 = vsub.f32 %v3860_v49, %v2319_v37 }
 0x3ea   : > { %v3217_v61 = vpop.eup %3216  ;;  %2403 = vst [vmem:[%s3956_s30 + $0x28] sm:$0xff] %v2371_v12  ;;  %v2325_v25 = vmul.f32 0.6931472, %v3215_v2  ;;  %v2265_v34 = vpop.xlane.xlu0 %2264 }
 0x3eb   : > { %2406 = vst [vmem:[%s3956_s30 + $0x40] sm:$0xff] %v2374_v40  ;;  %v2331_v42 = vmul.f32 0.6931472, %v3217_v61  ;;  %v2271_v4 = vpop.xlane.xlu1 %2270  ;;  %3226 = vlog2.f32 %v2265_v34 }
 0x3ec   : > { %v2377_v48 = vsub.f32 %v3863_v22, %v2325_v25  ;;  %3228 = vlog2.f32 %v2271_v4 }
 0x3ed   : > { %v3219_v51 = vpop.eup %3218  ;;  %v2380_v55 = vsub.f32 %v3871_v43, %v2331_v42 }
 0x3ee   : > { %v3221_v27 = vpop.eup %3220  ;;  %2409 = vst [vmem:[%s3956_s30 + $0x58] sm:$0xff] %v2377_v48  ;;  %v2321_v49 = vmul.f32 0.6931472, %v3219_v51  ;;  %v2277_v58 = vpop.xlane.xlu0 %2276 }
 0x3ef   : > { %2412 = vst [vmem:[%s3956_s30 + $0x70] sm:$0xff] %v2380_v55  ;;  %v2327_v52 = vmul.f32 0.6931472, %v3221_v27  ;;  %v2283_v5 = vpop.xlane.xlu1 %2282  ;;  %3230 = vlog2.f32 %v2277_v58 }
 0x3f0   : > { %v2375_v32 = vsub.f32 %v3868_v9, %v2321_v49  ;;  %3232 = vlog2.f32 %v2283_v5 }
 0x3f1   : > { %v3223_v6 = vpop.eup %3222  ;;  %v2378_v22 = vsub.f32 %v3876_v13, %v2327_v52 }
 0x3f2   : > { %v3225_v20 = vpop.eup %3224  ;;  %2407 = vst [vmem:[%s3956_s30 + $0x48] sm:$0xff] %v2375_v32  ;;  %v2333_v43 = vmul.f32 0.6931472, %v3223_v6  ;;  %v2273_v17 = vpop.xlane.xlu0 %2272 }
 0x3f3   : > { %2410 = vst [vmem:[%s3956_s30 + $0x60] sm:$0xff] %v2378_v22  ;;  %v2339_v26 = vmul.f32 0.6931472, %v3225_v20  ;;  %v2279_v0 = vpop.xlane.xlu1 %2278  ;;  %3234 = vlog2.f32 %v2273_v17 }
 0x3f4   : > { %v2381_v38 = vsub.f32 %v3879_v10, %v2333_v43  ;;  %3236 = vlog2.f32 %v2279_v0 }
 0x3f5   : > { %v3227_v53 = vpop.eup %3226  ;;  %v2384_v9 = vsub.f32 %v3887_v14, %v2339_v26 }
 0x3f6   : > { %v3229_v62 = vpop.eup %3228  ;;  %2413 = vst [vmem:[%s3956_s30 + $0x78] sm:$0xff] %v2381_v38  ;;  %v2329_v13 = vmul.f32 0.6931472, %v3227_v53  ;;  %v2285_v15 = vpop.xlane.xlu0 %2284 }
 0x3f7   : > { %2416 = vst [vmem:[%s3956_s30 + $0x90] sm:$0xff] %v2384_v9  ;;  %v2335_v11 = vmul.f32 0.6931472, %v3229_v62  ;;  %v2291_v16 = vpop.xlane.xlu1 %2290  ;;  %3238 = vlog2.f32 %v2285_v15 }
 0x3f8   : > { %v2379_v31 = vsub.f32 %v3884_v39, %v2329_v13  ;;  %3240 = vlog2.f32 %v2291_v16 }
 0x3f9   : > { %v3231_v23 = vpop.eup %3230  ;;  %v2382_v10 = vsub.f32 %v3892_v47, %v2335_v11 }
 0x3fa   : > { %v3233_v18 = vpop.eup %3232  ;;  %2411 = vst [vmem:[%s3956_s30 + $0x68] sm:$0xff] %v2379_v31  ;;  %v2341_v14 = vmul.f32 0.6931472, %v3231_v23  ;;  %v2281_v24 = vpop.xlane.xlu0 %2280 }
 0x3fb   : > { %2414 = vst [vmem:[%s3956_s30 + $0x80] sm:$0xff] %v2382_v10  ;;  %v2347_v8 = vmul.f32 0.6931472, %v3233_v18  ;;  %v2287_v29 = vpop.xlane.xlu1 %2286  ;;  %3242 = vlog2.f32 %v2281_v24 }
 0x3fc   : > { %v2385_v60 = vsub.f32 %v3895_v44, %v2341_v14  ;;  %3244 = vlog2.f32 %v2287_v29 }
 0x3fd   : > { %v3235_v28 = vpop.eup %3234  ;;  %v2388_v39 = vsub.f32 %v3903_v54, %v2347_v8 }
 0x3fe   : > { %v3237_v1 = vpop.eup %3236  ;;  %2417 = vst [vmem:[%s3956_s30 + $0x98] sm:$0xff] %v2385_v60  ;;  %v2337_v47 = vmul.f32 0.6931472, %v3235_v28  ;;  %v2293_v33 = vpop.xlane.xlu0 %2292 }
 0x3ff   : > { %2420 = vst [vmem:[%s3956_s30 + $0xb0] sm:$0xff] %v2388_v39  ;;  %v2343_v21 = vmul.f32 0.6931472, %v3237_v1  ;;  %3246 = vlog2.f32 %v2293_v33  ;;  %v2295_v35 = vpop.xlane.xlu1 %2294 }
 0x400   : > { %v2383_v37 = vsub.f32 %v3900_v30, %v2337_v47  ;;  %3248 = vlog2.f32 %v2295_v35 }
 0x401   : > { %v3239_v19 = vpop.eup %3238  ;;  %v2386_v44 = vsub.f32 %v3908_v36, %v2343_v21 }
 0x402   : > { %v3241_v12 = vpop.eup %3240  ;;  %2415 = vst [vmem:[%s3956_s30 + $0x88] sm:$0xff] %v2383_v37  ;;  %v2349_v54 = vmul.f32 0.6931472, %v3239_v19  ;;  %v2289_v2 = vpop.xlane.xlu0 %2288 }
 0x403   : > { %2418 = vst [vmem:[%s3956_s30 + $0xa0] sm:$0xff] %v2386_v44  ;;  %v2355_v40 = vmul.f32 0.6931472, %v3241_v12  ;;  %3250 = vlog2.f32 %v2289_v2  ;;  %v2299_v61 = vpop.xlane.xlu1 %2298 }
 0x404   : > { %v2389_v25 = vsub.f32 %v3911_v57, %v2349_v54  ;;  %3252 = vlog2.f32 %v2299_v61 }
 0x405   : > { %v3243_v34 = vpop.eup %3242  ;;  %v2392_v30 = vsub.f32 %v3919_v59, %v2355_v40 }
 0x406   : > { %v3245_v42 = vpop.eup %3244  ;;  %2421 = vst [vmem:[%s3956_s30 + $0xb8] sm:$0xff] %v2389_v25  ;;  %v2345_v36 = vmul.f32 0.6931472, %v3243_v34  ;;  %v2297_v4 = vpop.xlane.xlu0 %2296 }
 0x407   : > { %2424 = vst [vmem:[%s3956_s30 + $0xd0] sm:$0xff] %v2392_v30  ;;  %v2351_v48 = vmul.f32 0.6931472, %v3245_v42  ;;  %3254 = vlog2.f32 %v2297_v4 }
 0x408   : > { %v2387_v51 = vsub.f32 %v3916_v46, %v2345_v36 }
 0x409   : > { %v3247_v55 = vpop.eup %3246  ;;  %v2390_v27 = vsub.f32 %v3924_v41, %v2351_v48 }
 0x40a   : > { %v3249_v57 = vpop.eup %3248  ;;  %2419 = vst [vmem:[%s3956_s30 + $0xa8] sm:$0xff] %v2387_v51  ;;  %v2357_v49 = vmul.f32 0.6931472, %v3247_v55  ;;  %v2301_v58 = vpop.xlane.xlu0 %2300 }
 0x40b   : > { %2422 = vst [vmem:[%s3956_s30 + $0xc0] sm:$0xff] %v2390_v27  ;;  %v2359_v59 = vmul.f32 0.6931472, %v3249_v57  ;;  %3256 = vlog2.f32 %v2301_v58 }
 0x40c   : > { %v2393_v52 = vsub.f32 %v3927_v63, %v2357_v49 }
 0x40d   : > { %v3251_v5 = vpop.eup %3250  ;;  %v2394_v32 = vsub.f32 %v3935_v3, %v2359_v59 }
 0x40e   : > { %v3253_v46 = vpop.eup %3252  ;;  %2425 = vst [vmem:[%s3956_s30 + $0xd8] sm:$0xff] %v2393_v52  ;;  %v2353_v6 = vmul.f32 0.6931472, %v3251_v5 }
 0x40f   : > { %2426 = vst [vmem:[%s3956_s30 + $0xe0] sm:$0xff] %v2394_v32  ;;  %v2363_v41 = vmul.f32 0.6931472, %v3253_v46 }
 0x410   : > { %v2391_v22 = vsub.f32 %v3932_v45, %v2353_v6 }
 0x411   : > { %v3255_v20 = vpop.eup %3254  ;;  %v2396_v43 = vsub.f32 %v3943_v50, %v2363_v41 }
 0x412   : > { %2423 = vst [vmem:[%s3956_s30 + $0xc8] sm:$0xff] %v2391_v22  ;;  %v2361_v17 = vmul.f32 0.6931472, %v3255_v20 }
 0x413   : > { %2428 = vst [vmem:[%s3956_s30 + $0xf0] sm:$0xff] %v2396_v43 }
 0x414   : > { %v2395_v63 = vsub.f32 %v3940_v56, %v2361_v17 }
 0x415   : > { %v3257_v26 = vpop.eup %3256 }
 0x416   : > { %2427 = vst [vmem:[%s3956_s30 + $0xe8] sm:$0xff] %v2395_v63  ;;  %v2365_v0 = vmul.f32 0.6931472, %v3257_v26 }
 0x418   : > { %v2397_v3 = vsub.f32 %v3948_v7, %v2365_v0 }
 0x41a   : > { %2429 = vst [vmem:[%s3956_s30 + $0xf8] sm:$0xff] %v2397_v3 }
 0x41b PF: > { %s17_s26 = sadd.s32 1, %s3280_s26   ;;  %s4039_s24 = smov %s3276_s25 }
 0x41c   : > { %p14_p6 = scmp.ge.s32.totalorder %s17_s26, 4   ;;  %s4040_s25 = smov %s4042_s27 }
 0x41e   :  { %16 = sbr.rel (!%p14_p6) target bundleno = 2 (0x2), region = 95 }

</bundles_post_ra>
